<compile_context>
chip_gen: v6e
topology: v6e:2x2x1
jax: 0.10.0
libtpu: 0.0.40
codegen_flags: <defaults>
</compile_context>

<pallas_src>
import functools

import jax
import jax.numpy as jnp
from jax import lax
from jax.experimental import pallas as pl
from jax.experimental.pallas import tpu as pltpu

_LANE = 128
_VMEM = pl.BlockSpec(memory_space=pltpu.MemorySpace.VMEM)


def _round_up(x, m):
    return ((x + m - 1) // m) * m


# -----------------------------------------------------------------------------
# Kernel A: fused dual-LSTM recurrence (que + concept), gates pre-projected.
#   gx*_ref : (T, B, 4*HP)  = x @ W_ih + (b_ih + b_hh), time-major, gate-padded
#   whh*_ref: (HP, 4*HP)    = W_hh^T, zero-padded to 128-lane gate slots
#   h*_ref  : (T, B, HP)    hidden states (padded lanes stay exactly 0)
# -----------------------------------------------------------------------------
def _dual_lstm_kernel(gxq_ref, gxc_ref, whhq_ref, whhc_ref, hq_ref, hc_ref):
    T, B, _ = gxq_ref.shape
    HP = whhq_ref.shape[0]
    whq = whhq_ref[...]          # hoisted weight loads (reused every step)
    whc = whhc_ref[...]

    def cell(gates, c_prev):     # PyTorch gate order i, f, g, o
        i_g = jax.nn.sigmoid(gates[:, 0 * HP:1 * HP])
        f_g = jax.nn.sigmoid(gates[:, 1 * HP:2 * HP])
        g_g = jnp.tanh(gates[:, 2 * HP:3 * HP])
        o_g = jax.nn.sigmoid(gates[:, 3 * HP:4 * HP])
        c_new = f_g * c_prev + i_g * g_g
        h_new = o_g * jnp.tanh(c_new)
        return h_new, c_new

    def body(t, carry):
        hq, cq, hc, cc = carry
        # Two independent recurrences interleaved -> their MXU ops overlap.
        gq = gxq_ref[t] + jnp.dot(hq, whq, preferred_element_type=jnp.float32)
        gc = gxc_ref[t] + jnp.dot(hc, whc, preferred_element_type=jnp.float32)
        hq, cq = cell(gq, cq)
        hc, cc = cell(gc, cc)
        hq_ref[t] = hq           # (B, 128) lane-dense VMEM store
        hc_ref[t] = hc
        return hq, cq, hc, cc

    z = jnp.zeros((B, HP), jnp.float32)
    lax.fori_loop(0, T, body, (z, z, z, z), unroll=True)


def dual_lstm_pallas(gxq, gxc, whh_q, whh_c):
    T, B, _ = gxq.shape
    HP = whh_q.shape[0]
    out_sds = jax.ShapeDtypeStruct((T, B, HP), jnp.float32)
    return pl.pallas_call(
        _dual_lstm_kernel,
        out_shape=(out_sds, out_sds),
        in_specs=[_VMEM] * 4,
        out_specs=(_VMEM, _VMEM),
    )(gxq, gxc, whh_q, whh_c)


# -----------------------------------------------------------------------------
# Kernel B: all four MLP heads fused, one lane-dense packed output (N, 128).
#   col 0: y_question_next, col 1: y_question_all,
#   col 2: y_concept_next,  col 3: y_concept_all, cols 4.. : 0
# -----------------------------------------------------------------------------
def _heads_kernel(eqc_ref, qh_ref, ch_ref,
                  qn_w1e_ref, qn_w1h_ref, qn_b1_ref, qn_wo_ref, qn_bo_ref,
                  qa_w1_ref, qa_b1_ref, qa_wog_ref, qa_bog_ref,
                  cn_w1e_ref, cn_w1h_ref, cn_b1_ref, cn_wo_ref, cn_bo_ref,
                  ca_w1_ref, ca_b1_ref, ca_wo_ref, ca_bo_ref,
                  cmask_ref, ccnt_ref, out_ref):
    f32 = jnp.float32
    eqc = eqc_ref[...]           # (N, 2E)  = emb_qc_shift
    qh = qh_ref[...]             # (N, HP)  = que_h   (dropout = identity)
    ch = ch_ref[...]             # (N, HP)  = concept_h

    # y_question_next: sigmoid(MLP([emb_qc_shift ; que_h])) with W1 split.
    h1 = jnp.maximum(
        jnp.dot(eqc, qn_w1e_ref[...], preferred_element_type=f32)
        + jnp.dot(qh, qn_w1h_ref[...], preferred_element_type=f32)
        + qn_b1_ref[...], 0.0)
    y_qn = jax.nn.sigmoid(
        jnp.dot(h1, qn_wo_ref[...], preferred_element_type=f32) + qn_bo_ref[...])

    # y_question_all: per-row gathered output column (no (N, num_q) logits;
    # one_hot-select commutes with sigmoid since exactly one column survives).
    h2 = jnp.maximum(
        jnp.dot(qh, qa_w1_ref[...], preferred_element_type=f32) + qa_b1_ref[...], 0.0)
    y_qa = jax.nn.sigmoid(
        jnp.sum(h2 * qa_wog_ref[...], axis=-1, keepdims=True) + qa_bog_ref[...])

    # Concept heads share one multi-hot fusion mask / count (precomputed).
    cmask = cmask_ref[...]                       # (N, num_c) multi-hot (with dup counts)
    denom = jnp.maximum(ccnt_ref[...], 1.0)      # (N, 1)

    h3 = jnp.maximum(
        jnp.dot(eqc, cn_w1e_ref[...], preferred_element_type=f32)
        + jnp.dot(ch, cn_w1h_ref[...], preferred_element_type=f32)
        + cn_b1_ref[...], 0.0)
    y_cn_full = jax.nn.sigmoid(
        jnp.dot(h3, cn_wo_ref[...], preferred_element_type=f32) + cn_bo_ref[...])
    y_cn = jnp.sum(y_cn_full * cmask, axis=-1, keepdims=True) / denom

    h4 = jnp.maximum(
        jnp.dot(ch, ca_w1_ref[...], preferred_element_type=f32) + ca_b1_ref[...], 0.0)
    y_ca_full = jax.nn.sigmoid(
        jnp.dot(h4, ca_wo_ref[...], preferred_element_type=f32) + ca_bo_ref[...])
    y_ca = jnp.sum(y_ca_full * cmask, axis=-1, keepdims=True) / denom

    # Pack into one full-width (unmasked) store.
    col = lax.broadcasted_iota(jnp.int32, out_ref.shape, 1)
    out_ref[...] = jnp.where(col == 0, y_qn,
                   jnp.where(col == 1, y_qa,
                   jnp.where(col == 2, y_cn,
                   jnp.where(col == 3, y_ca, 0.0))))


def heads_pallas(eqc, qh, ch, qn, qa, cn, ca, cmask, ccnt):
    N = qh.shape[0]
    args = (eqc, qh, ch, *qn, *qa, *cn, *ca, cmask, ccnt)
    return pl.pallas_call(
        _heads_kernel,
        out_shape=jax.ShapeDtypeStruct((N, _LANE), jnp.float32),
        in_specs=[_VMEM] * len(args),
        out_specs=_VMEM,
    )(*args)


# -----------------------------------------------------------------------------
# Parameter layout preparation (plain JAX; constant-folded under jit since
# params are closure constants)
# -----------------------------------------------------------------------------
def _pad_lstm_params(w_ih, w_hh, b_ih, b_hh, *, H, HP):
    """torch (4H,Din)/(4H,H)/(4H,) -> matmul layout with 128-lane gate slots."""
    def pad_gate_cols(wT):                     # (rows, 4H) -> (rows, 4*HP)
        rows = wT.shape[0]
        w = wT.reshape(rows, 4, H)
        return jnp.pad(w, ((0, 0), (0, 0), (0, HP - H))).reshape(rows, 4 * HP)

    wih = pad_gate_cols(w_ih.T)                                    # (Din, 4*HP)
    whh = jnp.pad(pad_gate_cols(w_hh.T), ((0, HP - H), (0, 0)))    # (HP, 4*HP)
    b = jnp.pad((b_ih + b_hh).reshape(4, H), ((0, 0), (0, HP - H)))
    return wih, whh, b.reshape(1, 4 * HP)


def _prep_next_head(p, E, H, HP):
    """MLP over concat([emb_qc_shift(2E); h(H)]): split W1, pad to lane tiles."""
    hid = p['w1'].shape[0]                     # 3H
    HH = _round_up(hid, _LANE)
    w1T = p['w1'].T                            # (3H_in, 3H_out)
    w1e = jnp.pad(w1T[:2 * E, :], ((0, 0), (0, HH - hid)))         # (2E, HH)
    w1h = jnp.pad(w1T[2 * E:, :], ((0, HP - H), (0, HH - hid)))    # (HP, HH)
    b1 = jnp.pad(p['b1'], (0, HH - hid))[None, :]
    wo = jnp.pad(p['wo'].T, ((0, HH - hid), (0, 0)))               # (HH, out)
    bo = p['bo'][None, :]
    return w1e, w1h, b1, wo, bo


def _prep_all_head(p, H, HP):
    hid = p['w1'].shape[0]                     # H
    HH = _round_up(hid, _LANE)
    w1 = jnp.pad(p['w1'].T, ((0, HP - H), (0, HH - hid)))          # (HP, HH)
    b1 = jnp.pad(p['b1'], (0, HH - hid))[None, :]
    wo = jnp.pad(p['wo'].T, ((0, HH - hid), (0, 0)))               # (HH, out)
    bo = p['bo'][None, :]
    return w1, b1, wo, bo


def _prep_gather_head(p, H, HP, idx):
    """out_question_all: gather the single wo row per qshft (skip full logits)."""
    hid = p['w1'].shape[0]
    HH = _round_up(hid, _LANE)
    w1 = jnp.pad(p['w1'].T, ((0, HP - H), (0, HH - hid)))          # (HP, HH)
    b1 = jnp.pad(p['b1'], (0, HH - hid))[None, :]
    wog = jnp.pad(p['wo'], ((0, 0), (0, HH - hid)))[idx]           # (N, HH)
    bog = p['bo'][idx][:, None]                                    # (N, 1)
    return w1, b1, wog, bog


# -----------------------------------------------------------------------------
# QueEmb (embedding lookups) -- plain JAX glue
# -----------------------------------------------------------------------------
def que_emb_forward(params, q, c, r):
    E = params['que_emb'].shape[1]
    emb_q = params['que_emb'][q]                                   # (B,L,E)
    concept_cat = jnp.concatenate(
        [jnp.zeros((1, E), jnp.float32), params['concept_emb']], axis=0)
    related = (c + 1).astype(jnp.int32)                            # -1 -> 0 (pad row)
    emb_sum = concept_cat[related].sum(axis=-2)                    # (B,L,E)
    num = (related != 0).astype(jnp.int32).sum(axis=-1, keepdims=True)
    num = jnp.where(num == 0, 1, num)
    emb_c = emb_sum / num.astype(jnp.float32)                      # avg skill emb
    # pykt QueEmb: que_c_emb = cat([concept_avg, que_emb], dim=-1)
    emb_qc = jnp.concatenate([emb_c, emb_q], axis=-1)              # (B,L,2E)
    rf = r.astype(jnp.float32)[..., None]
    emb_qca = jnp.concatenate([emb_qc * (1.0 - rf), emb_qc * rf], axis=-1)  # (B,L,4E)
    # TODO(synk): QueEmb also builds an interaction embedding (xemb); it is
    # discarded by QIKTNet.forward (`_`), so it is omitted here.
    return emb_qca, emb_qc, emb_q, emb_c


# -----------------------------------------------------------------------------
# QIKTNet forward
# -----------------------------------------------------------------------------
def qikt_forward(params, q, c, r, data):
    emb_qca, emb_qc, emb_q, emb_c = que_emb_forward(params, q, c, r)
    E = params['que_emb'].shape[1]
    H = E                                      # hidden_size == emb_size
    HP = _round_up(H, _LANE)
    num_c = params['concept_emb'].shape[0]

    emb_qc_shift = emb_qc[:, 1:, :]            # (B, T, 2E)
    emb_qca_current = emb_qca[:, :-1, :]       # (B, T, 4E)
    rf = r.astype(jnp.float32)[..., None]
    emb_ca = jnp.concatenate([emb_c * (1.0 - rf), emb_c * rf], axis=-1)
    emb_ca_current = emb_ca[:, :-1, :]         # (B, T, 2E)

    B, T, _ = emb_qca_current.shape
    N = B * T

    # --- padded LSTM parameters + hoisted input projections (one matmul each)
    wih_q, whh_q, b_q = _pad_lstm_params(*params['que_lstm'], H=H, HP=HP)
    wih_c, whh_c, b_c = _pad_lstm_params(*params['concept_lstm'], H=H, HP=HP)
    gxq = jnp.transpose(jnp.dot(emb_qca_current, wih_q) + b_q, (1, 0, 2))  # (T,B,4HP)
    gxc = jnp.transpose(jnp.dot(emb_ca_current, wih_c) + b_c, (1, 0, 2))

    # --- fused dual-LSTM recurrence (dropout = identity in eval mode)
    hq_t, hc_t = dual_lstm_pallas(gxq, gxc, whh_q, whh_c)          # (T,B,HP) each
    qh = jnp.transpose(hq_t, (1, 0, 2)).reshape(N, HP)
    ch = jnp.transpose(hc_t, (1, 0, 2)).reshape(N, HP)
    eqc = emb_qc_shift.reshape(N, 2 * E)

    qshft = data['qshft'].reshape(N).astype(jnp.int32)
    cshft = data['cshft'].reshape(N, -1).astype(jnp.int32)

    # --- head parameters (padded / split / gathered)
    qn = _prep_next_head(params['out_question_next'], E, H, HP)
    cn = _prep_next_head(params['out_concept_next'], E, H, HP)
    qa = _prep_gather_head(params['out_question_all'], H, HP, qshft)
    ca = _prep_all_head(params['out_concept_all'], H, HP)

    # shared multi-hot fusion mask / counts for get_avg_fusion_concepts
    valid = cshft != -1
    cmask = (jax.nn.one_hot(jnp.where(valid, cshft, 0), num_c, dtype=jnp.float32)
             * valid[..., None].astype(jnp.float32)).sum(axis=1)   # (N, num_c)
    ccnt = valid.sum(axis=-1, keepdims=True).astype(jnp.float32)   # (N, 1)

    packed = heads_pallas(eqc, qh, ch, qn, qa, cn, ca, cmask, ccnt)  # (N, 128)
    y = packed[:, :4].reshape(B, T, 4)
    return {
        'y_question_next': y[..., 0],
        'y_question_all': y[..., 1],
        'y_concept_next': y[..., 2],
        'y_concept_all': y[..., 3],
    }


# -----------------------------------------------------------------------------
# Deterministic parameter construction (torch-style layouts)
# -----------------------------------------------------------------------------
def init_params(key, num_q, num_c, emb_size):
    H = emb_size
    ks = list(jax.random.split(key, 24))
    nrm = lambda k, shape, s=0.1: (s * jax.random.normal(k, shape)).astype(jnp.float32)

    def lstm_params(k, din, h):
        k1, k2, k3, k4 = jax.random.split(k, 4)
        return (nrm(k1, (4 * h, din)), nrm(k2, (4 * h, h)),
                nrm(k3, (4 * h,)), nrm(k4, (4 * h,)))

    def mlp_params(k, hidden, out):
        k1, k2, k3, k4 = jax.random.split(k, 4)
        return {'w1': nrm(k1, (hidden, hidden)), 'b1': nrm(k2, (hidden,)),
                'wo': nrm(k3, (out, hidden)), 'bo': nrm(k4, (out,))}

    return {
        'que_emb': nrm(ks[0], (num_q, emb_size), 1.0),
        'concept_emb': nrm(ks[1], (num_c, emb_size), 1.0),
        'que_lstm': lstm_params(ks[2], 4 * emb_size, H),
        'concept_lstm': lstm_params(ks[3], 2 * emb_size, H),
        'out_question_next': mlp_params(ks[4], 3 * H, 1),
        'out_question_all': mlp_params(ks[5], H, num_q),
        'out_concept_next': mlp_params(ks[6], 3 * H, num_c),
        'out_concept_all': mlp_params(ks[7], H, num_c),
        # TODO(synk): que_disc MLP exists in __init__ but is unused in forward.
    }


# -----------------------------------------------------------------------------
# Main
# -----------------------------------------------------------------------------
if __name__ == "__main__":
    num_q, num_c, emb_size = 32, 16, 32
    B, L, K = 2, 8, 3                       # batch, seq len, max concepts/step

    key = jax.random.PRNGKey(0)
    kp, kq, kc, kr, kqs, kcs = jax.random.split(key, 6)

    params = init_params(kp, num_q, num_c, emb_size)

    q = jax.random.randint(kq, (B, L), 0, num_q, dtype=jnp.int32)
    c = jax.random.randint(kc, (B, L, K), -1, num_c, dtype=jnp.int32)   # -1 = pad
    r = jax.random.randint(kr, (B, L), 0, 2, dtype=jnp.int32)
    data = {
        'qshft': jax.random.randint(kqs, (B, L - 1), 0, num_q, dtype=jnp.int32),
        'cshft': jax.random.randint(kcs, (B, L - 1, K), -1, num_c, dtype=jnp.int32),
    }

    fwd = jax.jit(functools.partial(qikt_forward, params))
    outputs = fwd(q, c, r, data)
    jax.block_until_ready(outputs)

    assert outputs['y_question_next'].shape == (B, L - 1)
    assert outputs['y_question_all'].shape == (B, L - 1)
    assert outputs['y_concept_next'].shape == (B, L - 1)
    assert outputs['y_concept_all'].shape == (B, L - 1)
    print("KERNEL_OK")
</pallas_src>

<mosaic_0001>
module attributes {stable_mosaic.version = 11 : i64} {
  func.func @_dual_lstm_kernel(%arg0: memref<7x2x512xf32, #tpu.memory_space<vmem>>, %arg1: memref<7x2x512xf32, #tpu.memory_space<vmem>>, %arg2: memref<128x512xf32, #tpu.memory_space<vmem>>, %arg3: memref<128x512xf32, #tpu.memory_space<vmem>>, %arg4: memref<7x2x128xf32, #tpu.memory_space<vmem>>, %arg5: memref<7x2x128xf32, #tpu.memory_space<vmem>>) attributes {dimension_semantics = [], scalar_prefetch = 0 : i64, scratch_operands = 0 : i64, tpu.core_type = #tpu.core_type<tc>} {
    %c0 = arith.constant 0 : index
    %c0_0 = arith.constant 0 : index
    %0 = vector.load %arg2[%c0, %c0_0] : memref<128x512xf32, #tpu.memory_space<vmem>>, vector<128x512xf32>
    %c0_1 = arith.constant 0 : index
    %c0_2 = arith.constant 0 : index
    %1 = vector.load %arg3[%c0_1, %c0_2] : memref<128x512xf32, #tpu.memory_space<vmem>>, vector<128x512xf32>
    %cst = arith.constant 0.000000e+00 : f32
    %2 = vector.broadcast %cst : f32 to vector<2x128xf32>
    %c0_i32 = arith.constant 0 : i32
    %3 = arith.index_cast %c0_i32 : i32 to index
    %c0_3 = arith.constant 0 : index
    %c0_4 = arith.constant 0 : index
    %4 = vector.load %arg0[%3, %c0_3, %c0_4] : memref<7x2x512xf32, #tpu.memory_space<vmem>>, vector<1x2x512xf32>
    %5 = vector.shape_cast %4 : vector<1x2x512xf32> to vector<2x512xf32>
    %cst_5 = arith.constant dense<0.000000e+00> : vector<2x512xf32>
    %6 = tpu.matmul %2, %0, %cst_5 {dimension_numbers = #tpu.dot_dimension_numbers<[1], [0], [0], [1], [0, 0, 1, 1], [], []>} : vector<2x128xf32>, vector<128x512xf32>, vector<2x512xf32> -> vector<2x512xf32>
    %7 = arith.addf %5, %6 : vector<2x512xf32>
    %8 = arith.index_cast %c0_i32 : i32 to index
    %c0_6 = arith.constant 0 : index
    %c0_7 = arith.constant 0 : index
    %9 = vector.load %arg1[%8, %c0_6, %c0_7] : memref<7x2x512xf32, #tpu.memory_space<vmem>>, vector<1x2x512xf32>
    %10 = vector.shape_cast %9 : vector<1x2x512xf32> to vector<2x512xf32>
    %cst_8 = arith.constant dense<0.000000e+00> : vector<2x512xf32>
    %11 = tpu.matmul %2, %1, %cst_8 {dimension_numbers = #tpu.dot_dimension_numbers<[1], [0], [0], [1], [0, 0, 1, 1], [], []>} : vector<2x128xf32>, vector<128x512xf32>, vector<2x512xf32> -> vector<2x512xf32>
    %12 = arith.addf %10, %11 : vector<2x512xf32>
    %13 = vector.extract_strided_slice %7 {offsets = [0, 0], sizes = [2, 128], strides = [1, 1]} : vector<2x512xf32> to vector<2x128xf32>
    %14 = arith.negf %13 : vector<2x128xf32>
    %15 = math.exp %14 : vector<2x128xf32>
    %cst_9 = arith.constant 1.000000e+00 : f32
    %16 = vector.broadcast %cst_9 : f32 to vector<2x128xf32>
    %17 = arith.addf %16, %15 : vector<2x128xf32>
    %18 = arith.divf %16, %17 : vector<2x128xf32>
    %19 = vector.extract_strided_slice %7 {offsets = [0, 128], sizes = [2, 128], strides = [1, 1]} : vector<2x512xf32> to vector<2x128xf32>
    %20 = arith.negf %19 : vector<2x128xf32>
    %21 = math.exp %20 : vector<2x128xf32>
    %cst_10 = arith.constant 1.000000e+00 : f32
    %22 = vector.broadcast %cst_10 : f32 to vector<2x128xf32>
    %23 = arith.addf %22, %21 : vector<2x128xf32>
    %24 = arith.divf %22, %23 : vector<2x128xf32>
    %25 = vector.extract_strided_slice %7 {offsets = [0, 256], sizes = [2, 128], strides = [1, 1]} : vector<2x512xf32> to vector<2x128xf32>
    %26 = math.tanh %25 : vector<2x128xf32>
    %27 = vector.extract_strided_slice %7 {offsets = [0, 384], sizes = [2, 128], strides = [1, 1]} : vector<2x512xf32> to vector<2x128xf32>
    %28 = arith.negf %27 : vector<2x128xf32>
    %29 = math.exp %28 : vector<2x128xf32>
    %cst_11 = arith.constant 1.000000e+00 : f32
    %30 = vector.broadcast %cst_11 : f32 to vector<2x128xf32>
    %31 = arith.addf %30, %29 : vector<2x128xf32>
    %32 = arith.divf %30, %31 : vector<2x128xf32>
    %33 = arith.mulf %24, %2 : vector<2x128xf32>
    %34 = arith.mulf %18, %26 : vector<2x128xf32>
    %35 = arith.addf %33, %34 : vector<2x128xf32>
    %36 = math.tanh %35 : vector<2x128xf32>
    %37 = arith.mulf %32, %36 : vector<2x128xf32>
    %38 = vector.extract_strided_slice %12 {offsets = [0, 0], sizes = [2, 128], strides = [1, 1]} : vector<2x512xf32> to vector<2x128xf32>
    %39 = arith.negf %38 : vector<2x128xf32>
    %40 = math.exp %39 : vector<2x128xf32>
    %cst_12 = arith.constant 1.000000e+00 : f32
    %41 = vector.broadcast %cst_12 : f32 to vector<2x128xf32>
    %42 = arith.addf %41, %40 : vector<2x128xf32>
    %43 = arith.divf %41, %42 : vector<2x128xf32>
    %44 = vector.extract_strided_slice %12 {offsets = [0, 128], sizes = [2, 128], strides = [1, 1]} : vector<2x512xf32> to vector<2x128xf32>
    %45 = arith.negf %44 : vector<2x128xf32>
    %46 = math.exp %45 : vector<2x128xf32>
    %cst_13 = arith.constant 1.000000e+00 : f32
    %47 = vector.broadcast %cst_13 : f32 to vector<2x128xf32>
    %48 = arith.addf %47, %46 : vector<2x128xf32>
    %49 = arith.divf %47, %48 : vector<2x128xf32>
    %50 = vector.extract_strided_slice %12 {offsets = [0, 256], sizes = [2, 128], strides = [1, 1]} : vector<2x512xf32> to vector<2x128xf32>
    %51 = math.tanh %50 : vector<2x128xf32>
    %52 = vector.extract_strided_slice %12 {offsets = [0, 384], sizes = [2, 128], strides = [1, 1]} : vector<2x512xf32> to vector<2x128xf32>
    %53 = arith.negf %52 : vector<2x128xf32>
    %54 = math.exp %53 : vector<2x128xf32>
    %cst_14 = arith.constant 1.000000e+00 : f32
    %55 = vector.broadcast %cst_14 : f32 to vector<2x128xf32>
    %56 = arith.addf %55, %54 : vector<2x128xf32>
    %57 = arith.divf %55, %56 : vector<2x128xf32>
    %58 = arith.mulf %49, %2 : vector<2x128xf32>
    %59 = arith.mulf %43, %51 : vector<2x128xf32>
    %60 = arith.addf %58, %59 : vector<2x128xf32>
    %61 = math.tanh %60 : vector<2x128xf32>
    %62 = arith.mulf %57, %61 : vector<2x128xf32>
    %63 = arith.index_cast %c0_i32 : i32 to index
    %c0_15 = arith.constant 0 : index
    %c0_16 = arith.constant 0 : index
    %64 = vector.load %arg4[%63, %c0_15, %c0_16] : memref<7x2x128xf32, #tpu.memory_space<vmem>>, vector<1x2x128xf32>
    %65 = vector.shape_cast %64 : vector<1x2x128xf32> to vector<2x128xf32>
    %66 = vector.shape_cast %37 : vector<2x128xf32> to vector<1x2x128xf32>
    tpu.vector_store %arg4[%63, %c0_15, %c0_16], %66 {strides = array<i32>} : memref<7x2x128xf32, #tpu.memory_space<vmem>>, vector<1x2x128xf32>,
    %67 = arith.index_cast %c0_i32 : i32 to index
    %c0_17 = arith.constant 0 : index
    %c0_18 = arith.constant 0 : index
    %68 = vector.load %arg5[%67, %c0_17, %c0_18] : memref<7x2x128xf32, #tpu.memory_space<vmem>>, vector<1x2x128xf32>
    %69 = vector.shape_cast %68 : vector<1x2x128xf32> to vector<2x128xf32>
    %70 = vector.shape_cast %62 : vector<2x128xf32> to vector<1x2x128xf32>
    tpu.vector_store %arg5[%67, %c0_17, %c0_18], %70 {strides = array<i32>} : memref<7x2x128xf32, #tpu.memory_space<vmem>>, vector<1x2x128xf32>,
    %c1_i32 = arith.constant 1 : i32
    %71 = arith.index_cast %c1_i32 : i32 to index
    %c0_19 = arith.constant 0 : index
    %c0_20 = arith.constant 0 : index
    %72 = vector.load %arg0[%71, %c0_19, %c0_20] : memref<7x2x512xf32, #tpu.memory_space<vmem>>, vector<1x2x512xf32>
    %73 = vector.shape_cast %72 : vector<1x2x512xf32> to vector<2x512xf32>
    %cst_21 = arith.constant dense<0.000000e+00> : vector<2x512xf32>
    %74 = tpu.matmul %37, %0, %cst_21 {dimension_numbers = #tpu.dot_dimension_numbers<[1], [0], [0], [1], [0, 0, 1, 1], [], []>} : vector<2x128xf32>, vector<128x512xf32>, vector<2x512xf32> -> vector<2x512xf32>
    %75 = arith.addf %73, %74 : vector<2x512xf32>
    %76 = arith.index_cast %c1_i32 : i32 to index
    %c0_22 = arith.constant 0 : index
    %c0_23 = arith.constant 0 : index
    %77 = vector.load %arg1[%76, %c0_22, %c0_23] : memref<7x2x512xf32, #tpu.memory_space<vmem>>, vector<1x2x512xf32>
    %78 = vector.shape_cast %77 : vector<1x2x512xf32> to vector<2x512xf32>
    %cst_24 = arith.constant dense<0.000000e+00> : vector<2x512xf32>
    %79 = tpu.matmul %62, %1, %cst_24 {dimension_numbers = #tpu.dot_dimension_numbers<[1], [0], [0], [1], [0, 0, 1, 1], [], []>} : vector<2x128xf32>, vector<128x512xf32>, vector<2x512xf32> -> vector<2x512xf32>
    %80 = arith.addf %78, %79 : vector<2x512xf32>
    %81 = vector.extract_strided_slice %75 {offsets = [0, 0], sizes = [2, 128], strides = [1, 1]} : vector<2x512xf32> to vector<2x128xf32>
    %82 = arith.negf %81 : vector<2x128xf32>
    %83 = math.exp %82 : vector<2x128xf32>
    %cst_25 = arith.constant 1.000000e+00 : f32
    %84 = vector.broadcast %cst_25 : f32 to vector<2x128xf32>
    %85 = arith.addf %84, %83 : vector<2x128xf32>
    %86 = arith.divf %84, %85 : vector<2x128xf32>
    %87 = vector.extract_strided_slice %75 {offsets = [0, 128], sizes = [2, 128], strides = [1, 1]} : vector<2x512xf32> to vector<2x128xf32>
    %88 = arith.negf %87 : vector<2x128xf32>
    %89 = math.exp %88 : vector<2x128xf32>
    %cst_26 = arith.constant 1.000000e+00 : f32
    %90 = vector.broadcast %cst_26 : f32 to vector<2x128xf32>
    %91 = arith.addf %90, %89 : vector<2x128xf32>
    %92 = arith.divf %90, %91 : vector<2x128xf32>
    %93 = vector.extract_strided_slice %75 {offsets = [0, 256], sizes = [2, 128], strides = [1, 1]} : vector<2x512xf32> to vector<2x128xf32>
    %94 = math.tanh %93 : vector<2x128xf32>
    %95 = vector.extract_strided_slice %75 {offsets = [0, 384], sizes = [2, 128], strides = [1, 1]} : vector<2x512xf32> to vector<2x128xf32>
    %96 = arith.negf %95 : vector<2x128xf32>
    %97 = math.exp %96 : vector<2x128xf32>
    %cst_27 = arith.constant 1.000000e+00 : f32
    %98 = vector.broadcast %cst_27 : f32 to vector<2x128xf32>
    %99 = arith.addf %98, %97 : vector<2x128xf32>
    %100 = arith.divf %98, %99 : vector<2x128xf32>
    %101 = arith.mulf %92, %35 : vector<2x128xf32>
    %102 = arith.mulf %86, %94 : vector<2x128xf32>
    %103 = arith.addf %101, %102 : vector<2x128xf32>
    %104 = math.tanh %103 : vector<2x128xf32>
    %105 = arith.mulf %100, %104 : vector<2x128xf32>
    %106 = vector.extract_strided_slice %80 {offsets = [0, 0], sizes = [2, 128], strides = [1, 1]} : vector<2x512xf32> to vector<2x128xf32>
    %107 = arith.negf %106 : vector<2x128xf32>
    %108 = math.exp %107 : vector<2x128xf32>
    %cst_28 = arith.constant 1.000000e+00 : f32
    %109 = vector.broadcast %cst_28 : f32 to vector<2x128xf32>
    %110 = arith.addf %109, %108 : vector<2x128xf32>
    %111 = arith.divf %109, %110 : vector<2x128xf32>
    %112 = vector.extract_strided_slice %80 {offsets = [0, 128], sizes = [2, 128], strides = [1, 1]} : vector<2x512xf32> to vector<2x128xf32>
    %113 = arith.negf %112 : vector<2x128xf32>
    %114 = math.exp %113 : vector<2x128xf32>
    %cst_29 = arith.constant 1.000000e+00 : f32
    %115 = vector.broadcast %cst_29 : f32 to vector<2x128xf32>
    %116 = arith.addf %115, %114 : vector<2x128xf32>
    %117 = arith.divf %115, %116 : vector<2x128xf32>
    %118 = vector.extract_strided_slice %80 {offsets = [0, 256], sizes = [2, 128], strides = [1, 1]} : vector<2x512xf32> to vector<2x128xf32>
    %119 = math.tanh %118 : vector<2x128xf32>
    %120 = vector.extract_strided_slice %80 {offsets = [0, 384], sizes = [2, 128], strides = [1, 1]} : vector<2x512xf32> to vector<2x128xf32>
    %121 = arith.negf %120 : vector<2x128xf32>
    %122 = math.exp %121 : vector<2x128xf32>
    %cst_30 = arith.constant 1.000000e+00 : f32
    %123 = vector.broadcast %cst_30 : f32 to vector<2x128xf32>
    %124 = arith.addf %123, %122 : vector<2x128xf32>
    %125 = arith.divf %123, %124 : vector<2x128xf32>
    %126 = arith.mulf %117, %60 : vector<2x128xf32>
    %127 = arith.mulf %111, %119 : vector<2x128xf32>
    %128 = arith.addf %126, %127 : vector<2x128xf32>
    %129 = math.tanh %128 : vector<2x128xf32>
    %130 = arith.mulf %125, %129 : vector<2x128xf32>
    %131 = arith.index_cast %c1_i32 : i32 to index
    %c0_31 = arith.constant 0 : index
    %c0_32 = arith.constant 0 : index
    %132 = vector.load %arg4[%131, %c0_31, %c0_32] : memref<7x2x128xf32, #tpu.memory_space<vmem>>, vector<1x2x128xf32>
    %133 = vector.shape_cast %132 : vector<1x2x128xf32> to vector<2x128xf32>
    %134 = vector.shape_cast %105 : vector<2x128xf32> to vector<1x2x128xf32>
    tpu.vector_store %arg4[%131, %c0_31, %c0_32], %134 {strides = array<i32>} : memref<7x2x128xf32, #tpu.memory_space<vmem>>, vector<1x2x128xf32>,
    %135 = arith.index_cast %c1_i32 : i32 to index
    %c0_33 = arith.constant 0 : index
    %c0_34 = arith.constant 0 : index
    %136 = vector.load %arg5[%135, %c0_33, %c0_34] : memref<7x2x128xf32, #tpu.memory_space<vmem>>, vector<1x2x128xf32>
    %137 = vector.shape_cast %136 : vector<1x2x128xf32> to vector<2x128xf32>
    %138 = vector.shape_cast %130 : vector<2x128xf32> to vector<1x2x128xf32>
    tpu.vector_store %arg5[%135, %c0_33, %c0_34], %138 {strides = array<i32>} : memref<7x2x128xf32, #tpu.memory_space<vmem>>, vector<1x2x128xf32>,
    %c2_i32 = arith.constant 2 : i32
    %139 = arith.index_cast %c2_i32 : i32 to index
    %c0_35 = arith.constant 0 : index
    %c0_36 = arith.constant 0 : index
    %140 = vector.load %arg0[%139, %c0_35, %c0_36] : memref<7x2x512xf32, #tpu.memory_space<vmem>>, vector<1x2x512xf32>
    %141 = vector.shape_cast %140 : vector<1x2x512xf32> to vector<2x512xf32>
    %cst_37 = arith.constant dense<0.000000e+00> : vector<2x512xf32>
    %142 = tpu.matmul %105, %0, %cst_37 {dimension_numbers = #tpu.dot_dimension_numbers<[1], [0], [0], [1], [0, 0, 1, 1], [], []>} : vector<2x128xf32>, vector<128x512xf32>, vector<2x512xf32> -> vector<2x512xf32>
    %143 = arith.addf %141, %142 : vector<2x512xf32>
    %144 = arith.index_cast %c2_i32 : i32 to index
    %c0_38 = arith.constant 0 : index
    %c0_39 = arith.constant 0 : index
    %145 = vector.load %arg1[%144, %c0_38, %c0_39] : memref<7x2x512xf32, #tpu.memory_space<vmem>>, vector<1x2x512xf32>
    %146 = vector.shape_cast %145 : vector<1x2x512xf32> to vector<2x512xf32>
    %cst_40 = arith.constant dense<0.000000e+00> : vector<2x512xf32>
    %147 = tpu.matmul %130, %1, %cst_40 {dimension_numbers = #tpu.dot_dimension_numbers<[1], [0], [0], [1], [0, 0, 1, 1], [], []>} : vector<2x128xf32>, vector<128x512xf32>, vector<2x512xf32> -> vector<2x512xf32>
    %148 = arith.addf %146, %147 : vector<2x512xf32>
    %149 = vector.extract_strided_slice %143 {offsets = [0, 0], sizes = [2, 128], strides = [1, 1]} : vector<2x512xf32> to vector<2x128xf32>
    %150 = arith.negf %149 : vector<2x128xf32>
    %151 = math.exp %150 : vector<2x128xf32>
    %cst_41 = arith.constant 1.000000e+00 : f32
    %152 = vector.broadcast %cst_41 : f32 to vector<2x128xf32>
    %153 = arith.addf %152, %151 : vector<2x128xf32>
    %154 = arith.divf %152, %153 : vector<2x128xf32>
    %155 = vector.extract_strided_slice %143 {offsets = [0, 128], sizes = [2, 128], strides = [1, 1]} : vector<2x512xf32> to vector<2x128xf32>
    %156 = arith.negf %155 : vector<2x128xf32>
    %157 = math.exp %156 : vector<2x128xf32>
    %cst_42 = arith.constant 1.000000e+00 : f32
    %158 = vector.broadcast %cst_42 : f32 to vector<2x128xf32>
    %159 = arith.addf %158, %157 : vector<2x128xf32>
    %160 = arith.divf %158, %159 : vector<2x128xf32>
    %161 = vector.extract_strided_slice %143 {offsets = [0, 256], sizes = [2, 128], strides = [1, 1]} : vector<2x512xf32> to vector<2x128xf32>
    %162 = math.tanh %161 : vector<2x128xf32>
    %163 = vector.extract_strided_slice %143 {offsets = [0, 384], sizes = [2, 128], strides = [1, 1]} : vector<2x512xf32> to vector<2x128xf32>
    %164 = arith.negf %163 : vector<2x128xf32>
    %165 = math.exp %164 : vector<2x128xf32>
    %cst_43 = arith.constant 1.000000e+00 : f32
    %166 = vector.broadcast %cst_43 : f32 to vector<2x128xf32>
    %167 = arith.addf %166, %165 : vector<2x128xf32>
    %168 = arith.divf %166, %167 : vector<2x128xf32>
    %169 = arith.mulf %160, %103 : vector<2x128xf32>
    %170 = arith.mulf %154, %162 : vector<2x128xf32>
    %171 = arith.addf %169, %170 : vector<2x128xf32>
    %172 = math.tanh %171 : vector<2x128xf32>
    %173 = arith.mulf %168, %172 : vector<2x128xf32>
    %174 = vector.extract_strided_slice %148 {offsets = [0, 0], sizes = [2, 128], strides = [1, 1]} : vector<2x512xf32> to vector<2x128xf32>
    %175 = arith.negf %174 : vector<2x128xf32>
    %176 = math.exp %175 : vector<2x128xf32>
    %cst_44 = arith.constant 1.000000e+00 : f32
    %177 = vector.broadcast %cst_44 : f32 to vector<2x128xf32>
    %178 = arith.addf %177, %176 : vector<2x128xf32>
    %179 = arith.divf %177, %178 : vector<2x128xf32>
    %180 = vector.extract_strided_slice %148 {offsets = [0, 128], sizes = [2, 128], strides = [1, 1]} : vector<2x512xf32> to vector<2x128xf32>
    %181 = arith.negf %180 : vector<2x128xf32>
    %182 = math.exp %181 : vector<2x128xf32>
    %cst_45 = arith.constant 1.000000e+00 : f32
    %183 = vector.broadcast %cst_45 : f32 to vector<2x128xf32>
    %184 = arith.addf %183, %182 : vector<2x128xf32>
    %185 = arith.divf %183, %184 : vector<2x128xf32>
    %186 = vector.extract_strided_slice %148 {offsets = [0, 256], sizes = [2, 128], strides = [1, 1]} : vector<2x512xf32> to vector<2x128xf32>
    %187 = math.tanh %186 : vector<2x128xf32>
    %188 = vector.extract_strided_slice %148 {offsets = [0, 384], sizes = [2, 128], strides = [1, 1]} : vector<2x512xf32> to vector<2x128xf32>
    %189 = arith.negf %188 : vector<2x128xf32>
    %190 = math.exp %189 : vector<2x128xf32>
    %cst_46 = arith.constant 1.000000e+00 : f32
    %191 = vector.broadcast %cst_46 : f32 to vector<2x128xf32>
    %192 = arith.addf %191, %190 : vector<2x128xf32>
    %193 = arith.divf %191, %192 : vector<2x128xf32>
    %194 = arith.mulf %185, %128 : vector<2x128xf32>
    %195 = arith.mulf %179, %187 : vector<2x128xf32>
    %196 = arith.addf %194, %195 : vector<2x128xf32>
    %197 = math.tanh %196 : vector<2x128xf32>
    %198 = arith.mulf %193, %197 : vector<2x128xf32>
    %199 = arith.index_cast %c2_i32 : i32 to index
    %c0_47 = arith.constant 0 : index
    %c0_48 = arith.constant 0 : index
    %200 = vector.load %arg4[%199, %c0_47, %c0_48] : memref<7x2x128xf32, #tpu.memory_space<vmem>>, vector<1x2x128xf32>
    %201 = vector.shape_cast %200 : vector<1x2x128xf32> to vector<2x128xf32>
    %202 = vector.shape_cast %173 : vector<2x128xf32> to vector<1x2x128xf32>
    tpu.vector_store %arg4[%199, %c0_47, %c0_48], %202 {strides = array<i32>} : memref<7x2x128xf32, #tpu.memory_space<vmem>>, vector<1x2x128xf32>,
    %203 = arith.index_cast %c2_i32 : i32 to index
    %c0_49 = arith.constant 0 : index
    %c0_50 = arith.constant 0 : index
    %204 = vector.load %arg5[%203, %c0_49, %c0_50] : memref<7x2x128xf32, #tpu.memory_space<vmem>>, vector<1x2x128xf32>
    %205 = vector.shape_cast %204 : vector<1x2x128xf32> to vector<2x128xf32>
    %206 = vector.shape_cast %198 : vector<2x128xf32> to vector<1x2x128xf32>
    tpu.vector_store %arg5[%203, %c0_49, %c0_50], %206 {strides = array<i32>} : memref<7x2x128xf32, #tpu.memory_space<vmem>>, vector<1x2x128xf32>,
    %c3_i32 = arith.constant 3 : i32
    %207 = arith.index_cast %c3_i32 : i32 to index
    %c0_51 = arith.constant 0 : index
    %c0_52 = arith.constant 0 : index
    %208 = vector.load %arg0[%207, %c0_51, %c0_52] : memref<7x2x512xf32, #tpu.memory_space<vmem>>, vector<1x2x512xf32>
    %209 = vector.shape_cast %208 : vector<1x2x512xf32> to vector<2x512xf32>
    %cst_53 = arith.constant dense<0.000000e+00> : vector<2x512xf32>
    %210 = tpu.matmul %173, %0, %cst_53 {dimension_numbers = #tpu.dot_dimension_numbers<[1], [0], [0], [1], [0, 0, 1, 1], [], []>} : vector<2x128xf32>, vector<128x512xf32>, vector<2x512xf32> -> vector<2x512xf32>
    %211 = arith.addf %209, %210 : vector<2x512xf32>
    %212 = arith.index_cast %c3_i32 : i32 to index
    %c0_54 = arith.constant 0 : index
    %c0_55 = arith.constant 0 : index
    %213 = vector.load %arg1[%212, %c0_54, %c0_55] : memref<7x2x512xf32, #tpu.memory_space<vmem>>, vector<1x2x512xf32>
    %214 = vector.shape_cast %213 : vector<1x2x512xf32> to vector<2x512xf32>
    %cst_56 = arith.constant dense<0.000000e+00> : vector<2x512xf32>
    %215 = tpu.matmul %198, %1, %cst_56 {dimension_numbers = #tpu.dot_dimension_numbers<[1], [0], [0], [1], [0, 0, 1, 1], [], []>} : vector<2x128xf32>, vector<128x512xf32>, vector<2x512xf32> -> vector<2x512xf32>
    %216 = arith.addf %214, %215 : vector<2x512xf32>
    %217 = vector.extract_strided_slice %211 {offsets = [0, 0], sizes = [2, 128], strides = [1, 1]} : vector<2x512xf32> to vector<2x128xf32>
    %218 = arith.negf %217 : vector<2x128xf32>
    %219 = math.exp %218 : vector<2x128xf32>
    %cst_57 = arith.constant 1.000000e+00 : f32
    %220 = vector.broadcast %cst_57 : f32 to vector<2x128xf32>
    %221 = arith.addf %220, %219 : vector<2x128xf32>
    %222 = arith.divf %220, %221 : vector<2x128xf32>
    %223 = vector.extract_strided_slice %211 {offsets = [0, 128], sizes = [2, 128], strides = [1, 1]} : vector<2x512xf32> to vector<2x128xf32>
    %224 = arith.negf %223 : vector<2x128xf32>
    %225 = math.exp %224 : vector<2x128xf32>
    %cst_58 = arith.constant 1.000000e+00 : f32
    %226 = vector.broadcast %cst_58 : f32 to vector<2x128xf32>
    %227 = arith.addf %226, %225 : vector<2x128xf32>
    %228 = arith.divf %226, %227 : vector<2x128xf32>
    %229 = vector.extract_strided_slice %211 {offsets = [0, 256], sizes = [2, 128], strides = [1, 1]} : vector<2x512xf32> to vector<2x128xf32>
    %230 = math.tanh %229 : vector<2x128xf32>
    %231 = vector.extract_strided_slice %211 {offsets = [0, 384], sizes = [2, 128], strides = [1, 1]} : vector<2x512xf32> to vector<2x128xf32>
    %232 = arith.negf %231 : vector<2x128xf32>
    %233 = math.exp %232 : vector<2x128xf32>
    %cst_59 = arith.constant 1.000000e+00 : f32
    %234 = vector.broadcast %cst_59 : f32 to vector<2x128xf32>
    %235 = arith.addf %234, %233 : vector<2x128xf32>
    %236 = arith.divf %234, %235 : vector<2x128xf32>
    %237 = arith.mulf %228, %171 : vector<2x128xf32>
    %238 = arith.mulf %222, %230 : vector<2x128xf32>
    %239 = arith.addf %237, %238 : vector<2x128xf32>
    %240 = math.tanh %239 : vector<2x128xf32>
    %241 = arith.mulf %236, %240 : vector<2x128xf32>
    %242 = vector.extract_strided_slice %216 {offsets = [0, 0], sizes = [2, 128], strides = [1, 1]} : vector<2x512xf32> to vector<2x128xf32>
    %243 = arith.negf %242 : vector<2x128xf32>
    %244 = math.exp %243 : vector<2x128xf32>
    %cst_60 = arith.constant 1.000000e+00 : f32
    %245 = vector.broadcast %cst_60 : f32 to vector<2x128xf32>
    %246 = arith.addf %245, %244 : vector<2x128xf32>
    %247 = arith.divf %245, %246 : vector<2x128xf32>
    %248 = vector.extract_strided_slice %216 {offsets = [0, 128], sizes = [2, 128], strides = [1, 1]} : vector<2x512xf32> to vector<2x128xf32>
    %249 = arith.negf %248 : vector<2x128xf32>
    %250 = math.exp %249 : vector<2x128xf32>
    %cst_61 = arith.constant 1.000000e+00 : f32
    %251 = vector.broadcast %cst_61 : f32 to vector<2x128xf32>
    %252 = arith.addf %251, %250 : vector<2x128xf32>
    %253 = arith.divf %251, %252 : vector<2x128xf32>
    %254 = vector.extract_strided_slice %216 {offsets = [0, 256], sizes = [2, 128], strides = [1, 1]} : vector<2x512xf32> to vector<2x128xf32>
    %255 = math.tanh %254 : vector<2x128xf32>
    %256 = vector.extract_strided_slice %216 {offsets = [0, 384], sizes = [2, 128], strides = [1, 1]} : vector<2x512xf32> to vector<2x128xf32>
    %257 = arith.negf %256 : vector<2x128xf32>
    %258 = math.exp %257 : vector<2x128xf32>
    %cst_62 = arith.constant 1.000000e+00 : f32
    %259 = vector.broadcast %cst_62 : f32 to vector<2x128xf32>
    %260 = arith.addf %259, %258 : vector<2x128xf32>
    %261 = arith.divf %259, %260 : vector<2x128xf32>
    %262 = arith.mulf %253, %196 : vector<2x128xf32>
    %263 = arith.mulf %247, %255 : vector<2x128xf32>
    %264 = arith.addf %262, %263 : vector<2x128xf32>
    %265 = math.tanh %264 : vector<2x128xf32>
    %266 = arith.mulf %261, %265 : vector<2x128xf32>
    %267 = arith.index_cast %c3_i32 : i32 to index
    %c0_63 = arith.constant 0 : index
    %c0_64 = arith.constant 0 : index
    %268 = vector.load %arg4[%267, %c0_63, %c0_64] : memref<7x2x128xf32, #tpu.memory_space<vmem>>, vector<1x2x128xf32>
    %269 = vector.shape_cast %268 : vector<1x2x128xf32> to vector<2x128xf32>
    %270 = vector.shape_cast %241 : vector<2x128xf32> to vector<1x2x128xf32>
    tpu.vector_store %arg4[%267, %c0_63, %c0_64], %270 {strides = array<i32>} : memref<7x2x128xf32, #tpu.memory_space<vmem>>, vector<1x2x128xf32>,
    %271 = arith.index_cast %c3_i32 : i32 to index
    %c0_65 = arith.constant 0 : index
    %c0_66 = arith.constant 0 : index
    %272 = vector.load %arg5[%271, %c0_65, %c0_66] : memref<7x2x128xf32, #tpu.memory_space<vmem>>, vector<1x2x128xf32>
    %273 = vector.shape_cast %272 : vector<1x2x128xf32> to vector<2x128xf32>
    %274 = vector.shape_cast %266 : vector<2x128xf32> to vector<1x2x128xf32>
    tpu.vector_store %arg5[%271, %c0_65, %c0_66], %274 {strides = array<i32>} : memref<7x2x128xf32, #tpu.memory_space<vmem>>, vector<1x2x128xf32>,
    %c4_i32 = arith.constant 4 : i32
    %275 = arith.index_cast %c4_i32 : i32 to index
    %c0_67 = arith.constant 0 : index
    %c0_68 = arith.constant 0 : index
    %276 = vector.load %arg0[%275, %c0_67, %c0_68] : memref<7x2x512xf32, #tpu.memory_space<vmem>>, vector<1x2x512xf32>
    %277 = vector.shape_cast %276 : vector<1x2x512xf32> to vector<2x512xf32>
    %cst_69 = arith.constant dense<0.000000e+00> : vector<2x512xf32>
    %278 = tpu.matmul %241, %0, %cst_69 {dimension_numbers = #tpu.dot_dimension_numbers<[1], [0], [0], [1], [0, 0, 1, 1], [], []>} : vector<2x128xf32>, vector<128x512xf32>, vector<2x512xf32> -> vector<2x512xf32>
    %279 = arith.addf %277, %278 : vector<2x512xf32>
    %280 = arith.index_cast %c4_i32 : i32 to index
    %c0_70 = arith.constant 0 : index
    %c0_71 = arith.constant 0 : index
    %281 = vector.load %arg1[%280, %c0_70, %c0_71] : memref<7x2x512xf32, #tpu.memory_space<vmem>>, vector<1x2x512xf32>
    %282 = vector.shape_cast %281 : vector<1x2x512xf32> to vector<2x512xf32>
    %cst_72 = arith.constant dense<0.000000e+00> : vector<2x512xf32>
    %283 = tpu.matmul %266, %1, %cst_72 {dimension_numbers = #tpu.dot_dimension_numbers<[1], [0], [0], [1], [0, 0, 1, 1], [], []>} : vector<2x128xf32>, vector<128x512xf32>, vector<2x512xf32> -> vector<2x512xf32>
    %284 = arith.addf %282, %283 : vector<2x512xf32>
    %285 = vector.extract_strided_slice %279 {offsets = [0, 0], sizes = [2, 128], strides = [1, 1]} : vector<2x512xf32> to vector<2x128xf32>
    %286 = arith.negf %285 : vector<2x128xf32>
    %287 = math.exp %286 : vector<2x128xf32>
    %cst_73 = arith.constant 1.000000e+00 : f32
    %288 = vector.broadcast %cst_73 : f32 to vector<2x128xf32>
    %289 = arith.addf %288, %287 : vector<2x128xf32>
    %290 = arith.divf %288, %289 : vector<2x128xf32>
    %291 = vector.extract_strided_slice %279 {offsets = [0, 128], sizes = [2, 128], strides = [1, 1]} : vector<2x512xf32> to vector<2x128xf32>
    %292 = arith.negf %291 : vector<2x128xf32>
    %293 = math.exp %292 : vector<2x128xf32>
    %cst_74 = arith.constant 1.000000e+00 : f32
    %294 = vector.broadcast %cst_74 : f32 to vector<2x128xf32>
    %295 = arith.addf %294, %293 : vector<2x128xf32>
    %296 = arith.divf %294, %295 : vector<2x128xf32>
    %297 = vector.extract_strided_slice %279 {offsets = [0, 256], sizes = [2, 128], strides = [1, 1]} : vector<2x512xf32> to vector<2x128xf32>
    %298 = math.tanh %297 : vector<2x128xf32>
    %299 = vector.extract_strided_slice %279 {offsets = [0, 384], sizes = [2, 128], strides = [1, 1]} : vector<2x512xf32> to vector<2x128xf32>
    %300 = arith.negf %299 : vector<2x128xf32>
    %301 = math.exp %300 : vector<2x128xf32>
    %cst_75 = arith.constant 1.000000e+00 : f32
    %302 = vector.broadcast %cst_75 : f32 to vector<2x128xf32>
    %303 = arith.addf %302, %301 : vector<2x128xf32>
    %304 = arith.divf %302, %303 : vector<2x128xf32>
    %305 = arith.mulf %296, %239 : vector<2x128xf32>
    %306 = arith.mulf %290, %298 : vector<2x128xf32>
    %307 = arith.addf %305, %306 : vector<2x128xf32>
    %308 = math.tanh %307 : vector<2x128xf32>
    %309 = arith.mulf %304, %308 : vector<2x128xf32>
    %310 = vector.extract_strided_slice %284 {offsets = [0, 0], sizes = [2, 128], strides = [1, 1]} : vector<2x512xf32> to vector<2x128xf32>
    %311 = arith.negf %310 : vector<2x128xf32>
    %312 = math.exp %311 : vector<2x128xf32>
    %cst_76 = arith.constant 1.000000e+00 : f32
    %313 = vector.broadcast %cst_76 : f32 to vector<2x128xf32>
    %314 = arith.addf %313, %312 : vector<2x128xf32>
    %315 = arith.divf %313, %314 : vector<2x128xf32>
    %316 = vector.extract_strided_slice %284 {offsets = [0, 128], sizes = [2, 128], strides = [1, 1]} : vector<2x512xf32> to vector<2x128xf32>
    %317 = arith.negf %316 : vector<2x128xf32>
    %318 = math.exp %317 : vector<2x128xf32>
    %cst_77 = arith.constant 1.000000e+00 : f32
    %319 = vector.broadcast %cst_77 : f32 to vector<2x128xf32>
    %320 = arith.addf %319, %318 : vector<2x128xf32>
    %321 = arith.divf %319, %320 : vector<2x128xf32>
    %322 = vector.extract_strided_slice %284 {offsets = [0, 256], sizes = [2, 128], strides = [1, 1]} : vector<2x512xf32> to vector<2x128xf32>
    %323 = math.tanh %322 : vector<2x128xf32>
    %324 = vector.extract_strided_slice %284 {offsets = [0, 384], sizes = [2, 128], strides = [1, 1]} : vector<2x512xf32> to vector<2x128xf32>
    %325 = arith.negf %324 : vector<2x128xf32>
    %326 = math.exp %325 : vector<2x128xf32>
    %cst_78 = arith.constant 1.000000e+00 : f32
    %327 = vector.broadcast %cst_78 : f32 to vector<2x128xf32>
    %328 = arith.addf %327, %326 : vector<2x128xf32>
    %329 = arith.divf %327, %328 : vector<2x128xf32>
    %330 = arith.mulf %321, %264 : vector<2x128xf32>
    %331 = arith.mulf %315, %323 : vector<2x128xf32>
    %332 = arith.addf %330, %331 : vector<2x128xf32>
    %333 = math.tanh %332 : vector<2x128xf32>
    %334 = arith.mulf %329, %333 : vector<2x128xf32>
    %335 = arith.index_cast %c4_i32 : i32 to index
    %c0_79 = arith.constant 0 : index
    %c0_80 = arith.constant 0 : index
    %336 = vector.load %arg4[%335, %c0_79, %c0_80] : memref<7x2x128xf32, #tpu.memory_space<vmem>>, vector<1x2x128xf32>
    %337 = vector.shape_cast %336 : vector<1x2x128xf32> to vector<2x128xf32>
    %338 = vector.shape_cast %309 : vector<2x128xf32> to vector<1x2x128xf32>
    tpu.vector_store %arg4[%335, %c0_79, %c0_80], %338 {strides = array<i32>} : memref<7x2x128xf32, #tpu.memory_space<vmem>>, vector<1x2x128xf32>,
    %339 = arith.index_cast %c4_i32 : i32 to index
    %c0_81 = arith.constant 0 : index
    %c0_82 = arith.constant 0 : index
    %340 = vector.load %arg5[%339, %c0_81, %c0_82] : memref<7x2x128xf32, #tpu.memory_space<vmem>>, vector<1x2x128xf32>
    %341 = vector.shape_cast %340 : vector<1x2x128xf32> to vector<2x128xf32>
    %342 = vector.shape_cast %334 : vector<2x128xf32> to vector<1x2x128xf32>
    tpu.vector_store %arg5[%339, %c0_81, %c0_82], %342 {strides = array<i32>} : memref<7x2x128xf32, #tpu.memory_space<vmem>>, vector<1x2x128xf32>,
    %c5_i32 = arith.constant 5 : i32
    %343 = arith.index_cast %c5_i32 : i32 to index
    %c0_83 = arith.constant 0 : index
    %c0_84 = arith.constant 0 : index
    %344 = vector.load %arg0[%343, %c0_83, %c0_84] : memref<7x2x512xf32, #tpu.memory_space<vmem>>, vector<1x2x512xf32>
    %345 = vector.shape_cast %344 : vector<1x2x512xf32> to vector<2x512xf32>
    %cst_85 = arith.constant dense<0.000000e+00> : vector<2x512xf32>
    %346 = tpu.matmul %309, %0, %cst_85 {dimension_numbers = #tpu.dot_dimension_numbers<[1], [0], [0], [1], [0, 0, 1, 1], [], []>} : vector<2x128xf32>, vector<128x512xf32>, vector<2x512xf32> -> vector<2x512xf32>
    %347 = arith.addf %345, %346 : vector<2x512xf32>
    %348 = arith.index_cast %c5_i32 : i32 to index
    %c0_86 = arith.constant 0 : index
    %c0_87 = arith.constant 0 : index
    %349 = vector.load %arg1[%348, %c0_86, %c0_87] : memref<7x2x512xf32, #tpu.memory_space<vmem>>, vector<1x2x512xf32>
    %350 = vector.shape_cast %349 : vector<1x2x512xf32> to vector<2x512xf32>
    %cst_88 = arith.constant dense<0.000000e+00> : vector<2x512xf32>
    %351 = tpu.matmul %334, %1, %cst_88 {dimension_numbers = #tpu.dot_dimension_numbers<[1], [0], [0], [1], [0, 0, 1, 1], [], []>} : vector<2x128xf32>, vector<128x512xf32>, vector<2x512xf32> -> vector<2x512xf32>
    %352 = arith.addf %350, %351 : vector<2x512xf32>
    %353 = vector.extract_strided_slice %347 {offsets = [0, 0], sizes = [2, 128], strides = [1, 1]} : vector<2x512xf32> to vector<2x128xf32>
    %354 = arith.negf %353 : vector<2x128xf32>
    %355 = math.exp %354 : vector<2x128xf32>
    %cst_89 = arith.constant 1.000000e+00 : f32
    %356 = vector.broadcast %cst_89 : f32 to vector<2x128xf32>
    %357 = arith.addf %356, %355 : vector<2x128xf32>
    %358 = arith.divf %356, %357 : vector<2x128xf32>
    %359 = vector.extract_strided_slice %347 {offsets = [0, 128], sizes = [2, 128], strides = [1, 1]} : vector<2x512xf32> to vector<2x128xf32>
    %360 = arith.negf %359 : vector<2x128xf32>
    %361 = math.exp %360 : vector<2x128xf32>
    %cst_90 = arith.constant 1.000000e+00 : f32
    %362 = vector.broadcast %cst_90 : f32 to vector<2x128xf32>
    %363 = arith.addf %362, %361 : vector<2x128xf32>
    %364 = arith.divf %362, %363 : vector<2x128xf32>
    %365 = vector.extract_strided_slice %347 {offsets = [0, 256], sizes = [2, 128], strides = [1, 1]} : vector<2x512xf32> to vector<2x128xf32>
    %366 = math.tanh %365 : vector<2x128xf32>
    %367 = vector.extract_strided_slice %347 {offsets = [0, 384], sizes = [2, 128], strides = [1, 1]} : vector<2x512xf32> to vector<2x128xf32>
    %368 = arith.negf %367 : vector<2x128xf32>
    %369 = math.exp %368 : vector<2x128xf32>
    %cst_91 = arith.constant 1.000000e+00 : f32
    %370 = vector.broadcast %cst_91 : f32 to vector<2x128xf32>
    %371 = arith.addf %370, %369 : vector<2x128xf32>
    %372 = arith.divf %370, %371 : vector<2x128xf32>
    %373 = arith.mulf %364, %307 : vector<2x128xf32>
    %374 = arith.mulf %358, %366 : vector<2x128xf32>
    %375 = arith.addf %373, %374 : vector<2x128xf32>
    %376 = math.tanh %375 : vector<2x128xf32>
    %377 = arith.mulf %372, %376 : vector<2x128xf32>
    %378 = vector.extract_strided_slice %352 {offsets = [0, 0], sizes = [2, 128], strides = [1, 1]} : vector<2x512xf32> to vector<2x128xf32>
    %379 = arith.negf %378 : vector<2x128xf32>
    %380 = math.exp %379 : vector<2x128xf32>
    %cst_92 = arith.constant 1.000000e+00 : f32
    %381 = vector.broadcast %cst_92 : f32 to vector<2x128xf32>
    %382 = arith.addf %381, %380 : vector<2x128xf32>
    %383 = arith.divf %381, %382 : vector<2x128xf32>
    %384 = vector.extract_strided_slice %352 {offsets = [0, 128], sizes = [2, 128], strides = [1, 1]} : vector<2x512xf32> to vector<2x128xf32>
    %385 = arith.negf %384 : vector<2x128xf32>
    %386 = math.exp %385 : vector<2x128xf32>
    %cst_93 = arith.constant 1.000000e+00 : f32
    %387 = vector.broadcast %cst_93 : f32 to vector<2x128xf32>
    %388 = arith.addf %387, %386 : vector<2x128xf32>
    %389 = arith.divf %387, %388 : vector<2x128xf32>
    %390 = vector.extract_strided_slice %352 {offsets = [0, 256], sizes = [2, 128], strides = [1, 1]} : vector<2x512xf32> to vector<2x128xf32>
    %391 = math.tanh %390 : vector<2x128xf32>
    %392 = vector.extract_strided_slice %352 {offsets = [0, 384], sizes = [2, 128], strides = [1, 1]} : vector<2x512xf32> to vector<2x128xf32>
    %393 = arith.negf %392 : vector<2x128xf32>
    %394 = math.exp %393 : vector<2x128xf32>
    %cst_94 = arith.constant 1.000000e+00 : f32
    %395 = vector.broadcast %cst_94 : f32 to vector<2x128xf32>
    %396 = arith.addf %395, %394 : vector<2x128xf32>
    %397 = arith.divf %395, %396 : vector<2x128xf32>
    %398 = arith.mulf %389, %332 : vector<2x128xf32>
    %399 = arith.mulf %383, %391 : vector<2x128xf32>
    %400 = arith.addf %398, %399 : vector<2x128xf32>
    %401 = math.tanh %400 : vector<2x128xf32>
    %402 = arith.mulf %397, %401 : vector<2x128xf32>
    %403 = arith.index_cast %c5_i32 : i32 to index
    %c0_95 = arith.constant 0 : index
    %c0_96 = arith.constant 0 : index
    %404 = vector.load %arg4[%403, %c0_95, %c0_96] : memref<7x2x128xf32, #tpu.memory_space<vmem>>, vector<1x2x128xf32>
    %405 = vector.shape_cast %404 : vector<1x2x128xf32> to vector<2x128xf32>
    %406 = vector.shape_cast %377 : vector<2x128xf32> to vector<1x2x128xf32>
    tpu.vector_store %arg4[%403, %c0_95, %c0_96], %406 {strides = array<i32>} : memref<7x2x128xf32, #tpu.memory_space<vmem>>, vector<1x2x128xf32>,
    %407 = arith.index_cast %c5_i32 : i32 to index
    %c0_97 = arith.constant 0 : index
    %c0_98 = arith.constant 0 : index
    %408 = vector.load %arg5[%407, %c0_97, %c0_98] : memref<7x2x128xf32, #tpu.memory_space<vmem>>, vector<1x2x128xf32>
    %409 = vector.shape_cast %408 : vector<1x2x128xf32> to vector<2x128xf32>
    %410 = vector.shape_cast %402 : vector<2x128xf32> to vector<1x2x128xf32>
    tpu.vector_store %arg5[%407, %c0_97, %c0_98], %410 {strides = array<i32>} : memref<7x2x128xf32, #tpu.memory_space<vmem>>, vector<1x2x128xf32>,
    %c6_i32 = arith.constant 6 : i32
    %411 = arith.index_cast %c6_i32 : i32 to index
    %c0_99 = arith.constant 0 : index
    %c0_100 = arith.constant 0 : index
    %412 = vector.load %arg0[%411, %c0_99, %c0_100] : memref<7x2x512xf32, #tpu.memory_space<vmem>>, vector<1x2x512xf32>
    %413 = vector.shape_cast %412 : vector<1x2x512xf32> to vector<2x512xf32>
    %cst_101 = arith.constant dense<0.000000e+00> : vector<2x512xf32>
    %414 = tpu.matmul %377, %0, %cst_101 {dimension_numbers = #tpu.dot_dimension_numbers<[1], [0], [0], [1], [0, 0, 1, 1], [], []>} : vector<2x128xf32>, vector<128x512xf32>, vector<2x512xf32> -> vector<2x512xf32>
    %415 = arith.addf %413, %414 : vector<2x512xf32>
    %416 = arith.index_cast %c6_i32 : i32 to index
    %c0_102 = arith.constant 0 : index
    %c0_103 = arith.constant 0 : index
    %417 = vector.load %arg1[%416, %c0_102, %c0_103] : memref<7x2x512xf32, #tpu.memory_space<vmem>>, vector<1x2x512xf32>
    %418 = vector.shape_cast %417 : vector<1x2x512xf32> to vector<2x512xf32>
    %cst_104 = arith.constant dense<0.000000e+00> : vector<2x512xf32>
    %419 = tpu.matmul %402, %1, %cst_104 {dimension_numbers = #tpu.dot_dimension_numbers<[1], [0], [0], [1], [0, 0, 1, 1], [], []>} : vector<2x128xf32>, vector<128x512xf32>, vector<2x512xf32> -> vector<2x512xf32>
    %420 = arith.addf %418, %419 : vector<2x512xf32>
    %421 = vector.extract_strided_slice %415 {offsets = [0, 0], sizes = [2, 128], strides = [1, 1]} : vector<2x512xf32> to vector<2x128xf32>
    %422 = arith.negf %421 : vector<2x128xf32>
    %423 = math.exp %422 : vector<2x128xf32>
    %cst_105 = arith.constant 1.000000e+00 : f32
    %424 = vector.broadcast %cst_105 : f32 to vector<2x128xf32>
    %425 = arith.addf %424, %423 : vector<2x128xf32>
    %426 = arith.divf %424, %425 : vector<2x128xf32>
    %427 = vector.extract_strided_slice %415 {offsets = [0, 128], sizes = [2, 128], strides = [1, 1]} : vector<2x512xf32> to vector<2x128xf32>
    %428 = arith.negf %427 : vector<2x128xf32>
    %429 = math.exp %428 : vector<2x128xf32>
    %cst_106 = arith.constant 1.000000e+00 : f32
    %430 = vector.broadcast %cst_106 : f32 to vector<2x128xf32>
    %431 = arith.addf %430, %429 : vector<2x128xf32>
    %432 = arith.divf %430, %431 : vector<2x128xf32>
    %433 = vector.extract_strided_slice %415 {offsets = [0, 256], sizes = [2, 128], strides = [1, 1]} : vector<2x512xf32> to vector<2x128xf32>
    %434 = math.tanh %433 : vector<2x128xf32>
    %435 = vector.extract_strided_slice %415 {offsets = [0, 384], sizes = [2, 128], strides = [1, 1]} : vector<2x512xf32> to vector<2x128xf32>
    %436 = arith.negf %435 : vector<2x128xf32>
    %437 = math.exp %436 : vector<2x128xf32>
    %cst_107 = arith.constant 1.000000e+00 : f32
    %438 = vector.broadcast %cst_107 : f32 to vector<2x128xf32>
    %439 = arith.addf %438, %437 : vector<2x128xf32>
    %440 = arith.divf %438, %439 : vector<2x128xf32>
    %441 = arith.mulf %432, %375 : vector<2x128xf32>
    %442 = arith.mulf %426, %434 : vector<2x128xf32>
    %443 = arith.addf %441, %442 : vector<2x128xf32>
    %444 = math.tanh %443 : vector<2x128xf32>
    %445 = arith.mulf %440, %444 : vector<2x128xf32>
    %446 = vector.extract_strided_slice %420 {offsets = [0, 0], sizes = [2, 128], strides = [1, 1]} : vector<2x512xf32> to vector<2x128xf32>
    %447 = arith.negf %446 : vector<2x128xf32>
    %448 = math.exp %447 : vector<2x128xf32>
    %cst_108 = arith.constant 1.000000e+00 : f32
    %449 = vector.broadcast %cst_108 : f32 to vector<2x128xf32>
    %450 = arith.addf %449, %448 : vector<2x128xf32>
    %451 = arith.divf %449, %450 : vector<2x128xf32>
    %452 = vector.extract_strided_slice %420 {offsets = [0, 128], sizes = [2, 128], strides = [1, 1]} : vector<2x512xf32> to vector<2x128xf32>
    %453 = arith.negf %452 : vector<2x128xf32>
    %454 = math.exp %453 : vector<2x128xf32>
    %cst_109 = arith.constant 1.000000e+00 : f32
    %455 = vector.broadcast %cst_109 : f32 to vector<2x128xf32>
    %456 = arith.addf %455, %454 : vector<2x128xf32>
    %457 = arith.divf %455, %456 : vector<2x128xf32>
    %458 = vector.extract_strided_slice %420 {offsets = [0, 256], sizes = [2, 128], strides = [1, 1]} : vector<2x512xf32> to vector<2x128xf32>
    %459 = math.tanh %458 : vector<2x128xf32>
    %460 = vector.extract_strided_slice %420 {offsets = [0, 384], sizes = [2, 128], strides = [1, 1]} : vector<2x512xf32> to vector<2x128xf32>
    %461 = arith.negf %460 : vector<2x128xf32>
    %462 = math.exp %461 : vector<2x128xf32>
    %cst_110 = arith.constant 1.000000e+00 : f32
    %463 = vector.broadcast %cst_110 : f32 to vector<2x128xf32>
    %464 = arith.addf %463, %462 : vector<2x128xf32>
    %465 = arith.divf %463, %464 : vector<2x128xf32>
    %466 = arith.mulf %457, %400 : vector<2x128xf32>
    %467 = arith.mulf %451, %459 : vector<2x128xf32>
    %468 = arith.addf %466, %467 : vector<2x128xf32>
    %469 = math.tanh %468 : vector<2x128xf32>
    %470 = arith.mulf %465, %469 : vector<2x128xf32>
    %471 = arith.index_cast %c6_i32 : i32 to index
    %c0_111 = arith.constant 0 : index
    %c0_112 = arith.constant 0 : index
    %472 = vector.load %arg4[%471, %c0_111, %c0_112] : memref<7x2x128xf32, #tpu.memory_space<vmem>>, vector<1x2x128xf32>
    %473 = vector.shape_cast %472 : vector<1x2x128xf32> to vector<2x128xf32>
    %474 = vector.shape_cast %445 : vector<2x128xf32> to vector<1x2x128xf32>
    tpu.vector_store %arg4[%471, %c0_111, %c0_112], %474 {strides = array<i32>} : memref<7x2x128xf32, #tpu.memory_space<vmem>>, vector<1x2x128xf32>,
    %475 = arith.index_cast %c6_i32 : i32 to index
    %c0_113 = arith.constant 0 : index
    %c0_114 = arith.constant 0 : index
    %476 = vector.load %arg5[%475, %c0_113, %c0_114] : memref<7x2x128xf32, #tpu.memory_space<vmem>>, vector<1x2x128xf32>
    %477 = vector.shape_cast %476 : vector<1x2x128xf32> to vector<2x128xf32>
    %478 = vector.shape_cast %470 : vector<2x128xf32> to vector<1x2x128xf32>
    tpu.vector_store %arg5[%475, %c0_113, %c0_114], %478 {strides = array<i32>} : memref<7x2x128xf32, #tpu.memory_space<vmem>>, vector<1x2x128xf32>,
    %c7_i32 = arith.constant 7 : i32
    return
  }
}

module attributes {stable_mosaic.version = 11 : i64} {
  func.func @_heads_kernel(%arg0: memref<14x64xf32, #tpu.memory_space<vmem>>, %arg1: memref<14x128xf32, #tpu.memory_space<vmem>>, %arg2: memref<14x128xf32, #tpu.memory_space<vmem>>, %arg3: memref<64x128xf32, #tpu.memory_space<vmem>>, %arg4: memref<128x128xf32, #tpu.memory_space<vmem>>, %arg5: memref<1x128xf32, #tpu.memory_space<vmem>>, %arg6: memref<128x1xf32, #tpu.memory_space<vmem>>, %arg7: memref<1x1xf32, #tpu.memory_space<vmem>>, %arg8: memref<128x128xf32, #tpu.memory_space<vmem>>, %arg9: memref<1x128xf32, #tpu.memory_space<vmem>>, %arg10: memref<14x128xf32, #tpu.memory_space<vmem>>, %arg11: memref<14x1xf32, #tpu.memory_space<vmem>>, %arg12: memref<64x128xf32, #tpu.memory_space<vmem>>, %arg13: memref<128x128xf32, #tpu.memory_space<vmem>>, %arg14: memref<1x128xf32, #tpu.memory_space<vmem>>, %arg15: memref<128x16xf32, #tpu.memory_space<vmem>>, %arg16: memref<1x16xf32, #tpu.memory_space<vmem>>, %arg17: memref<128x128xf32, #tpu.memory_space<vmem>>, %arg18: memref<1x128xf32, #tpu.memory_space<vmem>>, %arg19: memref<128x16xf32, #tpu.memory_space<vmem>>, %arg20: memref<1x16xf32, #tpu.memory_space<vmem>>, %arg21: memref<14x16xf32, #tpu.memory_space<vmem>>, %arg22: memref<14x1xf32, #tpu.memory_space<vmem>>, %arg23: memref<14x128xf32, #tpu.memory_space<vmem>>) attributes {dimension_semantics = [], scalar_prefetch = 0 : i64, scratch_operands = 0 : i64, tpu.core_type = #tpu.core_type<tc>} {
    %c0 = arith.constant 0 : index
    %c0_0 = arith.constant 0 : index
    %0 = vector.load %arg0[%c0, %c0_0] : memref<14x64xf32, #tpu.memory_space<vmem>>, vector<14x64xf32>
    %c0_1 = arith.constant 0 : index
    %c0_2 = arith.constant 0 : index
    %1 = vector.load %arg1[%c0_1, %c0_2] : memref<14x128xf32, #tpu.memory_space<vmem>>, vector<14x128xf32>
    %c0_3 = arith.constant 0 : index
    %c0_4 = arith.constant 0 : index
    %2 = vector.load %arg2[%c0_3, %c0_4] : memref<14x128xf32, #tpu.memory_space<vmem>>, vector<14x128xf32>
    %c0_5 = arith.constant 0 : index
    %c0_6 = arith.constant 0 : index
    %3 = vector.load %arg3[%c0_5, %c0_6] : memref<64x128xf32, #tpu.memory_space<vmem>>, vector<64x128xf32>
    %cst = arith.constant dense<0.000000e+00> : vector<14x128xf32>
    %4 = tpu.matmul %0, %3, %cst {dimension_numbers = #tpu.dot_dimension_numbers<[1], [0], [0], [1], [0, 0, 1, 1], [], []>} : vector<14x64xf32>, vector<64x128xf32>, vector<14x128xf32> -> vector<14x128xf32>
    %c0_7 = arith.constant 0 : index
    %c0_8 = arith.constant 0 : index
    %5 = vector.load %arg4[%c0_7, %c0_8] : memref<128x128xf32, #tpu.memory_space<vmem>>, vector<128x128xf32>
    %cst_9 = arith.constant dense<0.000000e+00> : vector<14x128xf32>
    %6 = tpu.matmul %1, %5, %cst_9 {dimension_numbers = #tpu.dot_dimension_numbers<[1], [0], [0], [1], [0, 0, 1, 1], [], []>} : vector<14x128xf32>, vector<128x128xf32>, vector<14x128xf32> -> vector<14x128xf32>
    %7 = arith.addf %4, %6 : vector<14x128xf32>
    %c0_10 = arith.constant 0 : index
    %c0_11 = arith.constant 0 : index
    %8 = vector.load %arg5[%c0_10, %c0_11] : memref<1x128xf32, #tpu.memory_space<vmem>>, vector<1x128xf32>
    %9 = vector.broadcast %8 : vector<1x128xf32> to vector<14x128xf32>
    %10 = arith.addf %7, %9 : vector<14x128xf32>
    %cst_12 = arith.constant 0.000000e+00 : f32
    %11 = vector.broadcast %cst_12 : f32 to vector<14x128xf32>
    %12 = arith.maximumf %10, %11 : vector<14x128xf32>
    %c0_13 = arith.constant 0 : index
    %c0_14 = arith.constant 0 : index
    %13 = vector.load %arg6[%c0_13, %c0_14] : memref<128x1xf32, #tpu.memory_space<vmem>>, vector<128x1xf32>
    %cst_15 = arith.constant dense<0.000000e+00> : vector<14x1xf32>
    %14 = tpu.matmul %12, %13, %cst_15 {dimension_numbers = #tpu.dot_dimension_numbers<[1], [0], [0], [1], [0, 0, 1, 1], [], []>} : vector<14x128xf32>, vector<128x1xf32>, vector<14x1xf32> -> vector<14x1xf32>
    %c0_16 = arith.constant 0 : index
    %c0_17 = arith.constant 0 : index
    %15 = vector.load %arg7[%c0_16, %c0_17] : memref<1x1xf32, #tpu.memory_space<vmem>>, vector<1x1xf32>
    %16 = vector.broadcast %15 : vector<1x1xf32> to vector<14x1xf32>
    %17 = arith.addf %14, %16 : vector<14x1xf32>
    %18 = arith.negf %17 : vector<14x1xf32>
    %19 = math.exp %18 : vector<14x1xf32>
    %cst_18 = arith.constant 1.000000e+00 : f32
    %20 = vector.broadcast %cst_18 : f32 to vector<14x1xf32>
    %21 = arith.addf %20, %19 : vector<14x1xf32>
    %22 = arith.divf %20, %21 : vector<14x1xf32>
    %c0_19 = arith.constant 0 : index
    %c0_20 = arith.constant 0 : index
    %23 = vector.load %arg8[%c0_19, %c0_20] : memref<128x128xf32, #tpu.memory_space<vmem>>, vector<128x128xf32>
    %cst_21 = arith.constant dense<0.000000e+00> : vector<14x128xf32>
    %24 = tpu.matmul %1, %23, %cst_21 {dimension_numbers = #tpu.dot_dimension_numbers<[1], [0], [0], [1], [0, 0, 1, 1], [], []>} : vector<14x128xf32>, vector<128x128xf32>, vector<14x128xf32> -> vector<14x128xf32>
    %c0_22 = arith.constant 0 : index
    %c0_23 = arith.constant 0 : index
    %25 = vector.load %arg9[%c0_22, %c0_23] : memref<1x128xf32, #tpu.memory_space<vmem>>, vector<1x128xf32>
    %26 = vector.broadcast %25 : vector<1x128xf32> to vector<14x128xf32>
    %27 = arith.addf %24, %26 : vector<14x128xf32>
    %cst_24 = arith.constant 0.000000e+00 : f32
    %28 = vector.broadcast %cst_24 : f32 to vector<14x128xf32>
    %29 = arith.maximumf %27, %28 : vector<14x128xf32>
    %c0_25 = arith.constant 0 : index
    %c0_26 = arith.constant 0 : index
    %30 = vector.load %arg10[%c0_25, %c0_26] : memref<14x128xf32, #tpu.memory_space<vmem>>, vector<14x128xf32>
    %31 = arith.mulf %29, %30 : vector<14x128xf32>
    %cst_27 = arith.constant dense<0.000000e+00> : vector<14xf32>
    %32 = vector.multi_reduction <add>, %31, %cst_27 [1] : vector<14x128xf32> to vector<14xf32>
    %33 = vector.shape_cast %32 : vector<14xf32> to vector<14x1xf32>
    %c0_28 = arith.constant 0 : index
    %c0_29 = arith.constant 0 : index
    %34 = vector.load %arg11[%c0_28, %c0_29] : memref<14x1xf32, #tpu.memory_space<vmem>>, vector<14x1xf32>
    %35 = arith.addf %33, %34 : vector<14x1xf32>
    %36 = arith.negf %35 : vector<14x1xf32>
    %37 = math.exp %36 : vector<14x1xf32>
    %cst_30 = arith.constant 1.000000e+00 : f32
    %38 = vector.broadcast %cst_30 : f32 to vector<14x1xf32>
    %39 = arith.addf %38, %37 : vector<14x1xf32>
    %40 = arith.divf %38, %39 : vector<14x1xf32>
    %c0_31 = arith.constant 0 : index
    %c0_32 = arith.constant 0 : index
    %41 = vector.load %arg21[%c0_31, %c0_32] : memref<14x16xf32, #tpu.memory_space<vmem>>, vector<14x16xf32>
    %c0_33 = arith.constant 0 : index
    %c0_34 = arith.constant 0 : index
    %42 = vector.load %arg22[%c0_33, %c0_34] : memref<14x1xf32, #tpu.memory_space<vmem>>, vector<14x1xf32>
    %cst_35 = arith.constant 1.000000e+00 : f32
    %43 = vector.broadcast %cst_35 : f32 to vector<14x1xf32>
    %44 = arith.maximumf %42, %43 : vector<14x1xf32>
    %c0_36 = arith.constant 0 : index
    %c0_37 = arith.constant 0 : index
    %45 = vector.load %arg12[%c0_36, %c0_37] : memref<64x128xf32, #tpu.memory_space<vmem>>, vector<64x128xf32>
    %cst_38 = arith.constant dense<0.000000e+00> : vector<14x128xf32>
    %46 = tpu.matmul %0, %45, %cst_38 {dimension_numbers = #tpu.dot_dimension_numbers<[1], [0], [0], [1], [0, 0, 1, 1], [], []>} : vector<14x64xf32>, vector<64x128xf32>, vector<14x128xf32> -> vector<14x128xf32>
    %c0_39 = arith.constant 0 : index
    %c0_40 = arith.constant 0 : index
    %47 = vector.load %arg13[%c0_39, %c0_40] : memref<128x128xf32, #tpu.memory_space<vmem>>, vector<128x128xf32>
    %cst_41 = arith.constant dense<0.000000e+00> : vector<14x128xf32>
    %48 = tpu.matmul %2, %47, %cst_41 {dimension_numbers = #tpu.dot_dimension_numbers<[1], [0], [0], [1], [0, 0, 1, 1], [], []>} : vector<14x128xf32>, vector<128x128xf32>, vector<14x128xf32> -> vector<14x128xf32>
    %49 = arith.addf %46, %48 : vector<14x128xf32>
    %c0_42 = arith.constant 0 : index
    %c0_43 = arith.constant 0 : index
    %50 = vector.load %arg14[%c0_42, %c0_43] : memref<1x128xf32, #tpu.memory_space<vmem>>, vector<1x128xf32>
    %51 = vector.broadcast %50 : vector<1x128xf32> to vector<14x128xf32>
    %52 = arith.addf %49, %51 : vector<14x128xf32>
    %cst_44 = arith.constant 0.000000e+00 : f32
    %53 = vector.broadcast %cst_44 : f32 to vector<14x128xf32>
    %54 = arith.maximumf %52, %53 : vector<14x128xf32>
    %c0_45 = arith.constant 0 : index
    %c0_46 = arith.constant 0 : index
    %55 = vector.load %arg15[%c0_45, %c0_46] : memref<128x16xf32, #tpu.memory_space<vmem>>, vector<128x16xf32>
    %cst_47 = arith.constant dense<0.000000e+00> : vector<14x16xf32>
    %56 = tpu.matmul %54, %55, %cst_47 {dimension_numbers = #tpu.dot_dimension_numbers<[1], [0], [0], [1], [0, 0, 1, 1], [], []>} : vector<14x128xf32>, vector<128x16xf32>, vector<14x16xf32> -> vector<14x16xf32>
    %c0_48 = arith.constant 0 : index
    %c0_49 = arith.constant 0 : index
    %57 = vector.load %arg16[%c0_48, %c0_49] : memref<1x16xf32, #tpu.memory_space<vmem>>, vector<1x16xf32>
    %58 = vector.broadcast %57 : vector<1x16xf32> to vector<14x16xf32>
    %59 = arith.addf %56, %58 : vector<14x16xf32>
    %60 = arith.negf %59 : vector<14x16xf32>
    %61 = math.exp %60 : vector<14x16xf32>
    %cst_50 = arith.constant 1.000000e+00 : f32
    %62 = vector.broadcast %cst_50 : f32 to vector<14x16xf32>
    %63 = arith.addf %62, %61 : vector<14x16xf32>
    %64 = arith.divf %62, %63 : vector<14x16xf32>
    %65 = arith.mulf %64, %41 : vector<14x16xf32>
    %cst_51 = arith.constant dense<0.000000e+00> : vector<14xf32>
    %66 = vector.multi_reduction <add>, %65, %cst_51 [1] : vector<14x16xf32> to vector<14xf32>
    %67 = vector.shape_cast %66 : vector<14xf32> to vector<14x1xf32>
    %68 = arith.divf %67, %44 : vector<14x1xf32>
    %c0_52 = arith.constant 0 : index
    %c0_53 = arith.constant 0 : index
    %69 = vector.load %arg17[%c0_52, %c0_53] : memref<128x128xf32, #tpu.memory_space<vmem>>, vector<128x128xf32>
    %cst_54 = arith.constant dense<0.000000e+00> : vector<14x128xf32>
    %70 = tpu.matmul %2, %69, %cst_54 {dimension_numbers = #tpu.dot_dimension_numbers<[1], [0], [0], [1], [0, 0, 1, 1], [], []>} : vector<14x128xf32>, vector<128x128xf32>, vector<14x128xf32> -> vector<14x128xf32>
    %c0_55 = arith.constant 0 : index
    %c0_56 = arith.constant 0 : index
    %71 = vector.load %arg18[%c0_55, %c0_56] : memref<1x128xf32, #tpu.memory_space<vmem>>, vector<1x128xf32>
    %72 = vector.broadcast %71 : vector<1x128xf32> to vector<14x128xf32>
    %73 = arith.addf %70, %72 : vector<14x128xf32>
    %cst_57 = arith.constant 0.000000e+00 : f32
    %74 = vector.broadcast %cst_57 : f32 to vector<14x128xf32>
    %75 = arith.maximumf %73, %74 : vector<14x128xf32>
    %c0_58 = arith.constant 0 : index
    %c0_59 = arith.constant 0 : index
    %76 = vector.load %arg19[%c0_58, %c0_59] : memref<128x16xf32, #tpu.memory_space<vmem>>, vector<128x16xf32>
    %cst_60 = arith.constant dense<0.000000e+00> : vector<14x16xf32>
    %77 = tpu.matmul %75, %76, %cst_60 {dimension_numbers = #tpu.dot_dimension_numbers<[1], [0], [0], [1], [0, 0, 1, 1], [], []>} : vector<14x128xf32>, vector<128x16xf32>, vector<14x16xf32> -> vector<14x16xf32>
    %c0_61 = arith.constant 0 : index
    %c0_62 = arith.constant 0 : index
    %78 = vector.load %arg20[%c0_61, %c0_62] : memref<1x16xf32, #tpu.memory_space<vmem>>, vector<1x16xf32>
    %79 = vector.broadcast %78 : vector<1x16xf32> to vector<14x16xf32>
    %80 = arith.addf %77, %79 : vector<14x16xf32>
    %81 = arith.negf %80 : vector<14x16xf32>
    %82 = math.exp %81 : vector<14x16xf32>
    %cst_63 = arith.constant 1.000000e+00 : f32
    %83 = vector.broadcast %cst_63 : f32 to vector<14x16xf32>
    %84 = arith.addf %83, %82 : vector<14x16xf32>
    %85 = arith.divf %83, %84 : vector<14x16xf32>
    %86 = arith.mulf %85, %41 : vector<14x16xf32>
    %cst_64 = arith.constant dense<0.000000e+00> : vector<14xf32>
    %87 = vector.multi_reduction <add>, %86, %cst_64 [1] : vector<14x16xf32> to vector<14xf32>
    %88 = vector.shape_cast %87 : vector<14xf32> to vector<14x1xf32>
    %89 = arith.divf %88, %44 : vector<14x1xf32>
    %90 = tpu.iota {dimensions = array<i32: 1>} : vector<14x128xi32>
    %c0_i32 = arith.constant 0 : i32
    %91 = vector.broadcast %c0_i32 : i32 to vector<14x128xi32>
    %92 = arith.cmpi eq, %90, %91 : vector<14x128xi32>
    %c1_i32 = arith.constant 1 : i32
    %93 = vector.broadcast %c1_i32 : i32 to vector<14x128xi32>
    %94 = arith.cmpi eq, %90, %93 : vector<14x128xi32>
    %c2_i32 = arith.constant 2 : i32
    %95 = vector.broadcast %c2_i32 : i32 to vector<14x128xi32>
    %96 = arith.cmpi eq, %90, %95 : vector<14x128xi32>
    %c3_i32 = arith.constant 3 : i32
    %97 = vector.broadcast %c3_i32 : i32 to vector<14x128xi32>
    %98 = arith.cmpi eq, %90, %97 : vector<14x128xi32>
    %cst_65 = arith.constant 0.000000e+00 : f32
    %99 = vector.shape_cast %89 : vector<14x1xf32> to vector<14x1xf32>
    %100 = vector.broadcast %99 : vector<14x1xf32> to vector<14x128xf32>
    %101 = vector.broadcast %cst_65 : f32 to vector<14x128xf32>
    %102 = arith.select %98, %100, %101 : vector<14x128xi1>, vector<14x128xf32>
    %103 = vector.shape_cast %68 : vector<14x1xf32> to vector<14x1xf32>
    %104 = vector.broadcast %103 : vector<14x1xf32> to vector<14x128xf32>
    %105 = arith.select %96, %104, %102 : vector<14x128xi1>, vector<14x128xf32>
    %106 = vector.shape_cast %40 : vector<14x1xf32> to vector<14x1xf32>
    %107 = vector.broadcast %106 : vector<14x1xf32> to vector<14x128xf32>
    %108 = arith.select %94, %107, %105 : vector<14x128xi1>, vector<14x128xf32>
    %109 = vector.shape_cast %22 : vector<14x1xf32> to vector<14x1xf32>
    %110 = vector.broadcast %109 : vector<14x1xf32> to vector<14x128xf32>
    %111 = arith.select %92, %110, %108 : vector<14x128xi1>, vector<14x128xf32>
    %c0_66 = arith.constant 0 : index
    %c0_67 = arith.constant 0 : index
    %112 = vector.load %arg23[%c0_66, %c0_67] : memref<14x128xf32, #tpu.memory_space<vmem>>, vector<14x128xf32>
    tpu.vector_store %arg23[%c0_66, %c0_67], %111 {strides = array<i32>} : memref<14x128xf32, #tpu.memory_space<vmem>>, vector<14x128xf32>,
    return
  }
}

</mosaic_0001>

<bundles_post_ra>
// kernel: qikt_forward.3
= control target key start
LH: loop header
LB: loop body
LE: loop exit
PB: predicated region body
PF: predicated region fallthrough
CT: control target
= control target key end

     0   :  { %vm181_vm0 = vcmask 523264   ;;  %vm490_vm1 = vcmask 1045504   ;;  %vm813_vm2 = vcmask 130048   ;;  %vm817_vm3 = vcmask 128000   ;;  %s2198_s4 = inlined_call_operand.vmem [shape: f32[128,128], index: 4, kind: input, shape index: {}]   ;;  %s2199_s3 = inlined_call_operand.vmem [shape: f32[64,128], index: 3, kind: input, shape index: {}]   ;;  %s2200_s0 = inlined_call_operand.vmem [shape: f32[14,64], index: 0, kind: input, shape index: {}]   ;;  %s2201_s1 = inlined_call_operand.vmem [shape: f32[14,128], index: 1, kind: input, shape index: {}]   ;;  %s2202_s6 = inlined_call_operand.vmem [shape: f32[128,1], index: 6, kind: input, shape index: {}]   ;;  %s2203_s13 = inlined_call_operand.vmem [shape: f32[128,128], index: 13, kind: input, shape index: {}]   ;;  %s2204_s8 = inlined_call_operand.vmem [shape: f32[128,128], index: 8, kind: input, shape index: {}]   ;;  %s2205_s7 = inlined_call_operand.<no memory space> [shape: f32[1,1], index: 7, kind: input, shape index: {}]   ;;  %s2206_s5 = inlined_call_operand.vmem [shape: f32[1,128], index: 5, kind: input, shape index: {}]   ;;  %s2207_s2 = inlined_call_operand.vmem [shape: f32[14,128], index: 2, kind: input, shape index: {}]   ;;  %s2208_s12 = inlined_call_operand.vmem [shape: f32[64,128], index: 12, kind: input, shape index: {}]   ;;  %s2209_s17 = inlined_call_operand.vmem [shape: f32[128,128], index: 17, kind: input, shape index: {}]   ;;  %s2210_s15 = inlined_call_operand.vmem [shape: f32[128,16], index: 15, kind: input, shape index: {}]   ;;  %s2211_s19 = inlined_call_operand.vmem [shape: f32[128,16], index: 19, kind: input, shape index: {}]   ;;  %s2212_s14 = inlined_call_operand.vmem [shape: f32[1,128], index: 14, kind: input, shape index: {}]   ;;  %s2213_s18 = inlined_call_operand.vmem [shape: f32[1,128], index: 18, kind: input, shape index: {}]   ;;  %s2214_s9 = inlined_call_operand.vmem [shape: f32[1,128], index: 9, kind: input, shape index: {}]   ;;  %s2215_s10 = inlined_call_operand.vmem [shape: f32[14,128], index: 10, kind: input, shape index: {}]   ;;  %s2216_s16 = inlined_call_operand.vmem [shape: f32[1,16], index: 16, kind: input, shape index: {}]   ;;  %s2217_s20 = inlined_call_operand.vmem [shape: f32[1,16], index: 20, kind: input, shape index: {}]   ;;  %s2218_s21 = inlined_call_operand.vmem [shape: f32[14,16], index: 21, kind: input, shape index: {}]   ;;  %s2219_s11 = inlined_call_operand.vmem [shape: f32[14,1], index: 11, kind: input, shape index: {}]   ;;  %s2220_s22 = inlined_call_operand.vmem [shape: f32[14,1], index: 22, kind: input, shape index: {}]   ;;  %s2221_s23 = inlined_call_operand.vmem [shape: f32[14,128], index: 23, kind: output, shape index: {}]  }
   0x1   :  { %2229 = sst [smem:[#allocation3_spill]] %s2198_s4  ;;  %v1107_v55 = vld [vmem:[%s2206_s5] ss:$0 sm:$0xff] }
   0x2   :  { %2230 = sst [smem:[#allocation4_spill]] %s2199_s3  ;;  %v1886_v63 = vld [vmem:[%s2207_s2] sm:$0xff] }
   0x3   :  { %2231 = sst [smem:[#allocation5_spill]] %s2200_s0 }
   0x4   :  { %2232 = sst [smem:[#allocation6_spill]] %s2201_s1 }
   0x5   :  { %2233 = sst [smem:[#allocation7_spill]] %s2202_s6 }
   0x6   :  { %2234 = sst [smem:[#allocation8_spill]] %s2203_s13 }
   0x7   :  { %2235 = sst [smem:[#allocation9_spill]] %s2204_s8 }
   0x8   :  { %2236 = sst [smem:[#allocation10_spill]] %s2205_s7 }
   0x9   :  { %s2237_s24 = sld [smem:[#allocation3_spill]] }
   0xa   :  { %s2238_s27 = sld [smem:[#allocation4_spill]] }
   0xb   :  { %s2239_s4 = sld [smem:[#allocation5_spill]] }
   0xc   :  { %s2240_s26 = sld [smem:[#allocation6_spill]] }
   0xd   :  { %s2241_s7 = sld [smem:[#allocation7_spill]] }
   0xe   :  { %s2242_s6 = sld [smem:[#allocation8_spill]] }
   0xf   :  { %v105_v0 = vld [vmem:[%s2237_s24 + $0x78] sm:$0xff]  ;;  %v104_v1 = vld [vmem:[%s2237_s24 + $0x70] sm:$0xff]  ;;  %v103_v2 = vld [vmem:[%s2237_s24 + $0x68] sm:$0xff]  ;;  %s2243_s25 = sld [smem:[#allocation9_spill]] }
  0x10   :  { %1270 = vmatprep.subr.mxu0 %v105_v0  ;;  %v89_v3 = vld [vmem:[%s2238_s27 + $0x38] sm:$0xff]  ;;  %v88_v4 = vld [vmem:[%s2238_s27 + $0x30] sm:$0xff]  ;;  %v102_v5 = vld [vmem:[%s2237_s24 + $0x60] sm:$0xff] }
  0x11   :  { %1271 = vmatpush3.msra.mxu0 %v105_v0  ;;  %1305 = vmatprep.subr.mxu1 %v89_v3  ;;  %v87_v6 = vld [vmem:[%s2238_s27 + $0x28] sm:$0xff]  ;;  %v101_v7 = vld [vmem:[%s2237_s24 + $0x58] sm:$0xff]  ;;  %v86_v8 = vld [vmem:[%s2238_s27 + $0x20] sm:$0xff] }
  0x12   :  { %1272 = vmatprep.subr.mxu0 %v104_v1  ;;  %1306 = vmatpush3.msra.mxu1 %v89_v3  ;;  %v100_v9 = vld [vmem:[%s2237_s24 + $0x50] sm:$0xff]  ;;  %v85_v10 = vld [vmem:[%s2238_s27 + $0x18] sm:$0xff]  ;;  %v99_v11 = vld [vmem:[%s2237_s24 + $0x48] sm:$0xff] }
  0x13   :  { %1273 = vmatpush3.msra.mxu0 %v104_v1  ;;  %1307 = vmatprep.subr.mxu1 %v88_v4  ;;  %v84_v12 = vld [vmem:[%s2238_s27 + $0x10] sm:$0xff]  ;;  %v98_v13 = vld [vmem:[%s2237_s24 + $0x40] sm:$0xff]  ;;  %v83_v14 = vld [vmem:[%s2238_s27 + $0x8] sm:$0xff] }
  0x14   :  { %1274 = vmatprep.subr.mxu0 %v103_v2  ;;  %1308 = vmatpush3.msra.mxu1 %v88_v4  ;;  %v97_v15 = vld [vmem:[%s2237_s24 + $0x38] sm:$0xff]  ;;  %v82_v16 = vld [vmem:[%s2238_s27] sm:$0xff]  ;;  %v96_v17 = vld [vmem:[%s2237_s24 + $0x30] sm:$0xff] }
  0x15   :  { %1275 = vmatpush3.msra.mxu0 %v103_v2  ;;  %1309 = vmatprep.subr.mxu1 %v87_v6  ;;  %v1770_v18 = vld [vmem:[%s2239_s4] sm:$0xff]  ;;  %v1775_v19 = vld [vmem:[%s2239_s4 + $0x8] sm:$0x3f]  ;;  %v289_v22 = vld [vmem:[%s2241_s7 + $0x78] sm:$0xff] }
  0x16   :  { %1276 = vmatprep.subr.mxu0 %v102_v5  ;;  %1310 = vmatpush3.msra.mxu1 %v87_v6  ;;  %v95_v20 = vld [vmem:[%s2237_s24 + $0x28] sm:$0xff]  ;;  %v78_v21 = vld [vmem:[%s2240_s26] sm:$0xff]  ;;  %v288_v24 = vld [vmem:[%s2241_s7 + $0x70] sm:$0xff] }
  0x17   :  { %1277 = vmatpush3.msra.mxu0 %v102_v5  ;;  %1311 = vmatprep.subr.mxu1 %v86_v8  ;;  %v94_v23 = vld [vmem:[%s2237_s24 + $0x20] sm:$0xff]  ;;  %v93_v25 = vld [vmem:[%s2237_s24 + $0x18] sm:$0xff]  ;;  %v287_v26 = vld [vmem:[%s2241_s7 + $0x68] sm:$0xff] }
  0x18   :  { %1278 = vmatprep.subr.mxu0 %v101_v7  ;;  %1312 = vmatpush3.msra.mxu1 %v86_v8  ;;  %v92_v27 = vld [vmem:[%s2237_s24 + $0x10] sm:$0xff]  ;;  %v286_v28 = vld [vmem:[%s2241_s7 + $0x60] sm:$0xff]  ;;  %v91_v29 = vld [vmem:[%s2237_s24 + $0x8] sm:$0xff] }
  0x19   :  { %1279 = vmatpush3.msra.mxu0 %v101_v7  ;;  %1313 = vmatprep.subr.mxu1 %v85_v10  ;;  %v285_v30 = vld [vmem:[%s2241_s7 + $0x58] sm:$0xff]  ;;  %v90_v31 = vld [vmem:[%s2237_s24] sm:$0xff]  ;;  %v284_v32 = vld [vmem:[%s2241_s7 + $0x50] sm:$0xff]  ;;  %s2244_s24 = sld [smem:[#allocation10_spill]] }
  0x1a   :  { %1280 = vmatprep.subr.mxu0 %v100_v9  ;;  %1314 = vmatpush3.msra.mxu1 %v85_v10  ;;  %v1823_v33 = vld [vmem:[%s2240_s26 + $0x8] sm:$0x3f]  ;;  %v282_v35 = vld [vmem:[%s2241_s7 + $0x40] sm:$0xff]  ;;  %v281_v36 = vld [vmem:[%s2241_s7 + $0x38] sm:$0xff] }
  0x1b   :  { %1281 = vmatpush3.msra.mxu0 %v100_v9  ;;  %1315 = vmatprep.subr.mxu1 %v84_v12  ;;  %v283_v34 = vld [vmem:[%s2241_s7 + $0x48] sm:$0xff]  ;;  %v280_v37 = vld [vmem:[%s2241_s7 + $0x30] sm:$0xff]  ;;  %v278_v39 = vld [vmem:[%s2241_s7 + $0x20] sm:$0xff] }
  0x1c   :  { %1282 = vmatprep.subr.mxu0 %v99_v11  ;;  %1316 = vmatpush3.msra.mxu1 %v84_v12  ;;  %v279_v38 = vld [vmem:[%s2241_s7 + $0x28] sm:$0xff]  ;;  %v277_v40 = vld [vmem:[%s2241_s7 + $0x18] sm:$0xff]  ;;  %v276_v41 = vld [vmem:[%s2241_s7 + $0x10] sm:$0xff] }
  0x1d   :  { %1283 = vmatpush3.msra.mxu0 %v99_v11  ;;  %1317 = vmatprep.subr.mxu1 %v83_v14  ;;  %v275_v42 = vld [vmem:[%s2241_s7 + $0x8] sm:$0xff]  ;;  %v274_v43 = vld [vmem:[%s2241_s7] sm:$0xff]  ;;  %v539_v44 = vld [vmem:[%s2242_s6 + $0x78] sm:$0xff] }
  0x1e   :  { %1284 = vmatprep.subr.mxu0 %v98_v13  ;;  %1318 = vmatpush3.msra.mxu1 %v83_v14  ;;  %v399_v45 = vld [vmem:[%s2243_s25 + $0x78] sm:$0xff]  ;;  %v398_v46 = vld [vmem:[%s2243_s25 + $0x70] sm:$0xff]  ;;  %v397_v48 = vld [vmem:[%s2243_s25 + $0x68] sm:$0xff] }
  0x1f   :  { %1285 = vmatpush3.msra.mxu0 %v98_v13  ;;  %1319 = vmatprep.subr.mxu1 %v82_v16  ;;  %v28_v47 = vstv %s2244_s24  ;;  %v396_v49 = vld [vmem:[%s2243_s25 + $0x60] sm:$0xff]  ;;  %v395_v50 = vld [vmem:[%s2243_s25 + $0x58] sm:$0xff]  ;;  %v394_v51 = vld [vmem:[%s2243_s25 + $0x50] sm:$0xff] }
  0x20   :  { %1286 = vmatprep.subr.mxu0 %v97_v15  ;;  %1320 = vmatpush3.msra.mxu1 %v82_v16  ;;  %29 = vst [vmem:[#allocation2] sm:$0x1] %v28_v47  ;;  %v538_v0 = vld [vmem:[%s2242_s6 + $0x70] sm:$0xff]  ;;  %v537_v1 = vld [vmem:[%s2242_s6 + $0x68] sm:$0xff]  ;;  %v536_v2 = vld [vmem:[%s2242_s6 + $0x60] sm:$0xff] }
  0x21   :  { %1287 = vmatpush3.msra.mxu0 %v97_v15  ;;  %1321 = vmatprep.mubr.msk.f32.mxu1 %vm181_vm0, %v1770_v18  ;;  %v535_v3 = vld [vmem:[%s2242_s6 + $0x58] sm:$0xff]  ;;  %v534_v4 = vld [vmem:[%s2242_s6 + $0x50] sm:$0xff]  ;;  %v533_v5 = vld [vmem:[%s2242_s6 + $0x48] sm:$0xff] }
  0x22   :  { %1288 = vmatprep.subr.mxu0 %v96_v17  ;;  %1322 = vmatmul.mubr.msk.f32.vlgmr.msra.gmra.mxu1 %vm181_vm0, %v1775_v19  ;;  %v532_v6 = vld [vmem:[%s2242_s6 + $0x40] sm:$0xff]  ;;  %v531_v7 = vld [vmem:[%s2242_s6 + $0x38] sm:$0xff]  ;;  %v530_v8 = vld [vmem:[%s2242_s6 + $0x30] sm:$0xff] }
  0x23   :  { %1289 = vmatpush3.msra.mxu0 %v96_v17  ;;  %1302 = vmatprep.mubr.f32.mxu0 %v78_v21  ;;  %v529_v9 = vld [vmem:[%s2242_s6 + $0x28] sm:$0xff]  ;;  %v528_v10 = vld [vmem:[%s2242_s6 + $0x20] sm:$0xff]  ;;  %v527_v11 = vld [vmem:[%s2242_s6 + $0x18] sm:$0xff] }
  0x24   :  { %1290 = vmatprep.subr.mxu0 %v95_v20  ;;  %1324 = vmatprep.subr.mxu1 %v289_v22  ;;  %v526_v12 = vld [vmem:[%s2242_s6 + $0x10] sm:$0xff]  ;;  %v525_v13 = vld [vmem:[%s2242_s6 + $0x8] sm:$0xff]  ;;  %v524_v14 = vld [vmem:[%s2242_s6] sm:$0xff] }
  0x25   :  { %1291 = vmatpush3.msra.mxu0 %v95_v20  ;;  %1325 = vmatpush3.msra.mxu1 %v289_v22  ;;  %v1937_v15 = vld [vmem:[%s2207_s2 + $0x8] sm:$0x3f]  ;;  %v523_v16 = vld [vmem:[%s2208_s12 + $0x38] sm:$0xff]  ;;  %v522_v17 = vld [vmem:[%s2208_s12 + $0x30] sm:$0xff] }
  0x26   :  { %1292 = vmatprep.subr.mxu0 %v94_v23  ;;  %1326 = vmatprep.subr.mxu1 %v288_v24  ;;  %v521_v20 = vld [vmem:[%s2208_s12 + $0x28] sm:$0xff]  ;;  %v519_v22 = vld [vmem:[%s2208_s12 + $0x18] sm:$0xff] }
  0x27   :  { %1293 = vmatpush3.msra.mxu0 %v94_v23  ;;  %1327 = vmatpush3.msra.mxu1 %v288_v24  ;;  %v518_v23 = vld [vmem:[%s2208_s12 + $0x10] sm:$0xff]  ;;  %v516_v24 = vld [vmem:[%s2208_s12] sm:$0xff]  ;;  %v387_v47 = vld [vmem:[%s2243_s25 + $0x18] sm:$0xff] }
  0x28   :  { %1294 = vmatprep.subr.mxu0 %v93_v25  ;;  %1328 = vmatprep.subr.mxu1 %v287_v26 }
  0x29   :  { %1295 = vmatpush3.msra.mxu0 %v93_v25  ;;  %1329 = vmatpush3.msra.mxu1 %v287_v26  ;;  %v840_v25 = vld [vmem:[%s2209_s17 + $0x78] sm:$0xff]  ;;  %v839_v26 = vld [vmem:[%s2209_s17 + $0x70] sm:$0xff] }
  0x2a   :  { %1296 = vmatprep.subr.mxu0 %v92_v27  ;;  %1330 = vmatprep.subr.mxu1 %v286_v28 }
  0x2b   :  { %1297 = vmatpush3.msra.mxu0 %v92_v27  ;;  %1331 = vmatpush3.msra.mxu1 %v286_v28  ;;  %v838_v27 = vld [vmem:[%s2209_s17 + $0x68] sm:$0xff]  ;;  %v837_v28 = vld [vmem:[%s2209_s17 + $0x60] sm:$0xff] }
  0x2c   :  { %1298 = vmatprep.subr.mxu0 %v91_v29  ;;  %1332 = vmatprep.subr.mxu1 %v285_v30 }
  0x2d   :  { %1299 = vmatpush3.msra.mxu0 %v91_v29  ;;  %1333 = vmatpush3.msra.mxu1 %v285_v30  ;;  %v835_v29 = vld [vmem:[%s2209_s17 + $0x50] sm:$0xff]  ;;  %v834_v30 = vld [vmem:[%s2209_s17 + $0x48] sm:$0xff] }
  0x2e   :  { %1300 = vmatprep.subr.mxu0 %v90_v31  ;;  %1334 = vmatprep.subr.mxu1 %v284_v32 }
  0x2f   :  { %1301 = vmatpush3.msra.mxu0 %v90_v31  ;;  %1335 = vmatpush3.msra.mxu1 %v284_v32  ;;  %v833_v31 = vld [vmem:[%s2209_s17 + $0x40] sm:$0xff]  ;;  %v832_v32 = vld [vmem:[%s2209_s17 + $0x38] sm:$0xff] }
  0x30   :  { %1303 = vmatmul.mubr.f32.vlgmr.msra.gmra.mxu0 %v1823_v33  ;;  %1336 = vmatprep.subr.mxu1 %v283_v34 }
  0x31   :  { %1391 = vmatprep.mubr.f32.mxu0 %v78_v21  ;;  %1337 = vmatpush3.msra.mxu1 %v283_v34  ;;  %v520_v21 = vld [vmem:[%s2208_s12 + $0x20] sm:$0xff]  ;;  %v831_v34 = vld [vmem:[%s2209_s17 + $0x30] sm:$0xff] }
  0x32   :  { %1338 = vmatprep.subr.mxu1 %v282_v35  ;;  %1359 = vmatprep.subr.mxu0 %v399_v45 }
  0x33   :  { %1339 = vmatpush3.msra.mxu1 %v282_v35  ;;  %1360 = vmatpush3.msra.mxu0 %v399_v45  ;;  %v393_v35 = vld [vmem:[%s2243_s25 + $0x48] sm:$0xff]  ;;  %v388_v45 = vld [vmem:[%s2243_s25 + $0x20] sm:$0xff] }
  0x34   :  { %1340 = vmatprep.subr.mxu1 %v281_v36  ;;  %1361 = vmatprep.subr.mxu0 %v398_v46 }
  0x35   :  { %1341 = vmatpush3.msra.mxu1 %v281_v36  ;;  %1362 = vmatpush3.msra.mxu0 %v398_v46  ;;  %v830_v36 = vld [vmem:[%s2209_s17 + $0x28] sm:$0xff]  ;;  %v825_v46 = vld [vmem:[%s2209_s17] sm:$0xff] }
  0x36   :  { %1342 = vmatprep.subr.mxu1 %v280_v37  ;;  %1363 = vmatprep.subr.mxu0 %v397_v48 }
  0x37   :  { %1343 = vmatpush3.msra.mxu1 %v280_v37  ;;  %1364 = vmatpush3.msra.mxu0 %v397_v48  ;;  %v392_v37 = vld [vmem:[%s2243_s25 + $0x40] sm:$0xff]  ;;  %v386_v48 = vld [vmem:[%s2243_s25 + $0x10] sm:$0xff] }
  0x38   :  { %1344 = vmatprep.subr.mxu1 %v279_v38  ;;  %1365 = vmatprep.subr.mxu0 %v396_v49 }
  0x39   :  { %1345 = vmatpush3.msra.mxu1 %v279_v38  ;;  %1366 = vmatpush3.msra.mxu0 %v396_v49  ;;  %v829_v38 = vld [vmem:[%s2209_s17 + $0x20] sm:$0xff]  ;;  %v385_v49 = vld [vmem:[%s2243_s25 + $0x8] sm:$0xff] }
  0x3a   :  { %1346 = vmatprep.subr.mxu1 %v278_v39  ;;  %1367 = vmatprep.subr.mxu0 %v395_v50 }
  0x3b   :  { %1347 = vmatpush3.msra.mxu1 %v278_v39  ;;  %1368 = vmatpush3.msra.mxu0 %v395_v50  ;;  %v391_v39 = vld [vmem:[%s2243_s25 + $0x38] sm:$0xff]  ;;  %v384_v50 = vld [vmem:[%s2243_s25] sm:$0xff] }
  0x3c   :  { %1348 = vmatprep.subr.mxu1 %v277_v40  ;;  %1369 = vmatprep.subr.mxu0 %v394_v51 }
  0x3d   :  { %1349 = vmatpush3.msra.mxu1 %v277_v40  ;;  %1370 = vmatpush3.msra.mxu0 %v394_v51  ;;  %v828_v40 = vld [vmem:[%s2209_s17 + $0x18] sm:$0xff] }
  0x3e   :  { %1350 = vmatprep.subr.mxu1 %v276_v41  ;;  %1371 = vmatprep.subr.mxu0 %v393_v35  ;;  %v716_v51 = vld [vmem:[%s2210_s15 + $0x78] sm:$0xff] }
  0x3f   :  { %1351 = vmatpush3.msra.mxu1 %v276_v41  ;;  %1372 = vmatpush3.msra.mxu0 %v393_v35  ;;  %v390_v41 = vld [vmem:[%s2243_s25 + $0x30] sm:$0xff] }
  0x40   :  { %1352 = vmatprep.subr.mxu1 %v275_v42  ;;  %1373 = vmatprep.subr.mxu0 %v392_v37 }
  0x41   :  { %1353 = vmatpush3.msra.mxu1 %v275_v42  ;;  %1374 = vmatpush3.msra.mxu0 %v392_v37  ;;  %v827_v42 = vld [vmem:[%s2209_s17 + $0x10] sm:$0xff]  ;;  %v925_v37 = vld [vmem:[%s2211_s19] sm:$0xff] }
  0x42   :  { %1354 = vmatprep.subr.mxu1 %v274_v43  ;;  %1375 = vmatprep.subr.mxu0 %v391_v39 }
  0x43   :  { %1355 = vmatpush3.msra.mxu1 %v274_v43  ;;  %1376 = vmatpush3.msra.mxu0 %v391_v39  ;;  %v389_v43 = vld [vmem:[%s2243_s25 + $0x28] sm:$0xff]  ;;  %v1111_v39 = vld [vmem:[%s2214_s9] ss:$0 sm:$0xff] }
  0x44   :  { %1394 = vmatprep.subr.mxu1 %v539_v44  ;;  %1377 = vmatprep.subr.mxu0 %v390_v41 }
  0x45   :  { %1378 = vmatpush3.msra.mxu0 %v390_v41 }
  0x46   :  { %1379 = vmatprep.subr.mxu0 %v389_v43 }
  0x47   :  { %1380 = vmatpush3.msra.mxu0 %v389_v43 }
  0x48   :  { %1381 = vmatprep.subr.mxu0 %v388_v45 }
  0x49   :  { %1382 = vmatpush3.msra.mxu0 %v388_v45  ;;  %v485_v45 = vld [vmem:[%s2215_s10 + $0x8] sm:$0x3f] }
  0x4a   :  { %1383 = vmatprep.subr.mxu0 %v387_v47 }
  0x4b   :  { %1384 = vmatpush3.msra.mxu0 %v387_v47 }
  0x4c   :  { %1385 = vmatprep.subr.mxu0 %v386_v48 }
  0x4d   :  { %1386 = vmatpush3.msra.mxu0 %v386_v48 }
  0x4e   :  { %1387 = vmatprep.subr.mxu0 %v385_v49 }
  0x4f   :  { %1388 = vmatpush3.msra.mxu0 %v385_v49 }
  0x50   :  { %1389 = vmatprep.subr.mxu0 %v384_v50 }
  0x51   :  { %1390 = vmatpush3.msra.mxu0 %v384_v50 }
  0x52   :  { %1392 = vmatmul.mubr.f32.vlgmr.msra.gmra.mxu0 %v1823_v33  ;;  %1448 = vmatprep.subr.mxu0 %v716_v51  ;;  %v713_v33 = vld [vmem:[%s2210_s15 + $0x60] sm:$0xff] }
  0x53   :  { %1449 = vmatpush3.msra.mxu0 %v716_v51 }
  0xe2   :  { %v1323_v52 = vpop.f32.mrf.mxu1 }
  0xe4   :  { %v254_v56 = vpop.f32.mrf.mxu1 }
  0xf0   :  { %v1304_v53 = vpop.f32.mrf.mxu0 }
  0xf1   :  { %v260_v54 = vadd.f32 %v1323_v52, %v1304_v53  ;;  %v715_v52 = vld [vmem:[%s2210_s15 + $0x70] sm:$0xff]  ;;  %v714_v53 = vld [vmem:[%s2210_s15 + $0x68] sm:$0xff] }
  0xf2   :  { %v172_v57 = vpop.f32.mrf.mxu0  ;;  %1450 = vmatprep.subr.mxu0 %v715_v52 }
  0xf3   :  { %v255_v58 = vadd.f32 %v254_v56, %v172_v57  ;;  %v271_v59 = vadd.f32 %v1107_v55, %v260_v54  ;;  %1451 = vmatpush3.msra.mxu0 %v715_v52  ;;  %v712_v54 = vld [vmem:[%s2210_s15 + $0x58] sm:$0xff]  ;;  %v710_v56 = vld [vmem:[%s2210_s15 + $0x48] sm:$0xff]  ;;  %v709_v57 = vld [vmem:[%s2210_s15 + $0x40] sm:$0xff] }
  0xf4   :  { %1452 = vmatprep.subr.mxu0 %v714_v53  ;;  %v1117_v52 = vld [vmem:[%s2216_s16] ss:$0 sm:$0xff] }
  0xf5   :  { %v270_v60 = vadd.f32 %v1107_v55, %v255_v58  ;;  %v273_v62 = vmax.f32 %v271_v59, 0.0  ;;  %1453 = vmatpush3.msra.mxu0 %v714_v53  ;;  %v711_v55 = vld [vmem:[%s2210_s15 + $0x50] sm:$0xff]  ;;  %v708_v58 = vld [vmem:[%s2210_s15 + $0x38] sm:$0xff] }
  0xf6   :  { %1454 = vmatprep.subr.mxu0 %v713_v33  ;;  %v707_v59 = vld [vmem:[%s2210_s15 + $0x30] sm:$0xff] }
  0xf7   :  { %v272_v61 = vmax.f32 %v270_v60, 0.0  ;;  %1455 = vmatpush3.msra.mxu0 %v713_v33  ;;  %v706_v60 = vld [vmem:[%s2210_s15 + $0x28] sm:$0xff] }
  0xf8   :  { %1456 = vmatprep.subr.mxu0 %v712_v54 }
  0xf9   :  { %1356 = vmatprep.mubr.f32.mxu1 %v272_v61  ;;  %1457 = vmatpush3.msra.mxu0 %v712_v54  ;;  %v705_v61 = vld [vmem:[%s2210_s15 + $0x20] sm:$0xff] }
  0xfa   :  { %1357 = vmatmul.mubr.f32.vlgmr.msra.gmra.mxu1 %v273_v62  ;;  %1458 = vmatprep.subr.mxu0 %v711_v55  ;;  %v704_v62 = vld [vmem:[%s2210_s15 + $0x18] sm:$0xff] }
  0xfb   :  { %1395 = vmatpush3.msra.mxu1 %v539_v44  ;;  %1426 = vmatprep.mubr.f32.mxu1 %v1886_v63  ;;  %v826_v44 = vld [vmem:[%s2209_s17 + $0x8] sm:$0xff] }
  0xfc   :  { %1396 = vmatprep.subr.mxu1 %v538_v0  ;;  %1459 = vmatpush3.msra.mxu0 %v711_v55 }
  0xfd   :  { %1397 = vmatpush3.msra.mxu1 %v538_v0  ;;  %1460 = vmatprep.subr.mxu0 %v710_v56  ;;  %v702_v0 = vld [vmem:[%s2210_s15 + $0x8] sm:$0xff] }
  0xfe   :  { %1398 = vmatprep.subr.mxu1 %v537_v1  ;;  %1461 = vmatpush3.msra.mxu0 %v710_v56 }
  0xff   :  { %1399 = vmatpush3.msra.mxu1 %v537_v1  ;;  %1462 = vmatprep.subr.mxu0 %v709_v57  ;;  %v701_v1 = vld [vmem:[%s2210_s15] sm:$0xff] }
 0x100   :  { %1400 = vmatprep.subr.mxu1 %v536_v2  ;;  %1463 = vmatpush3.msra.mxu0 %v709_v57 }
 0x101   :  { %1401 = vmatpush3.msra.mxu1 %v536_v2  ;;  %1464 = vmatprep.subr.mxu0 %v708_v58  ;;  %v940_v2 = vld [vmem:[%s2211_s19 + $0x78] sm:$0xff] }
 0x102   :  { %1402 = vmatprep.subr.mxu1 %v535_v3  ;;  %1465 = vmatpush3.msra.mxu0 %v708_v58  ;;  %v1121_v58 = vld [vmem:[%s2217_s20] ss:$0 sm:$0xff] }
 0x103   :  { %1403 = vmatpush3.msra.mxu1 %v535_v3  ;;  %1466 = vmatprep.subr.mxu0 %v707_v59 }
 0x104   :  { %1404 = vmatprep.subr.mxu1 %v534_v4  ;;  %1467 = vmatpush3.msra.mxu0 %v707_v59 }
 0x105   :  { %1405 = vmatpush3.msra.mxu1 %v534_v4  ;;  %1468 = vmatprep.subr.mxu0 %v706_v60 }
 0x106   :  { %1406 = vmatprep.subr.mxu1 %v533_v5  ;;  %1469 = vmatpush3.msra.mxu0 %v706_v60 }
 0x107   :  { %1407 = vmatpush3.msra.mxu1 %v533_v5  ;;  %1470 = vmatprep.subr.mxu0 %v705_v61 }
 0x108   :  { %1408 = vmatprep.subr.mxu1 %v532_v6  ;;  %1471 = vmatpush3.msra.mxu0 %v705_v61 }
 0x109   :  { %1409 = vmatpush3.msra.mxu1 %v532_v6  ;;  %1472 = vmatprep.subr.mxu0 %v704_v62 }
 0x10a   :  { %1410 = vmatprep.subr.mxu1 %v531_v7  ;;  %1473 = vmatpush3.msra.mxu0 %v704_v62 }
 0x10b   :  { %1411 = vmatpush3.msra.mxu1 %v531_v7 }
 0x10c   :  { %1412 = vmatprep.subr.mxu1 %v530_v8 }
 0x10d   :  { %1413 = vmatpush3.msra.mxu1 %v530_v8 }
 0x10e   :  { %1414 = vmatprep.subr.mxu1 %v529_v9 }
 0x10f   :  { %1415 = vmatpush3.msra.mxu1 %v529_v9  ;;  %v1116_v9 = vld [vmem:[%s2212_s14] ss:$0 sm:$0xff] }
 0x110   :  { %1416 = vmatprep.subr.mxu1 %v528_v10 }
 0x111   :  { %1417 = vmatpush3.msra.mxu1 %v528_v10 }
 0x112   :  { %1418 = vmatprep.subr.mxu1 %v527_v11 }
 0x113   :  { %1419 = vmatpush3.msra.mxu1 %v527_v11 }
 0x114   :  { %1420 = vmatprep.subr.mxu1 %v526_v12 }
 0x115   :  { %1421 = vmatpush3.msra.mxu1 %v526_v12 }
 0x116   :  { %1422 = vmatprep.subr.mxu1 %v525_v13 }
 0x117   :  { %1423 = vmatpush3.msra.mxu1 %v525_v13 }
 0x118   :  { %1424 = vmatprep.subr.mxu1 %v524_v14 }
 0x119   :  { %1425 = vmatpush3.msra.mxu1 %v524_v14 }
 0x11a   :  { %1427 = vmatmul.mubr.f32.vlgmr.msra.gmra.mxu1 %v1937_v15  ;;  %1429 = vmatprep.subr.mxu1 %v523_v16 }
 0x11b   :  { %1430 = vmatpush3.msra.mxu1 %v523_v16  ;;  %1445 = vmatprep.mubr.msk.f32.mxu1 %vm181_vm0, %v1770_v18  ;;  %v517_v18 = vld [vmem:[%s2208_s12 + $0x8] sm:$0xff]  ;;  %v939_v16 = vld [vmem:[%s2211_s19 + $0x70] sm:$0xff] }
 0x11c   :  { %1431 = vmatprep.subr.mxu1 %v522_v17 }
 0x11d   :  { %1432 = vmatpush3.msra.mxu1 %v522_v17  ;;  %v938_v17 = vld [vmem:[%s2211_s19 + $0x68] sm:$0xff] }
 0x11e   :  { %1433 = vmatprep.subr.mxu1 %v521_v20 }
 0x11f   :  { %1434 = vmatpush3.msra.mxu1 %v521_v20  ;;  %v937_v20 = vld [vmem:[%s2211_s19 + $0x60] sm:$0xff] }
 0x120   :  { %1435 = vmatprep.subr.mxu1 %v520_v21 }
 0x121   :  { %1436 = vmatpush3.msra.mxu1 %v520_v21  ;;  %v936_v21 = vld [vmem:[%s2211_s19 + $0x58] sm:$0xff] }
 0x122   :  { %1437 = vmatprep.subr.mxu1 %v519_v22 }
 0x123   :  { %1438 = vmatpush3.msra.mxu1 %v519_v22  ;;  %v935_v22 = vld [vmem:[%s2211_s19 + $0x50] sm:$0xff] }
 0x124   :  { %1439 = vmatprep.subr.mxu1 %v518_v23 }
 0x125   :  { %1440 = vmatpush3.msra.mxu1 %v518_v23  ;;  %v934_v23 = vld [vmem:[%s2211_s19 + $0x48] sm:$0xff] }
 0x126   :  { %1441 = vmatprep.subr.mxu1 %v517_v18 }
 0x127   :  { %1442 = vmatpush3.msra.mxu1 %v517_v18  ;;  %v933_v18 = vld [vmem:[%s2211_s19 + $0x40] sm:$0xff] }
 0x128   :  { %1443 = vmatprep.subr.mxu1 %v516_v24 }
 0x129   :  { %1444 = vmatpush3.msra.mxu1 %v516_v24  ;;  %v932_v24 = vld [vmem:[%s2211_s19 + $0x38] sm:$0xff] }
 0x12a   :  { %1446 = vmatmul.mubr.msk.f32.vlgmr.msra.gmra.mxu1 %vm181_vm0, %v1775_v19  ;;  %1483 = vmatprep.subr.mxu1 %v840_v25  ;;  %v836_v19 = vld [vmem:[%s2209_s17 + $0x58] sm:$0xff] }
 0x12b   :  { %1484 = vmatpush3.msra.mxu1 %v840_v25  ;;  %1515 = vmatprep.mubr.f32.mxu1 %v1886_v63  ;;  %v703_v63 = vld [vmem:[%s2210_s15 + $0x10] sm:$0xff] }
 0x12c   :  { %1485 = vmatprep.subr.mxu1 %v839_v26  ;;  %1474 = vmatprep.subr.mxu0 %v703_v63  ;;  %v931_v25 = vld [vmem:[%s2211_s19 + $0x30] sm:$0xff] }
 0x12d   :  { %1486 = vmatpush3.msra.mxu1 %v839_v26  ;;  %1475 = vmatpush3.msra.mxu0 %v703_v63  ;;  %v930_v26 = vld [vmem:[%s2211_s19 + $0x28] sm:$0xff]  ;;  %v510_v63 = vld [vmem:[%s2218_s21] sm:$0xff] }
 0x12e   :  { %1487 = vmatprep.subr.mxu1 %v838_v27  ;;  %1476 = vmatprep.subr.mxu0 %v702_v0 }
 0x12f   :  { %1488 = vmatpush3.msra.mxu1 %v838_v27  ;;  %1477 = vmatpush3.msra.mxu0 %v702_v0  ;;  %v929_v27 = vld [vmem:[%s2211_s19 + $0x20] sm:$0xff] }
 0x130   :  { %1489 = vmatprep.subr.mxu1 %v837_v28  ;;  %1478 = vmatprep.subr.mxu0 %v701_v1 }
 0x131   :  { %1490 = vmatpush3.msra.mxu1 %v837_v28  ;;  %1479 = vmatpush3.msra.mxu0 %v701_v1  ;;  %v928_v28 = vld [vmem:[%s2211_s19 + $0x18] sm:$0xff] }
 0x132   :  { %1491 = vmatprep.subr.mxu1 %v836_v19  ;;  %1518 = vmatprep.subr.mxu0 %v940_v2 }
 0x133   :  { %1492 = vmatpush3.msra.mxu1 %v836_v19 }
 0x134   :  { %1493 = vmatprep.subr.mxu1 %v835_v29 }
 0x135   :  { %1494 = vmatpush3.msra.mxu1 %v835_v29  ;;  %v1120_v29 = vld [vmem:[%s2213_s18] ss:$0 sm:$0xff] }
 0x136   :  { %1495 = vmatprep.subr.mxu1 %v834_v30 }
 0x137   :  { %1496 = vmatpush3.msra.mxu1 %v834_v30  ;;  %v927_v30 = vld [vmem:[%s2211_s19 + $0x10] sm:$0xff] }
 0x138   :  { %1497 = vmatprep.subr.mxu1 %v833_v31 }
 0x139   :  { %1498 = vmatpush3.msra.mxu1 %v833_v31 }
 0x13a   :  { %1499 = vmatprep.subr.mxu1 %v832_v32 }
 0x13b   :  { %1500 = vmatpush3.msra.mxu1 %v832_v32 }
 0x13c   :  { %1501 = vmatprep.subr.mxu1 %v831_v34 }
 0x13d   :  { %1502 = vmatpush3.msra.mxu1 %v831_v34  ;;  %v926_v34 = vld [vmem:[%s2211_s19 + $0x8] sm:$0xff] }
 0x13e   :  { %1503 = vmatprep.subr.mxu1 %v830_v36 }
 0x13f   :  { %1504 = vmatpush3.msra.mxu1 %v830_v36 }
 0x140   :  { %1505 = vmatprep.subr.mxu1 %v829_v38 }
 0x141   :  { %1506 = vmatpush3.msra.mxu1 %v829_v38  ;;  %v1393_v38 = vpop.f32.mrf.mxu0 }
 0x142   :  { %1507 = vmatprep.subr.mxu1 %v828_v40 }
 0x143   :  { %1508 = vmatpush3.msra.mxu1 %v828_v40  ;;  %v479_v40 = vadd.f32 %v1393_v38, %v1111_v39  ;;  %v473_v41 = vpop.f32.mrf.mxu0  ;;  %v512_v38 = vld [vmem:[%s2220_s22] sm:$0xff] }
 0x144   :  { %1509 = vmatprep.subr.mxu1 %v827_v42 }
 0x145   :  { %1510 = vmatpush3.msra.mxu1 %v827_v42  ;;  %v483_v43 = vmax.f32 %v479_v40, 0.0 }
 0x146   :  { %1511 = vmatprep.subr.mxu1 %v826_v44 }
 0x147   :  { %1512 = vmatpush3.msra.mxu1 %v826_v44  ;;  %v474_v44 = vadd.f32 %v1111_v39, %v473_v41  ;;  %v487_v48 = vmul.f32 %v485_v45, %v483_v43  ;;  %v514_v41 = vmax.f32 %v512_v38, 1.0 }
 0x148   :  { %1513 = vmatprep.subr.mxu1 %v825_v46 }
 0x149   :  { %1514 = vmatpush3.msra.mxu1 %v825_v46  ;;  %v484_v46 = vld [vmem:[%s2215_s10] sm:$0xff]  ;;  %v482_v47 = vmax.f32 %v474_v44, 0.0  ;;  %v491_v50 = vsel %vm490_vm1, %v487_v48, 0.0 }
 0x14a   :  { %1516 = vmatmul.mubr.f32.vlgmr.msra.gmra.mxu1 %v1937_v15 }
 0x14b   :  { %v486_v49 = vmul.f32 %v484_v46, %v482_v47 }
 0x14d   :  { %488 = vadd.xlane.f32.xlu0 %v486_v49 }
 0x151   :  { %492 = vadd.xlane.f32.xlu0 %v491_v50 }
 0x1ba   :  { %v2100_v3 = vpop.f32.mrf.mxu1 }
 0x1bc   :  { %v2102_v4 = vpop.f32.mrf.mxu1 }
 0x1da   :  { %v1428_v5 = vpop.f32.mrf.mxu1 }
 0x1dc   :  { %v606_v6 = vpop.f32.mrf.mxu1 }
 0x1ea   :  { %v1447_v7 = vpop.f32.mrf.mxu1 }
 0x1eb   :  { %v687_v8 = vadd.f32 %v1447_v7, %v1428_v5 }
 0x1ec   :  { %v681_v10 = vpop.f32.mrf.mxu1 }
 0x1ed   :  { %v682_v11 = vadd.f32 %v681_v10, %v606_v6  ;;  %v698_v12 = vadd.f32 %v1116_v9, %v687_v8 }
 0x1ef   :  { %v697_v13 = vadd.f32 %v1116_v9, %v682_v11  ;;  %v700_v15 = vmax.f32 %v698_v12, 0.0 }
 0x1f1   :  { %v699_v14 = vmax.f32 %v697_v13, 0.0 }
 0x1f3   :  { %1480 = vmatprep.mubr.f32.mxu0 %v699_v14 }
 0x1f4   :  { %1481 = vmatmul.mubr.f32.vlgmr.msra.gmra.mxu0 %v700_v15  ;;  %v511_v15 = vld [vmem:[%s2218_s21 + $0x8] sm:$0x3f] }
 0x1f5   :  { %1519 = vmatpush3.msra.mxu0 %v940_v2 }
 0x1f6   :  { %1520 = vmatprep.subr.mxu0 %v939_v16 }
 0x1f7   :  { %1521 = vmatpush3.msra.mxu0 %v939_v16 }
 0x1f8   :  { %1522 = vmatprep.subr.mxu0 %v938_v17 }
 0x1f9   :  { %1523 = vmatpush3.msra.mxu0 %v938_v17 }
 0x1fa   :  { %1524 = vmatprep.subr.mxu0 %v937_v20 }
 0x1fb   :  { %1525 = vmatpush3.msra.mxu0 %v937_v20 }
 0x1fc   :  { %1526 = vmatprep.subr.mxu0 %v936_v21 }
 0x1fd   :  { %1527 = vmatpush3.msra.mxu0 %v936_v21 }
 0x1fe   :  { %1528 = vmatprep.subr.mxu0 %v935_v22 }
 0x1ff   :  { %1529 = vmatpush3.msra.mxu0 %v935_v22 }
 0x200   :  { %1530 = vmatprep.subr.mxu0 %v934_v23 }
 0x201   :  { %1531 = vmatpush3.msra.mxu0 %v934_v23 }
 0x202   :  { %1532 = vmatprep.subr.mxu0 %v933_v18 }
 0x203   :  { %1533 = vmatpush3.msra.mxu0 %v933_v18 }
 0x204   :  { %1534 = vmatprep.subr.mxu0 %v932_v24 }
 0x205   :  { %1535 = vmatpush3.msra.mxu0 %v932_v24 }
 0x206   :  { %1536 = vmatprep.subr.mxu0 %v931_v25 }
 0x207   :  { %1537 = vmatpush3.msra.mxu0 %v931_v25  ;;  %v1592_v25 = vmov 0  }
 0x208   :  { %1538 = vmatprep.subr.mxu0 %v930_v26  ;;  %1555 = vset.pattern.permute.xlu1 %v1592_v25 }
 0x209   :  { %1539 = vmatpush3.msra.mxu0 %v930_v26  ;;  %1554 = vset.pattern.permute.xlu0 %v1592_v25  ;;  %v489_v26 = vpop.xlane.xlu0 %488 }
 0x20a   :  { %1540 = vmatprep.subr.mxu0 %v929_v27  ;;  %v1517_v19 = vpop.f32.mrf.mxu1 }
 0x20b   :  { %1541 = vmatpush3.msra.mxu0 %v929_v27  ;;  %v920_v35 = vadd.f32 %v1517_v19, %v1120_v29  ;;  %v494_v27 = vld [vmem:[%s2219_s11] sm:$0xff]  ;;  %v495_v19 = vld [vmem:[%s2219_s11 + $0x8] sm:$0x3f] }
 0x20c   :  { %1542 = vmatprep.subr.mxu0 %v928_v28  ;;  %v914_v31 = vpop.f32.mrf.mxu1 }
 0x20d   :  { %v915_v32 = vadd.f32 %v1120_v29, %v914_v31  ;;  %1543 = vmatpush3.msra.mxu0 %v928_v28  ;;  %v924_v42 = vmax.f32 %v920_v35, 0.0  ;;  %v496_v28 = vadd.f32 %v494_v27, %v489_v26  ;;  %v493_v29 = vpop.xlane.xlu0 %492 }
 0x20e   :  { %1544 = vmatprep.subr.mxu0 %v927_v30 }
 0x20f   :  { %v923_v36 = vmax.f32 %v915_v32, 0.0  ;;  %1545 = vmatpush3.msra.mxu0 %v927_v30  ;;  %v497_v30 = vadd.f32 %v495_v19, %v493_v29  ;;  %v1112_v31 = vmul.f32 -1.442695, %v496_v28  ;;  %v513_v32 = vld [vmem:[%s2220_s22 + $0x8] sm:$0x3f] }
 0x210   :  { %1546 = vmatprep.subr.mxu0 %v926_v34 }
 0x211   :  { %1547 = vmatpush3.msra.mxu0 %v926_v34  ;;  %1550 = vmatprep.mubr.f32.mxu0 %v923_v36  ;;  %v1108_v34 = vld [vmem:[#allocation2] ss:$0 sm:$0xff]  ;;  %v1113_v36 = vmul.f32 -1.442695, %v497_v30 }
 0x212   :  { %1548 = vmatprep.subr.mxu0 %v925_v37  ;;  %v364_v35 = vadd.f32 %v1108_v34, %v2102_v4  ;;  %v369_v40 = vadd.f32 %v2100_v3, %v1108_v34 }
 0x213   :  { %1549 = vmatpush3.msra.mxu0 %v925_v37  ;;  %v515_v37 = vmax.f32 %v513_v32, 1.0 }
 0x214   :  { %1551 = vmatmul.mubr.f32.vlgmr.msra.gmra.mxu0 %v924_v42  ;;  %v1109_v39 = vmul.f32 -1.442695, %v364_v35  ;;  %v1110_v42 = vmul.f32 -1.442695, %v369_v40 }
 0x2b4   :  { %v1482_v51 = vpop.f32.mrf.mxu0 }
 0x2b5   :  { %v796_v57 = vadd.f32 %v1482_v51, %v1117_v52 }
 0x2b6   :  { %v790_v53 = vpop.f32.mrf.mxu0 }
 0x2b7   :  { %v791_v33 = vadd.f32 %v1117_v52, %v790_v53  ;;  %v1119_v59 = vmul.f32 -1.442695, %v796_v57 }
 0x2b9   :  { %v1118_v54 = vmul.f32 -1.442695, %v791_v33 }
 0x2bb   :  { %1556 = vpow2.f32 %v1118_v54 }
 0x2c8   :  { %v1557_v55 = vpop.eup %1556 }
 0x2c9   :  { %v805_v56 = vadd.f32 1.0, %v1557_v55 }
 0x2cb   :  { %1558 = vrcp.f32 %v805_v56 }
 0x2cc   :  { %1560 = vpow2.f32 %v1119_v59 }
 0x2d4   :  { %v1552_v60 = vpop.f32.mrf.mxu0 }
 0x2d5   :  { %v1020_v61 = vadd.f32 %v1552_v60, %v1121_v58 }
 0x2d6   :  { %v1014_v62 = vpop.f32.mrf.mxu0 }
 0x2d7   :  { %v1123_v0 = vmul.f32 -1.442695, %v1020_v61  ;;  %v1015_v1 = vadd.f32 %v1121_v58, %v1014_v62 }
 0x2d8   :  { %v1559_v2 = vpop.eup %1558 }
 0x2d9   :  { %1562 = vpow2.f32 %v1123_v0  ;;  %v1122_v5 = vmul.f32 -1.442695, %v1015_v1  ;;  %v811_v6 = vmul.f32 %v1559_v2, %v510_v63  ;;  %v1561_v8 = vpop.eup %1560  ;;  %v1045_v0 = vlaneseq }
 0x2da   :  { %v806_v12 = vadd.f32 1.0, %v1561_v8 }
 0x2db   :  { %1564 = vpow2.f32 %v1122_v5  ;;  %v814_v7 = vsel %vm813_vm2, %v811_v6, 0.0  ;;  %v1046_v2 = vand.u32 127, %v1045_v0 }
 0x2dc   :  { %815 = vadd.xlane.f32.xlu0 %v814_v7 }
 0x2dd   :  { %vm1050_vm4 = vcmp.eq.s32.totalorder %v1046_v2, 3  ;;  %vm1049_vm5 = vcmp.eq.s32.totalorder %v1046_v2, 2  ;;  %vm1048_vm6 = vcmp.eq.s32.totalorder %v1046_v2, 1  ;;  %vm1047_vm7 = vcmp.eq.s32.totalorder %v1046_v2, 0 }
 0x2e6   :  { %v1563_v9 = vpop.eup %1562 }
 0x2e7   :  { %v1030_v10 = vadd.f32 1.0, %v1563_v9 }
 0x2e8   :  { %v1565_v11 = vpop.eup %1564 }
 0x2e9   :  { %1566 = vrcp.f32 %v1030_v10  ;;  %v1029_v13 = vadd.f32 1.0, %v1565_v11 }
 0x2eb   :  { %1568 = vrcp.f32 %v1029_v13 }
 0x2ec   :  { %1570 = vrcp.f32 %v806_v12 }
 0x2ed   :  { %1572 = vpow2.f32 %v1112_v31 }
 0x2ee   :  { %1574 = vpow2.f32 %v1113_v36 }
 0x2ef   :  { %1576 = vrcp.f32 %v515_v37 }
 0x2f0   :  { %1578 = vpow2.f32 %v1109_v39 }
 0x2f1   :  { %1580 = vrcp.f32 %v514_v41 }
 0x2f2   :  { %1582 = vpow2.f32 %v1110_v42 }
 0x2f6   :  { %v1567_v14 = vpop.eup %1566 }
 0x2f7   :  { %v1036_v16 = vmul.f32 %v1567_v14, %v511_v15 }
 0x2f8   :  { %v1569_v17 = vpop.eup %1568 }
 0x2f9   :  { %v1040_v20 = vsel %vm817_vm3, %v1036_v16, 0.0  ;;  %v1035_v21 = vmul.f32 %v1569_v17, %v510_v63  ;;  %v1571_v22 = vpop.eup %1570 }
 0x2fa   :  { %1041 = vadd.xlane.f32.xlu1 %v1040_v20  ;;  %v812_v18 = vmul.f32 %v1571_v22, %v511_v15  ;;  %v1573_v43 = vpop.eup %1572 }
 0x2fb   :  { %v1037_v23 = vsel %vm813_vm2, %v1035_v21, 0.0  ;;  %v1575_v44 = vpop.eup %1574  ;;  %v504_v4 = vadd.f32 1.0, %v1573_v43 }
 0x2fc   :  { %v818_v24 = vsel %vm817_vm3, %v812_v18, 0.0  ;;  %v1577_v45 = vpop.eup %1576  ;;  %v505_v48 = vadd.f32 1.0, %v1575_v44 }
 0x2fd   :  { %v1579_v47 = vpop.eup %1578  ;;  %1584 = vrcp.f32 %v504_v4 }
 0x2fe   :  { %1038 = vadd.xlane.f32.xlu1 %v1037_v23  ;;  %v1581_v50 = vpop.eup %1580  ;;  %v378_v3 = vadd.f32 1.0, %v1579_v47  ;;  %1586 = vrcp.f32 %v505_v48 }
 0x2ff   :  { %v1583_v54 = vpop.eup %1582 }
 0x300   :  { %v379_v56 = vadd.f32 1.0, %v1583_v54  ;;  %1588 = vrcp.f32 %v378_v3 }
 0x302   :  { %819 = vadd.xlane.f32.xlu1 %v818_v24  ;;  %1590 = vrcp.f32 %v379_v56 }
 0x30a   :  { %v1585_v58 = vpop.eup %1584 }
 0x30b   :  { %v1587_v59 = vpop.eup %1586 }
 0x30d   :  { %v1589_v60 = vpop.eup %1588 }
 0x30f   :  { %v1591_v61 = vpop.eup %1590 }
 0x365   :  { %v816_v51 = vpop.xlane.xlu0 %815 }
 0x366   :  { %v822_v53 = vmul.f32 %v1581_v50, %v816_v51 }
 0x383   :  { %v1042_v46 = vpop.xlane.xlu1 %1041 }
 0x384   :  { %v1044_v49 = vmul.f32 %v1577_v45, %v1042_v46 }
 0x386   :  { %1058 = vperm.xlu1 %1555, %v1044_v49  }
 0x387   :  { %v1039_v52 = vpop.xlane.xlu1 %1038 }
 0x388   :  { %v1043_v33 = vmul.f32 %v1581_v50, %v1039_v52 }
 0x38a   :  { %1053 = vperm.xlu0 %1554, %v1043_v33   ;;  %1065 = vperm.xlu1 %1555, %v822_v53  }
 0x38b   :  { %v820_v55 = vpop.xlane.xlu1 %819 }
 0x38c   :  { %v824_v57 = vmul.f32 %v1577_v45, %v820_v55 }
 0x38e   :  { %1070 = vperm.xlu1 %1555, %v824_v57  }
 0x392   :  { %1077 = vperm.xlu1 %1555, %v1585_v58  }
 0x396   :  { %1082 = vperm.xlu1 %1555, %v1587_v59  }
 0x39a   :  { %1089 = vperm.xlu1 %1555, %v1589_v60  }
 0x39e   :  { %1094 = vperm.xlu1 %1555, %v1591_v61  }
 0x401   :  { %v1059_v62 = vpop.permute.xlu1 %1058 }
 0x402   :  { %v1062_v13 = vsel %vm1050_vm4, %v1059_v62, 0.0 }
 0x405   :  { %v1066_v63 = vpop.permute.xlu1 %1065  ;;  %v1054_v6 = vpop.permute.xlu0 %1053 }
 0x406   :  { %v1061_v7 = vsel %vm1050_vm4, %v1054_v6, 0.0 }
 0x407   :  { %v1073_v9 = vsel %vm1049_vm5, %v1066_v63, %v1061_v7 }
 0x409   :  { %v1071_v1 = vpop.permute.xlu1 %1070 }
 0x40a   :  { %v1074_v14 = vsel %vm1049_vm5, %v1071_v1, %v1062_v13 }
 0x40d   :  { %v1078_v5 = vpop.permute.xlu1 %1077 }
 0x40e   :  { %v1085_v10 = vsel %vm1048_vm6, %v1078_v5, %v1073_v9 }
 0x411   :  { %v1083_v8 = vpop.permute.xlu1 %1082 }
 0x412   :  { %v1086_v15 = vsel %vm1048_vm6, %v1083_v8, %v1074_v14 }
 0x415   :  { %v1090_v11 = vpop.permute.xlu1 %1089 }
 0x416   :  { %v1097_v12 = vsel %vm1047_vm7, %v1090_v11, %v1085_v10 }
 0x417   :  { %1099 = vst [vmem:[%s2221_s23] sm:$0xff] %v1097_v12 }
 0x419   :  { %v1095_v16 = vpop.permute.xlu1 %1094 }
 0x41a   :  { %v1098_v17 = vsel %vm1047_vm7, %v1095_v16, %v1086_v15 }
 0x41b   :  { %1100 = vst [vmem:[%s2221_s23 + $0x8] sm:$0x3f] %v1098_v17 }

// kernel: qikt_forward.2
= control target key start
LH: loop header
LB: loop body
LE: loop exit
PB: predicated region body
PF: predicated region fallthrough
CT: control target
= control target key end

     0   :  { %v6163_v3 = vmov 0.0   ;;  %s6157_s2 = inlined_call_operand.vmem [shape: f32[128,512], index: 2, kind: input, shape index: {}]   ;;  %s6158_s3 = inlined_call_operand.vmem [shape: f32[128,512], index: 3, kind: input, shape index: {}]   ;;  %s6159_s0 = inlined_call_operand.vmem [shape: f32[7,2,512], index: 0, kind: input, shape index: {}]   ;;  %s6160_s1 = inlined_call_operand.vmem [shape: f32[7,2,512], index: 1, kind: input, shape index: {}]   ;;  %s6161_s4 = inlined_call_operand.vmem [shape: f32[7,2,128], index: 4, kind: output, shape index: {0}]   ;;  %s6162_s5 = inlined_call_operand.vmem [shape: f32[7,2,128], index: 5, kind: output, shape index: {1}]  }
   0x1   :  { %v3534_v0 = vld [vmem:[%s6157_s2 + $0x1e8] sm:$0xff]  ;;  %v3539_v1 = vld [vmem:[%s6157_s2 + $0x1f8] sm:$0xff]  ;;  %v3544_v2 = vld [vmem:[%s6157_s2 + $0x1e0] sm:$0xff]  ;;  %212 = vmatprep.mubr.f32.mxu0 %v6163_v3  ;;  %283 = vmatprep.mubr.f32.mxu1 %v6163_v3 }
   0x2   :  { %148 = vmatprep.subr.mxu0 %v3534_v0  ;;  %219 = vmatprep.subr.mxu1 %v3539_v1  ;;  %v3553_v4 = vld [vmem:[%s6157_s2 + $0x1f0] sm:$0xff]  ;;  %v3558_v5 = vld [vmem:[%s6157_s2 + $0x1c8] sm:$0xff]  ;;  %v3563_v6 = vld [vmem:[%s6157_s2 + $0x1d8] sm:$0xff] }
   0x3   :  { %149 = vmatpush1.msra.mxu0 %v3544_v2  ;;  %220 = vmatpush1.msra.mxu1 %v3553_v4  ;;  %v3570_v7 = vld [vmem:[%s6157_s2 + $0x1c0] sm:$0xff]  ;;  %v3575_v8 = vld [vmem:[%s6157_s2 + $0x1d0] sm:$0xff]  ;;  %v3580_v9 = vld [vmem:[%s6157_s2 + $0x1a8] sm:$0xff] }
   0x4   :  { %150 = vmatprep.subr.mxu0 %v3558_v5  ;;  %221 = vmatprep.subr.mxu1 %v3563_v6  ;;  %v3587_v10 = vld [vmem:[%s6157_s2 + $0x1b8] sm:$0xff]  ;;  %v3592_v11 = vld [vmem:[%s6157_s2 + $0x1a0] sm:$0xff]  ;;  %v3597_v12 = vld [vmem:[%s6157_s2 + $0x1b0] sm:$0xff] }
   0x5   :  { %151 = vmatpush1.msra.mxu0 %v3570_v7  ;;  %222 = vmatpush1.msra.mxu1 %v3575_v8  ;;  %v3604_v13 = vld [vmem:[%s6157_s2 + $0x188] sm:$0xff]  ;;  %v3609_v14 = vld [vmem:[%s6157_s2 + $0x198] sm:$0xff]  ;;  %v3616_v15 = vld [vmem:[%s6157_s2 + $0x180] sm:$0xff] }
   0x6   :  { %152 = vmatprep.subr.mxu0 %v3580_v9  ;;  %223 = vmatprep.subr.mxu1 %v3587_v10  ;;  %v3621_v16 = vld [vmem:[%s6157_s2 + $0x190] sm:$0xff]  ;;  %v3628_v17 = vld [vmem:[%s6157_s2 + $0x168] sm:$0xff]  ;;  %v3633_v18 = vld [vmem:[%s6157_s2 + $0x178] sm:$0xff] }
   0x7   :  { %153 = vmatpush1.msra.mxu0 %v3592_v11  ;;  %224 = vmatpush1.msra.mxu1 %v3597_v12  ;;  %v3640_v19 = vld [vmem:[%s6157_s2 + $0x160] sm:$0xff]  ;;  %v3645_v20 = vld [vmem:[%s6157_s2 + $0x170] sm:$0xff]  ;;  %v3652_v21 = vld [vmem:[%s6157_s2 + $0x148] sm:$0xff] }
   0x8   :  { %154 = vmatprep.subr.mxu0 %v3604_v13  ;;  %225 = vmatprep.subr.mxu1 %v3609_v14  ;;  %v3657_v22 = vld [vmem:[%s6157_s2 + $0x158] sm:$0xff]  ;;  %v3664_v23 = vld [vmem:[%s6157_s2 + $0x140] sm:$0xff]  ;;  %v3669_v24 = vld [vmem:[%s6157_s2 + $0x150] sm:$0xff] }
   0x9   :  { %155 = vmatpush1.msra.mxu0 %v3616_v15  ;;  %226 = vmatpush1.msra.mxu1 %v3621_v16  ;;  %v3676_v25 = vld [vmem:[%s6157_s2 + $0x128] sm:$0xff]  ;;  %v3681_v26 = vld [vmem:[%s6157_s2 + $0x138] sm:$0xff]  ;;  %v3688_v27 = vld [vmem:[%s6157_s2 + $0x120] sm:$0xff] }
   0xa   :  { %156 = vmatprep.subr.mxu0 %v3628_v17  ;;  %227 = vmatprep.subr.mxu1 %v3633_v18  ;;  %v3693_v28 = vld [vmem:[%s6157_s2 + $0x130] sm:$0xff]  ;;  %v3700_v29 = vld [vmem:[%s6157_s2 + $0x108] sm:$0xff]  ;;  %v3705_v30 = vld [vmem:[%s6157_s2 + $0x118] sm:$0xff] }
   0xb   :  { %157 = vmatpush1.msra.mxu0 %v3640_v19  ;;  %228 = vmatpush1.msra.mxu1 %v3645_v20  ;;  %v3712_v31 = vld [vmem:[%s6157_s2 + $0x100] sm:$0xff]  ;;  %v3717_v32 = vld [vmem:[%s6157_s2 + $0x110] sm:$0xff]  ;;  %v3724_v33 = vld [vmem:[%s6157_s2 + $0xe8] sm:$0xff] }
   0xc   :  { %158 = vmatprep.subr.mxu0 %v3652_v21  ;;  %229 = vmatprep.subr.mxu1 %v3657_v22  ;;  %v3729_v34 = vld [vmem:[%s6157_s2 + $0xf8] sm:$0xff]  ;;  %v3736_v35 = vld [vmem:[%s6157_s2 + $0xe0] sm:$0xff]  ;;  %v3741_v36 = vld [vmem:[%s6157_s2 + $0xf0] sm:$0xff] }
   0xd   :  { %159 = vmatpush1.msra.mxu0 %v3664_v23  ;;  %230 = vmatpush1.msra.mxu1 %v3669_v24  ;;  %6474 = vst [vmem:[#allocation2_spill] sm:$0xff] %v3741_v36  ;;  %v3748_v37 = vld [vmem:[%s6157_s2 + $0xc8] sm:$0xff]  ;;  %v3753_v38 = vld [vmem:[%s6157_s2 + $0xd8] sm:$0xff]  ;;  %v3760_v39 = vld [vmem:[%s6157_s2 + $0xc0] sm:$0xff] }
   0xe   :  { %160 = vmatprep.subr.mxu0 %v3676_v25  ;;  %231 = vmatprep.subr.mxu1 %v3681_v26  ;;  %6475 = vst [vmem:[#allocation3_spill] sm:$0xff] %v3748_v37  ;;  %6476 = vst [vmem:[#allocation4_spill] sm:$0xff] %v3753_v38  ;;  %v3765_v40 = vld [vmem:[%s6157_s2 + $0xd0] sm:$0xff]  ;;  %v3772_v41 = vld [vmem:[%s6157_s2 + $0xa8] sm:$0xff] }
   0xf   :  { %161 = vmatpush1.msra.mxu0 %v3688_v27  ;;  %232 = vmatpush1.msra.mxu1 %v3693_v28  ;;  %6477 = vst [vmem:[#allocation5_spill] sm:$0xff] %v3760_v39  ;;  %6478 = vst [vmem:[#allocation6_spill] sm:$0xff] %v3765_v40  ;;  %v3777_v42 = vld [vmem:[%s6157_s2 + $0xb8] sm:$0xff]  ;;  %v3784_v43 = vld [vmem:[%s6157_s2 + $0xa0] sm:$0xff] }
  0x10   :  { %162 = vmatprep.subr.mxu0 %v3700_v29  ;;  %233 = vmatprep.subr.mxu1 %v3705_v30  ;;  %6479 = vst [vmem:[#allocation7_spill] sm:$0xff] %v3772_v41  ;;  %6480 = vst [vmem:[#allocation8_spill] sm:$0xff] %v3777_v42  ;;  %v3789_v44 = vld [vmem:[%s6157_s2 + $0xb0] sm:$0xff]  ;;  %v3796_v45 = vld [vmem:[%s6157_s2 + $0x88] sm:$0xff] }
  0x11   :  { %163 = vmatpush1.msra.mxu0 %v3712_v31  ;;  %234 = vmatpush1.msra.mxu1 %v3717_v32  ;;  %6481 = vst [vmem:[#allocation9_spill] sm:$0xff] %v3784_v43  ;;  %6482 = vst [vmem:[#allocation10_spill] sm:$0xff] %v3789_v44  ;;  %v3801_v46 = vld [vmem:[%s6157_s2 + $0x98] sm:$0xff]  ;;  %v3808_v47 = vld [vmem:[%s6157_s2 + $0x80] sm:$0xff] }
  0x12   :  { %164 = vmatprep.subr.mxu0 %v3724_v33  ;;  %235 = vmatprep.subr.mxu1 %v3729_v34  ;;  %6483 = vst [vmem:[#allocation11_spill] sm:$0xff] %v3796_v45  ;;  %6484 = vst [vmem:[#allocation12_spill] sm:$0xff] %v3801_v46  ;;  %v3813_v48 = vld [vmem:[%s6157_s2 + $0x90] sm:$0xff]  ;;  %v3820_v49 = vld [vmem:[%s6157_s2 + $0x68] sm:$0xff] }
  0x13   :  { %165 = vmatpush1.msra.mxu0 %v3736_v35  ;;  %236 = vmatpush1.msra.mxu1 %v3741_v36  ;;  %6485 = vst [vmem:[#allocation13_spill] sm:$0xff] %v3808_v47  ;;  %6486 = vst [vmem:[#allocation14_spill] sm:$0xff] %v3813_v48  ;;  %v3825_v50 = vld [vmem:[%s6157_s2 + $0x78] sm:$0xff]  ;;  %v3832_v51 = vld [vmem:[%s6157_s2 + $0x60] sm:$0xff] }
  0x14   :  { %166 = vmatprep.subr.mxu0 %v3748_v37  ;;  %237 = vmatprep.subr.mxu1 %v3753_v38  ;;  %6487 = vst [vmem:[#allocation15_spill] sm:$0xff] %v3820_v49  ;;  %6488 = vst [vmem:[#allocation16_spill] sm:$0xff] %v3825_v50  ;;  %v3837_v52 = vld [vmem:[%s6157_s2 + $0x70] sm:$0xff]  ;;  %v3844_v53 = vld [vmem:[%s6157_s2 + $0x48] sm:$0xff] }
  0x15   :  { %167 = vmatpush1.msra.mxu0 %v3760_v39  ;;  %238 = vmatpush1.msra.mxu1 %v3765_v40  ;;  %6489 = vst [vmem:[#allocation17_spill] sm:$0xff] %v3832_v51  ;;  %6490 = vst [vmem:[#allocation18_spill] sm:$0xff] %v3837_v52  ;;  %v3849_v54 = vld [vmem:[%s6157_s2 + $0x58] sm:$0xff]  ;;  %v3856_v55 = vld [vmem:[%s6157_s2 + $0x40] sm:$0xff] }
  0x16   :  { %168 = vmatprep.subr.mxu0 %v3772_v41  ;;  %239 = vmatprep.subr.mxu1 %v3777_v42  ;;  %6491 = vst [vmem:[#allocation19_spill] sm:$0xff] %v3844_v53  ;;  %6492 = vst [vmem:[#allocation20_spill] sm:$0xff] %v3849_v54  ;;  %v3861_v56 = vld [vmem:[%s6157_s2 + $0x50] sm:$0xff]  ;;  %v3868_v57 = vld [vmem:[%s6157_s2 + $0x28] sm:$0xff] }
  0x17   :  { %169 = vmatpush1.msra.mxu0 %v3784_v43  ;;  %240 = vmatpush1.msra.mxu1 %v3789_v44  ;;  %6493 = vst [vmem:[#allocation21_spill] sm:$0xff] %v3856_v55  ;;  %6494 = vst [vmem:[#allocation22_spill] sm:$0xff] %v3861_v56  ;;  %v3873_v58 = vld [vmem:[%s6157_s2 + $0x38] sm:$0xff]  ;;  %v3880_v59 = vld [vmem:[%s6157_s2 + $0x20] sm:$0xff] }
  0x18   :  { %170 = vmatprep.subr.mxu0 %v3796_v45  ;;  %241 = vmatprep.subr.mxu1 %v3801_v46  ;;  %6495 = vst [vmem:[#allocation23_spill] sm:$0xff] %v3868_v57  ;;  %6496 = vst [vmem:[#allocation24_spill] sm:$0xff] %v3873_v58  ;;  %v3885_v60 = vld [vmem:[%s6157_s2 + $0x30] sm:$0xff]  ;;  %v3892_v61 = vld [vmem:[%s6157_s2 + $0x8] sm:$0xff] }
  0x19   :  { %171 = vmatpush1.msra.mxu0 %v3808_v47  ;;  %242 = vmatpush1.msra.mxu1 %v3813_v48  ;;  %6497 = vst [vmem:[#allocation25_spill] sm:$0xff] %v3880_v59  ;;  %6498 = vst [vmem:[#allocation26_spill] sm:$0xff] %v3885_v60  ;;  %v3897_v62 = vld [vmem:[%s6157_s2 + $0x18] sm:$0xff]  ;;  %v3904_v63 = vld [vmem:[%s6157_s2] sm:$0xff] }
  0x1a   :  { %172 = vmatprep.subr.mxu0 %v3820_v49  ;;  %243 = vmatprep.subr.mxu1 %v3825_v50  ;;  %6499 = vst [vmem:[#allocation27_spill] sm:$0xff] %v3892_v61  ;;  %6500 = vst [vmem:[#allocation28_spill] sm:$0xff] %v3897_v62  ;;  %v3909_v3 = vld [vmem:[%s6157_s2 + $0x10] sm:$0xff] }
  0x1b   :  { %173 = vmatpush1.msra.mxu0 %v3832_v51  ;;  %244 = vmatpush1.msra.mxu1 %v3837_v52  ;;  %6501 = vst [vmem:[#allocation29_spill] sm:$0xff] %v3904_v63  ;;  %6502 = vst [vmem:[#allocation30_spill] sm:$0xff] %v3909_v3 }
  0x1c   :  { %174 = vmatprep.subr.mxu0 %v3844_v53  ;;  %245 = vmatprep.subr.mxu1 %v3849_v54 }
  0x1d   :  { %175 = vmatpush1.msra.mxu0 %v3856_v55  ;;  %246 = vmatpush1.msra.mxu1 %v3861_v56  ;;  %v3959_v56 = vld [vmem:[%s6158_s3 + $0x1d0] sm:$0xff] }
  0x1e   :  { %176 = vmatprep.subr.mxu0 %v3868_v57  ;;  %247 = vmatprep.subr.mxu1 %v3873_v58  ;;  %v3918_v58 = vld [vmem:[%s6158_s3 + $0x1e8] sm:$0xff]  ;;  %v3923_v57 = vld [vmem:[%s6158_s3 + $0x1f8] sm:$0xff]  ;;  %6511 = vst [vmem:[#allocation38_spill] sm:$0xff] %v3959_v56 }
  0x1f   :  { %177 = vmatpush1.msra.mxu0 %v3880_v59  ;;  %248 = vmatpush1.msra.mxu1 %v3885_v60  ;;  %6503 = vst [vmem:[#allocation31_spill] sm:$0xff] %v3918_v58  ;;  %6504 = vst [vmem:[#allocation32_spill] sm:$0xff] %v3923_v57  ;;  %v6507_v60 = vmov 0.0   ;;  %v3954_v59 = vld [vmem:[%s6158_s3 + $0x1c0] sm:$0xff] }
  0x20   :  { %178 = vmatprep.subr.mxu0 %v3892_v61  ;;  %249 = vmatprep.subr.mxu1 %v3897_v62  ;;  %v3930_v61 = vld [vmem:[%s6158_s3 + $0x1e0] sm:$0xff]  ;;  %v3935_v62 = vld [vmem:[%s6158_s3 + $0x1f0] sm:$0xff]  ;;  %6510 = vst [vmem:[#allocation37_spill] sm:$0xff] %v3954_v59 }
  0x21   :  { %179 = vmatpush1.msra.mxu0 %v3904_v63  ;;  %250 = vmatpush1.msra.mxu1 %v3909_v3  ;;  %6505 = vst [vmem:[#allocation33_spill] sm:$0xff] %v3930_v61  ;;  %6506 = vst [vmem:[#allocation34_spill] sm:$0xff] %v3935_v62  ;;  %v3942_v63 = vld [vmem:[%s6158_s3 + $0x1c8] sm:$0xff]  ;;  %v3947_v3 = vld [vmem:[%s6158_s3 + $0x1d8] sm:$0xff] }
  0x22   :  { %213 = vmatmul.mubr.f32.vlgmr.msra.gmra.mxu0 %v6507_v60  ;;  %284 = vmatmul.mubr.f32.vlgmr.msra.gmra.mxu1 %v6507_v60  ;;  %6508 = vst [vmem:[#allocation35_spill] sm:$0xff] %v3942_v63  ;;  %6509 = vst [vmem:[#allocation36_spill] sm:$0xff] %v3947_v3 }
  0x23   :  { %314 = vmatprep.subr.mxu0 %v3918_v58  ;;  %385 = vmatprep.subr.mxu1 %v3923_v57  ;;  %v3966_v58 = vld [vmem:[%s6158_s3 + $0x1a8] sm:$0xff]  ;;  %v3971_v57 = vld [vmem:[%s6158_s3 + $0x1b8] sm:$0xff] }
  0x24   :  { %315 = vmatpush1.msra.mxu0 %v3930_v61  ;;  %386 = vmatpush1.msra.mxu1 %v3935_v62  ;;  %6512 = vst [vmem:[#allocation39_spill] sm:$0xff] %v3966_v58  ;;  %6513 = vst [vmem:[#allocation40_spill] sm:$0xff] %v3971_v57  ;;  %v3978_v61 = vld [vmem:[%s6158_s3 + $0x1a0] sm:$0xff]  ;;  %v3983_v62 = vld [vmem:[%s6158_s3 + $0x1b0] sm:$0xff] }
  0x25   :  { %316 = vmatprep.subr.mxu0 %v3942_v63  ;;  %387 = vmatprep.subr.mxu1 %v3947_v3  ;;  %6514 = vst [vmem:[#allocation41_spill] sm:$0xff] %v3978_v61  ;;  %6515 = vst [vmem:[#allocation42_spill] sm:$0xff] %v3983_v62  ;;  %v3990_v63 = vld [vmem:[%s6158_s3 + $0x188] sm:$0xff]  ;;  %v3995_v3 = vld [vmem:[%s6158_s3 + $0x198] sm:$0xff] }
  0x26   :  { %317 = vmatpush1.msra.mxu0 %v3954_v59  ;;  %388 = vmatpush1.msra.mxu1 %v3959_v56  ;;  %6516 = vst [vmem:[#allocation43_spill] sm:$0xff] %v3990_v63  ;;  %6517 = vst [vmem:[#allocation44_spill] sm:$0xff] %v3995_v3  ;;  %v4002_v59 = vld [vmem:[%s6158_s3 + $0x180] sm:$0xff]  ;;  %v4007_v56 = vld [vmem:[%s6158_s3 + $0x190] sm:$0xff] }
  0x27   :  { %318 = vmatprep.subr.mxu0 %v3966_v58  ;;  %389 = vmatprep.subr.mxu1 %v3971_v57  ;;  %6518 = vst [vmem:[#allocation45_spill] sm:$0xff] %v4002_v59  ;;  %6519 = vst [vmem:[#allocation46_spill] sm:$0xff] %v4007_v56  ;;  %v4014_v58 = vld [vmem:[%s6158_s3 + $0x168] sm:$0xff]  ;;  %v4019_v57 = vld [vmem:[%s6158_s3 + $0x178] sm:$0xff] }
  0x28   :  { %319 = vmatpush1.msra.mxu0 %v3978_v61  ;;  %390 = vmatpush1.msra.mxu1 %v3983_v62  ;;  %6520 = vst [vmem:[#allocation47_spill] sm:$0xff] %v4014_v58  ;;  %6521 = vst [vmem:[#allocation48_spill] sm:$0xff] %v4019_v57  ;;  %v4026_v61 = vld [vmem:[%s6158_s3 + $0x160] sm:$0xff]  ;;  %v4031_v62 = vld [vmem:[%s6158_s3 + $0x170] sm:$0xff] }
  0x29   :  { %320 = vmatprep.subr.mxu0 %v3990_v63  ;;  %391 = vmatprep.subr.mxu1 %v3995_v3  ;;  %6522 = vst [vmem:[#allocation49_spill] sm:$0xff] %v4026_v61  ;;  %6523 = vst [vmem:[#allocation50_spill] sm:$0xff] %v4031_v62  ;;  %v4038_v63 = vld [vmem:[%s6158_s3 + $0x148] sm:$0xff]  ;;  %v4043_v3 = vld [vmem:[%s6158_s3 + $0x158] sm:$0xff] }
  0x2a   :  { %321 = vmatpush1.msra.mxu0 %v4002_v59  ;;  %392 = vmatpush1.msra.mxu1 %v4007_v56  ;;  %6524 = vst [vmem:[#allocation51_spill] sm:$0xff] %v4038_v63  ;;  %6525 = vst [vmem:[#allocation52_spill] sm:$0xff] %v4043_v3  ;;  %v4050_v59 = vld [vmem:[%s6158_s3 + $0x140] sm:$0xff]  ;;  %v4055_v56 = vld [vmem:[%s6158_s3 + $0x150] sm:$0xff] }
  0x2b   :  { %322 = vmatprep.subr.mxu0 %v4014_v58  ;;  %393 = vmatprep.subr.mxu1 %v4019_v57  ;;  %6526 = vst [vmem:[#allocation53_spill] sm:$0xff] %v4050_v59  ;;  %6527 = vst [vmem:[#allocation54_spill] sm:$0xff] %v4055_v56  ;;  %v4062_v58 = vld [vmem:[%s6158_s3 + $0x128] sm:$0xff]  ;;  %v4067_v57 = vld [vmem:[%s6158_s3 + $0x138] sm:$0xff] }
  0x2c   :  { %323 = vmatpush1.msra.mxu0 %v4026_v61  ;;  %394 = vmatpush1.msra.mxu1 %v4031_v62  ;;  %6528 = vst [vmem:[#allocation55_spill] sm:$0xff] %v4062_v58  ;;  %6529 = vst [vmem:[#allocation56_spill] sm:$0xff] %v4067_v57  ;;  %v4074_v61 = vld [vmem:[%s6158_s3 + $0x120] sm:$0xff]  ;;  %v4079_v62 = vld [vmem:[%s6158_s3 + $0x130] sm:$0xff] }
  0x2d   :  { %324 = vmatprep.subr.mxu0 %v4038_v63  ;;  %395 = vmatprep.subr.mxu1 %v4043_v3  ;;  %6530 = vst [vmem:[#allocation57_spill] sm:$0xff] %v4074_v61  ;;  %6531 = vst [vmem:[#allocation58_spill] sm:$0xff] %v4079_v62  ;;  %v4086_v63 = vld [vmem:[%s6158_s3 + $0x108] sm:$0xff]  ;;  %v4091_v3 = vld [vmem:[%s6158_s3 + $0x118] sm:$0xff] }
  0x2e   :  { %325 = vmatpush1.msra.mxu0 %v4050_v59  ;;  %396 = vmatpush1.msra.mxu1 %v4055_v56  ;;  %6532 = vst [vmem:[#allocation59_spill] sm:$0xff] %v4086_v63  ;;  %6533 = vst [vmem:[#allocation60_spill] sm:$0xff] %v4091_v3  ;;  %v4098_v59 = vld [vmem:[%s6158_s3 + $0x100] sm:$0xff]  ;;  %v4103_v56 = vld [vmem:[%s6158_s3 + $0x110] sm:$0xff] }
  0x2f   :  { %326 = vmatprep.subr.mxu0 %v4062_v58  ;;  %397 = vmatprep.subr.mxu1 %v4067_v57  ;;  %6534 = vst [vmem:[#allocation61_spill] sm:$0xff] %v4098_v59  ;;  %6535 = vst [vmem:[#allocation62_spill] sm:$0xff] %v4103_v56  ;;  %v4110_v58 = vld [vmem:[%s6158_s3 + $0xe8] sm:$0xff]  ;;  %v4115_v57 = vld [vmem:[%s6158_s3 + $0xf8] sm:$0xff] }
  0x30   :  { %327 = vmatpush1.msra.mxu0 %v4074_v61  ;;  %398 = vmatpush1.msra.mxu1 %v4079_v62  ;;  %6536 = vst [vmem:[#allocation63_spill] sm:$0xff] %v4110_v58  ;;  %6537 = vst [vmem:[#allocation64_spill] sm:$0xff] %v4115_v57  ;;  %v4122_v61 = vld [vmem:[%s6158_s3 + $0xe0] sm:$0xff]  ;;  %v4127_v62 = vld [vmem:[%s6158_s3 + $0xf0] sm:$0xff] }
  0x31   :  { %328 = vmatprep.subr.mxu0 %v4086_v63  ;;  %399 = vmatprep.subr.mxu1 %v4091_v3  ;;  %6538 = vst [vmem:[#allocation65_spill] sm:$0xff] %v4122_v61  ;;  %6539 = vst [vmem:[#allocation66_spill] sm:$0xff] %v4127_v62  ;;  %v4134_v63 = vld [vmem:[%s6158_s3 + $0xc8] sm:$0xff]  ;;  %v4139_v3 = vld [vmem:[%s6158_s3 + $0xd8] sm:$0xff] }
  0x32   :  { %329 = vmatpush1.msra.mxu0 %v4098_v59  ;;  %400 = vmatpush1.msra.mxu1 %v4103_v56  ;;  %6540 = vst [vmem:[#allocation67_spill] sm:$0xff] %v4134_v63  ;;  %6541 = vst [vmem:[#allocation68_spill] sm:$0xff] %v4139_v3  ;;  %v4146_v59 = vld [vmem:[%s6158_s3 + $0xc0] sm:$0xff]  ;;  %v4151_v56 = vld [vmem:[%s6158_s3 + $0xd0] sm:$0xff] }
  0x33   :  { %330 = vmatprep.subr.mxu0 %v4110_v58  ;;  %401 = vmatprep.subr.mxu1 %v4115_v57  ;;  %6542 = vst [vmem:[#allocation69_spill] sm:$0xff] %v4146_v59  ;;  %6543 = vst [vmem:[#allocation70_spill] sm:$0xff] %v4151_v56  ;;  %v4158_v58 = vld [vmem:[%s6158_s3 + $0xa8] sm:$0xff]  ;;  %v4163_v57 = vld [vmem:[%s6158_s3 + $0xb8] sm:$0xff] }
  0x34   :  { %331 = vmatpush1.msra.mxu0 %v4122_v61  ;;  %402 = vmatpush1.msra.mxu1 %v4127_v62  ;;  %6544 = vst [vmem:[#allocation71_spill] sm:$0xff] %v4158_v58  ;;  %6545 = vst [vmem:[#allocation72_spill] sm:$0xff] %v4163_v57  ;;  %v4170_v61 = vld [vmem:[%s6158_s3 + $0xa0] sm:$0xff]  ;;  %v4175_v62 = vld [vmem:[%s6158_s3 + $0xb0] sm:$0xff] }
  0x35   :  { %332 = vmatprep.subr.mxu0 %v4134_v63  ;;  %403 = vmatprep.subr.mxu1 %v4139_v3  ;;  %6546 = vst [vmem:[#allocation73_spill] sm:$0xff] %v4170_v61  ;;  %6547 = vst [vmem:[#allocation74_spill] sm:$0xff] %v4175_v62  ;;  %v4182_v63 = vld [vmem:[%s6158_s3 + $0x88] sm:$0xff]  ;;  %v4187_v3 = vld [vmem:[%s6158_s3 + $0x98] sm:$0xff] }
  0x36   :  { %333 = vmatpush1.msra.mxu0 %v4146_v59  ;;  %404 = vmatpush1.msra.mxu1 %v4151_v56  ;;  %6548 = vst [vmem:[#allocation75_spill] sm:$0xff] %v4182_v63  ;;  %6549 = vst [vmem:[#allocation76_spill] sm:$0xff] %v4187_v3  ;;  %v4194_v59 = vld [vmem:[%s6158_s3 + $0x80] sm:$0xff]  ;;  %v4199_v56 = vld [vmem:[%s6158_s3 + $0x90] sm:$0xff] }
  0x37   :  { %334 = vmatprep.subr.mxu0 %v4158_v58  ;;  %405 = vmatprep.subr.mxu1 %v4163_v57  ;;  %6550 = vst [vmem:[#allocation77_spill] sm:$0xff] %v4194_v59  ;;  %6551 = vst [vmem:[#allocation78_spill] sm:$0xff] %v4199_v56  ;;  %v4206_v58 = vld [vmem:[%s6158_s3 + $0x68] sm:$0xff]  ;;  %v4211_v57 = vld [vmem:[%s6158_s3 + $0x78] sm:$0xff] }
  0x38   :  { %335 = vmatpush1.msra.mxu0 %v4170_v61  ;;  %406 = vmatpush1.msra.mxu1 %v4175_v62  ;;  %6552 = vst [vmem:[#allocation79_spill] sm:$0xff] %v4206_v58  ;;  %6553 = vst [vmem:[#allocation80_spill] sm:$0xff] %v4211_v57  ;;  %v4218_v61 = vld [vmem:[%s6158_s3 + $0x60] sm:$0xff]  ;;  %v4223_v62 = vld [vmem:[%s6158_s3 + $0x70] sm:$0xff] }
  0x39   :  { %336 = vmatprep.subr.mxu0 %v4182_v63  ;;  %407 = vmatprep.subr.mxu1 %v4187_v3  ;;  %6554 = vst [vmem:[#allocation81_spill] sm:$0xff] %v4218_v61  ;;  %6555 = vst [vmem:[#allocation82_spill] sm:$0xff] %v4223_v62  ;;  %v4230_v63 = vld [vmem:[%s6158_s3 + $0x48] sm:$0xff]  ;;  %v4235_v3 = vld [vmem:[%s6158_s3 + $0x58] sm:$0xff] }
  0x3a   :  { %337 = vmatpush1.msra.mxu0 %v4194_v59  ;;  %408 = vmatpush1.msra.mxu1 %v4199_v56  ;;  %6556 = vst [vmem:[#allocation83_spill] sm:$0xff] %v4230_v63  ;;  %6557 = vst [vmem:[#allocation84_spill] sm:$0xff] %v4235_v3  ;;  %v4242_v59 = vld [vmem:[%s6158_s3 + $0x40] sm:$0xff]  ;;  %v4247_v56 = vld [vmem:[%s6158_s3 + $0x50] sm:$0xff] }
  0x3b   :  { %338 = vmatprep.subr.mxu0 %v4206_v58  ;;  %409 = vmatprep.subr.mxu1 %v4211_v57  ;;  %6558 = vst [vmem:[#allocation85_spill] sm:$0xff] %v4242_v59  ;;  %6559 = vst [vmem:[#allocation86_spill] sm:$0xff] %v4247_v56  ;;  %v4254_v58 = vld [vmem:[%s6158_s3 + $0x28] sm:$0xff]  ;;  %v4259_v57 = vld [vmem:[%s6158_s3 + $0x38] sm:$0xff] }
  0x3c   :  { %339 = vmatpush1.msra.mxu0 %v4218_v61  ;;  %410 = vmatpush1.msra.mxu1 %v4223_v62  ;;  %v4266_v61 = vld [vmem:[%s6158_s3 + $0x20] sm:$0xff]  ;;  %v4271_v62 = vld [vmem:[%s6158_s3 + $0x30] sm:$0xff] }
  0x3d   :  { %340 = vmatprep.subr.mxu0 %v4230_v63  ;;  %411 = vmatprep.subr.mxu1 %v4235_v3  ;;  %v4278_v63 = vld [vmem:[%s6158_s3 + $0x8] sm:$0xff]  ;;  %v4283_v3 = vld [vmem:[%s6158_s3 + $0x18] sm:$0xff] }
  0x3e   :  { %341 = vmatpush1.msra.mxu0 %v4242_v59  ;;  %412 = vmatpush1.msra.mxu1 %v4247_v56  ;;  %v4290_v59 = vld [vmem:[%s6158_s3] sm:$0xff]  ;;  %v4297_v56 = vld [vmem:[%s6158_s3 + $0x10] sm:$0xff] }
  0x3f   :  { %342 = vmatprep.subr.mxu0 %v4254_v58  ;;  %413 = vmatprep.subr.mxu1 %v4259_v57 }
  0x40   :  { %343 = vmatpush1.msra.mxu0 %v4266_v61  ;;  %414 = vmatpush1.msra.mxu1 %v4271_v62 }
  0x41   :  { %344 = vmatprep.subr.mxu0 %v4278_v63  ;;  %415 = vmatprep.subr.mxu1 %v4283_v3 }
  0x42   :  { %345 = vmatpush1.msra.mxu0 %v4290_v59  ;;  %378 = vmatprep.mubr.f32.mxu0 %v6507_v60 }
  0x43   :  { %416 = vmatpush1.msra.mxu1 %v4297_v56  ;;  %449 = vmatprep.mubr.f32.mxu1 %v6507_v60 }
  0x44   :  { %379 = vmatmul.mubr.f32.vlgmr.msra.gmra.mxu0 %v6507_v60  ;;  %450 = vmatmul.mubr.f32.vlgmr.msra.gmra.mxu1 %v6507_v60 }
  0x45   :  { %545 = vmatprep.subr.mxu0 %v3534_v0  ;;  %616 = vmatprep.subr.mxu1 %v3539_v1 }
  0x46   :  { %546 = vmatpush1.msra.mxu0 %v3544_v2  ;;  %617 = vmatpush1.msra.mxu1 %v3553_v4 }
  0x47   :  { %547 = vmatprep.subr.mxu0 %v3558_v5  ;;  %618 = vmatprep.subr.mxu1 %v3563_v6 }
  0x48   :  { %548 = vmatpush1.msra.mxu0 %v3570_v7  ;;  %619 = vmatpush1.msra.mxu1 %v3575_v8 }
  0x49   :  { %549 = vmatprep.subr.mxu0 %v3580_v9  ;;  %620 = vmatprep.subr.mxu1 %v3587_v10 }
  0x4a   :  { %550 = vmatpush1.msra.mxu0 %v3592_v11  ;;  %621 = vmatpush1.msra.mxu1 %v3597_v12 }
  0x4b   :  { %551 = vmatprep.subr.mxu0 %v3604_v13  ;;  %622 = vmatprep.subr.mxu1 %v3609_v14 }
  0x4c   :  { %552 = vmatpush1.msra.mxu0 %v3616_v15  ;;  %623 = vmatpush1.msra.mxu1 %v3621_v16 }
  0x4d   :  { %553 = vmatprep.subr.mxu0 %v3628_v17  ;;  %624 = vmatprep.subr.mxu1 %v3633_v18 }
  0x4e   :  { %554 = vmatpush1.msra.mxu0 %v3640_v19  ;;  %625 = vmatpush1.msra.mxu1 %v3645_v20 }
  0x4f   :  { %555 = vmatprep.subr.mxu0 %v3652_v21  ;;  %626 = vmatprep.subr.mxu1 %v3657_v22 }
  0x50   :  { %556 = vmatpush1.msra.mxu0 %v3664_v23  ;;  %627 = vmatpush1.msra.mxu1 %v3669_v24 }
  0x51   :  { %557 = vmatprep.subr.mxu0 %v3676_v25  ;;  %628 = vmatprep.subr.mxu1 %v3681_v26 }
  0x52   :  { %558 = vmatpush1.msra.mxu0 %v3688_v27  ;;  %629 = vmatpush1.msra.mxu1 %v3693_v28 }
  0x53   :  { %559 = vmatprep.subr.mxu0 %v3700_v29  ;;  %630 = vmatprep.subr.mxu1 %v3705_v30 }
  0x54   :  { %560 = vmatpush1.msra.mxu0 %v3712_v31  ;;  %631 = vmatpush1.msra.mxu1 %v3717_v32 }
  0x55   :  { %561 = vmatprep.subr.mxu0 %v3724_v33  ;;  %632 = vmatprep.subr.mxu1 %v3729_v34 }
  0x56   :  { %562 = vmatpush1.msra.mxu0 %v3736_v35  ;;  %633 = vmatpush1.msra.mxu1 %v3741_v36 }
  0x57   :  { %563 = vmatprep.subr.mxu0 %v3748_v37  ;;  %634 = vmatprep.subr.mxu1 %v3753_v38 }
  0x58   :  { %564 = vmatpush1.msra.mxu0 %v3760_v39  ;;  %635 = vmatpush1.msra.mxu1 %v3765_v40 }
  0x59   :  { %565 = vmatprep.subr.mxu0 %v3772_v41  ;;  %636 = vmatprep.subr.mxu1 %v3777_v42 }
  0x5a   :  { %566 = vmatpush1.msra.mxu0 %v3784_v43  ;;  %637 = vmatpush1.msra.mxu1 %v3789_v44 }
  0x5b   :  { %567 = vmatprep.subr.mxu0 %v3796_v45  ;;  %638 = vmatprep.subr.mxu1 %v3801_v46  ;;  %v6560_v45 = vld [vmem:[#allocation22_spill] sm:$0xff]  ;;  %v6561_v46 = vld [vmem:[#allocation23_spill] sm:$0xff] }
  0x5c   :  { %568 = vmatpush1.msra.mxu0 %v3808_v47  ;;  %639 = vmatpush1.msra.mxu1 %v3813_v48  ;;  %v6562_v47 = vld [vmem:[#allocation24_spill] sm:$0xff]  ;;  %v6563_v48 = vld [vmem:[#allocation25_spill] sm:$0xff] }
  0x5d   :  { %569 = vmatprep.subr.mxu0 %v3820_v49  ;;  %640 = vmatprep.subr.mxu1 %v3825_v50  ;;  %v6564_v49 = vld [vmem:[#allocation26_spill] sm:$0xff]  ;;  %v6565_v50 = vld [vmem:[#allocation27_spill] sm:$0xff] }
  0x5e   :  { %570 = vmatpush1.msra.mxu0 %v3832_v51  ;;  %641 = vmatpush1.msra.mxu1 %v3837_v52  ;;  %v6566_v51 = vld [vmem:[#allocation28_spill] sm:$0xff]  ;;  %v6567_v52 = vld [vmem:[#allocation29_spill] sm:$0xff] }
  0x5f   :  { %571 = vmatprep.subr.mxu0 %v3844_v53  ;;  %642 = vmatprep.subr.mxu1 %v3849_v54  ;;  %v6568_v54 = vld [vmem:[#allocation30_spill] sm:$0xff] }
  0x60   :  { %572 = vmatpush1.msra.mxu0 %v3856_v55  ;;  %643 = vmatpush1.msra.mxu1 %v6560_v45  ;;  %v6569_v45 = vld [vmem:[#allocation31_spill] sm:$0xff]  ;;  %v299_v55 = vlaneseq }
  0x61   :  { %573 = vmatprep.subr.mxu0 %v6561_v46  ;;  %644 = vmatprep.subr.mxu1 %v6562_v47  ;;  %v6570_v46 = vld [vmem:[#allocation32_spill] sm:$0xff]  ;;  %v3500_v47 = vmov 1983009808  }
  0x62   :  { %574 = vmatpush1.msra.mxu0 %v6563_v48  ;;  %645 = vmatpush1.msra.mxu1 %v6564_v49  ;;  %v297_v48 = vunpack.c.l.s4 %v3500_v47  ;;  %v300_v53 = vshrl.u32 %v299_v55, 7 }
  0x63   :  { %575 = vmatprep.subr.mxu0 %v6565_v50  ;;  %646 = vmatprep.subr.mxu1 %v6566_v51 }
  0x64   :  { %576 = vmatpush1.msra.mxu0 %v6567_v52  ;;  %609 = vmatprep.mubr.f32.mxu0 %v6507_v60  ;;  %v298_v49 = vunpack.c.0.s8 %v297_v48 }
  0x65   :  { %647 = vmatpush1.msra.mxu1 %v6568_v54  ;;  %680 = vmatprep.mubr.f32.mxu1 %v6507_v60 }
  0x66   :  { %712 = vmatprep.subr.mxu0 %v6569_v45  ;;  %783 = vmatprep.subr.mxu1 %v6570_v46  ;;  %v4375_v51 = vsub.s32 %v298_v49, %v300_v53  ;;  %v147_v46 = vld [vmem:[%s6159_s0] sm:$0xff] }
  0x68   :  { %6571 = vst [vmem:[#allocation87_spill] sm:$0xff] %v4375_v51 }
  0xe2   :  { %v214_v50 = vpop.f32.mrf.mxu0  ;;  %v285_v44 = vpop.f32.mrf.mxu1 }
  0xe4   :  { %v216_v52 = vpop.f32.mrf.mxu0  ;;  %v287_v43 = vpop.f32.mrf.mxu1 }
  0xe5   :  { %v294_v42 = vcombine.low %v214_v50, %v216_v52  ;;  %v295_v41 = vcombine.low %v285_v44, %v287_v43 }
  0xe7   :  { %v302_v54 = vrot.slane %v294_v42, %v4375_v51  ;;  %v309_v40 = vrot.slane %v295_v41, %v4375_v51 }
  0xe9   :  { %v310_v47 = vcombine.low %v302_v54, %v309_v40 }
  0xeb   :  { %v312_v45 = vadd.f32 %v310_v47, %v147_v46 }
  0xed   :  { %v2951_v48 = vmul.f32 -1.442695, %v312_v45  ;;  %v486_v55 = vrot.slane %v312_v45, 2  ;;  %v497_v49 = vrot.slane %v312_v45, 6  ;;  %v494_v53 = vrot.slane %v312_v45, 4 }
  0xef   :  { %3019 = vpow2.f32 %v2951_v48  ;;  %v2952_v39 = vmul.f32 -1.442695, %v486_v55  ;;  %v2953_v50 = vmul.f32 -1.442695, %v497_v49 }
  0xf1   :  { %3021 = vpow2.f32 %v2952_v39 }
  0xf2   :  { %3023 = vtanh.f32 %v494_v53 }
  0xfc   :  { %v3020_v38 = vpop.eup %3019 }
  0xfd   :  { %v482_v43 = vadd.f32 1.0, %v3020_v38  ;;  %v313_v38 = vld [vmem:[%s6160_s1] sm:$0xff] }
  0xfe   :  { %v3022_v44 = vpop.eup %3021 }
  0xff   :  { %3025 = vrcp.f32 %v482_v43  ;;  %v491_v41 = vadd.f32 1.0, %v3022_v44  ;;  %v3024_v45 = vpop.eup %3023 }
 0x100   :  { %3027 = vpow2.f32 %v2953_v50 }
 0x101   :  { %3029 = vrcp.f32 %v491_v41 }
 0x104   :  { %v380_v42 = vpop.f32.mrf.mxu0  ;;  %v451_v52 = vpop.f32.mrf.mxu1 }
 0x106   :  { %v382_v40 = vpop.f32.mrf.mxu0  ;;  %v453_v46 = vpop.f32.mrf.mxu1 }
 0x107   :  { %v460_v54 = vcombine.low %v380_v42, %v382_v40  ;;  %v461_v47 = vcombine.low %v451_v52, %v453_v46 }
 0x109   :  { %v468_v48 = vrot.slane %v460_v54, %v4375_v51  ;;  %v475_v39 = vrot.slane %v461_v47, %v4375_v51 }
 0x10b   :  { %v476_v55 = vcombine.low %v468_v48, %v475_v39 }
 0x10c   :  { %v3026_v49 = vpop.eup %3025 }
 0x10d   :  { %v3028_v53 = vpop.eup %3027  ;;  %v478_v50 = vadd.f32 %v476_v55, %v313_v38  ;;  %v506_v36 = vmul.f32 %v3026_v49, %v3024_v45  ;;  %v6573_v49 = vld [vmem:[#allocation34_spill] sm:$0xff] }
 0x10e   :  { %v3030_v43 = vpop.eup %3029  ;;  %v502_v42 = vadd.f32 1.0, %v3028_v53  ;;  %v6574_v53 = vld [vmem:[#allocation35_spill] sm:$0xff] }
 0x10f   :  { %v505_v44 = vmul.f32 0.0, %v3030_v43  ;;  %v2954_v41 = vmul.f32 -1.442695, %v478_v50  ;;  %v517_v37 = vrot.slane %v478_v50, 2  ;;  %v528_v46 = vrot.slane %v478_v50, 6 }
 0x110   :  { %v525_v48 = vrot.slane %v478_v50, 4  ;;  %v6575_v50 = vld [vmem:[#allocation36_spill] sm:$0xff] }
 0x111   :  { %3031 = vpow2.f32 %v2954_v41  ;;  %v2955_v52 = vmul.f32 -1.442695, %v517_v37  ;;  %v4387_v40 = vadd.f32 %v506_v36, %v505_v44  ;;  %v2956_v54 = vmul.f32 -1.442695, %v528_v46  ;;  %v6572_v36 = vld [vmem:[#allocation33_spill] sm:$0xff]  ;;  %v6577_v41 = vld [vmem:[#allocation38_spill] sm:$0xff] }
 0x112   :  { %v6576_v44 = vld [vmem:[#allocation37_spill] sm:$0xff] }
 0x113   :  { %3033 = vpow2.f32 %v2955_v52  ;;  %v6579_v52 = vld [vmem:[#allocation40_spill] sm:$0xff]  ;;  %v6580_v46 = vld [vmem:[#allocation41_spill] sm:$0xff] }
 0x114   :  { %3035 = vrcp.f32 %v502_v42  ;;  %v6578_v42 = vld [vmem:[#allocation39_spill] sm:$0xff] }
 0x115   :  { %3037 = vtanh.f32 %v4387_v40 }
 0x116   :  { %3039 = vpow2.f32 %v2956_v54  ;;  %v6581_v54 = vld [vmem:[#allocation42_spill] sm:$0xff] }
 0x11e   :  { %v3032_v47 = vpop.eup %3031 }
 0x11f   :  { %v513_v39 = vadd.f32 1.0, %v3032_v47  ;;  %v6582_v47 = vld [vmem:[#allocation43_spill] sm:$0xff] }
 0x120   :  { %v3034_v38 = vpop.eup %3033 }
 0x121   :  { %v3036_v55 = vpop.eup %3035  ;;  %3041 = vrcp.f32 %v513_v39  ;;  %v522_v43 = vadd.f32 1.0, %v3034_v38  ;;  %v6584_v39 = vld [vmem:[#allocation45_spill] sm:$0xff]  ;;  %v6585_v38 = vld [vmem:[#allocation46_spill] sm:$0xff] }
 0x122   :  { %v3038_v45 = vpop.eup %3037  ;;  %3043 = vtanh.f32 %v525_v48  ;;  %v6583_v48 = vld [vmem:[#allocation44_spill] sm:$0xff] }
 0x123   :  { %3045 = vrcp.f32 %v522_v43  ;;  %v509_v37 = vmul.f32 %v3038_v45, %v3036_v55  ;;  %v3040_v55 = vpop.eup %3039  ;;  %v6586_v43 = vld [vmem:[#allocation47_spill] sm:$0xff]  ;;  %v6587_v45 = vld [vmem:[#allocation48_spill] sm:$0xff] }
 0x125   :  { %541 = vst [vmem:[%s6161_s4] sm:$0x3] %v509_v37  ;;  %610 = vmatmul.mubr.f32.vlgmr.msra.gmra.mxu0 %v509_v37  ;;  %681 = vmatmul.mubr.f32.vlgmr.msra.gmra.mxu1 %v509_v37 }
 0x126   :  { %713 = vmatpush1.msra.mxu0 %v6572_v36  ;;  %784 = vmatpush1.msra.mxu1 %v6573_v49 }
 0x127   :  { %714 = vmatprep.subr.mxu0 %v6574_v53  ;;  %785 = vmatprep.subr.mxu1 %v6575_v50  ;;  %v6598_v53 = vld [vmem:[#allocation59_spill] sm:$0xff] }
 0x128   :  { %715 = vmatpush1.msra.mxu0 %v6576_v44  ;;  %786 = vmatpush1.msra.mxu1 %v6577_v41  ;;  %v533_v41 = vadd.f32 1.0, %v3040_v55  ;;  %v6600_v55 = vld [vmem:[#allocation61_spill] sm:$0xff] }
 0x129   :  { %716 = vmatprep.subr.mxu0 %v6578_v42  ;;  %787 = vmatprep.subr.mxu1 %v6579_v52  ;;  %v6588_v42 = vld [vmem:[#allocation49_spill] sm:$0xff]  ;;  %v6589_v52 = vld [vmem:[#allocation50_spill] sm:$0xff] }
 0x12a   :  { %717 = vmatpush1.msra.mxu0 %v6580_v46  ;;  %788 = vmatpush1.msra.mxu1 %v6581_v54  ;;  %v6590_v54 = vld [vmem:[#allocation51_spill] sm:$0xff]  ;;  %3047 = vrcp.f32 %v533_v41 }
 0x12b   :  { %718 = vmatprep.subr.mxu0 %v6582_v47  ;;  %789 = vmatprep.subr.mxu1 %v6583_v48  ;;  %v6591_v47 = vld [vmem:[#allocation52_spill] sm:$0xff]  ;;  %v6610_v41 = vld [vmem:[#allocation71_spill] sm:$0xff] }
 0x12c   :  { %719 = vmatpush1.msra.mxu0 %v6584_v39  ;;  %790 = vmatpush1.msra.mxu1 %v6585_v38  ;;  %v6592_v39 = vld [vmem:[#allocation53_spill] sm:$0xff]  ;;  %v6593_v38 = vld [vmem:[#allocation54_spill] sm:$0xff] }
 0x12d   :  { %720 = vmatprep.subr.mxu0 %v6586_v43  ;;  %791 = vmatprep.subr.mxu1 %v6587_v45  ;;  %v6594_v43 = vld [vmem:[#allocation55_spill] sm:$0xff]  ;;  %v6595_v45 = vld [vmem:[#allocation56_spill] sm:$0xff] }
 0x12e   :  { %v3042_v37 = vpop.eup %3041  ;;  %721 = vmatpush1.msra.mxu0 %v6588_v42  ;;  %792 = vmatpush1.msra.mxu1 %v6589_v52  ;;  %v6596_v42 = vld [vmem:[#allocation57_spill] sm:$0xff]  ;;  %v6597_v52 = vld [vmem:[#allocation58_spill] sm:$0xff] }
 0x12f   :  { %v3044_v46 = vpop.eup %3043  ;;  %722 = vmatprep.subr.mxu0 %v6590_v54  ;;  %793 = vmatprep.subr.mxu1 %v6591_v47  ;;  %v6599_v54 = vld [vmem:[#allocation60_spill] sm:$0xff] }
 0x130   :  { %v3046_v48 = vpop.eup %3045  ;;  %723 = vmatpush1.msra.mxu0 %v6592_v39  ;;  %794 = vmatpush1.msra.mxu1 %v6593_v38  ;;  %v537_v50 = vmul.f32 %v3044_v46, %v3042_v37  ;;  %v6601_v38 = vld [vmem:[#allocation62_spill] sm:$0xff]  ;;  %v6604_v46 = vld [vmem:[#allocation65_spill] sm:$0xff] }
 0x131   :  { %v536_v44 = vmul.f32 0.0, %v3046_v48  ;;  %724 = vmatprep.subr.mxu0 %v6594_v43  ;;  %795 = vmatprep.subr.mxu1 %v6595_v45  ;;  %v6602_v48 = vld [vmem:[#allocation63_spill] sm:$0xff]  ;;  %v6603_v43 = vld [vmem:[#allocation64_spill] sm:$0xff]  ;;  %v6605_v37 = vld [vmem:[#allocation66_spill] sm:$0xff] }
 0x132   :  { %725 = vmatpush1.msra.mxu0 %v6596_v42  ;;  %796 = vmatpush1.msra.mxu1 %v6597_v52 }
 0x133   :  { %726 = vmatprep.subr.mxu0 %v6598_v53  ;;  %797 = vmatprep.subr.mxu1 %v6599_v54  ;;  %v4421_v47 = vadd.f32 %v537_v50, %v536_v44  ;;  %v6606_v53 = vld [vmem:[#allocation67_spill] sm:$0xff]  ;;  %v6607_v54 = vld [vmem:[#allocation68_spill] sm:$0xff]  ;;  %v6608_v50 = vld [vmem:[#allocation69_spill] sm:$0xff] }
 0x134   :  { %727 = vmatpush1.msra.mxu0 %v6600_v55  ;;  %798 = vmatpush1.msra.mxu1 %v6601_v38  ;;  %v6609_v44 = vld [vmem:[#allocation70_spill] sm:$0xff]  ;;  %v6611_v38 = vld [vmem:[#allocation72_spill] sm:$0xff]  ;;  %v6614_v55 = vld [vmem:[#allocation75_spill] sm:$0xff] }
 0x135   :  { %728 = vmatprep.subr.mxu0 %v6602_v48  ;;  %799 = vmatprep.subr.mxu1 %v6603_v43  ;;  %3049 = vtanh.f32 %v4421_v47  ;;  %v6612_v48 = vld [vmem:[#allocation73_spill] sm:$0xff]  ;;  %v6613_v43 = vld [vmem:[#allocation74_spill] sm:$0xff] }
 0x136   :  { %729 = vmatpush1.msra.mxu0 %v6604_v46  ;;  %800 = vmatpush1.msra.mxu1 %v6605_v37  ;;  %v6615_v46 = vld [vmem:[#allocation76_spill] sm:$0xff]  ;;  %v6616_v37 = vld [vmem:[#allocation77_spill] sm:$0xff] }
 0x137   :  { %730 = vmatprep.subr.mxu0 %v6606_v53  ;;  %801 = vmatprep.subr.mxu1 %v6607_v54  ;;  %v6617_v53 = vld [vmem:[#allocation78_spill] sm:$0xff]  ;;  %v6618_v54 = vld [vmem:[#allocation79_spill] sm:$0xff] }
 0x138   :  { %731 = vmatpush1.msra.mxu0 %v6608_v50  ;;  %802 = vmatpush1.msra.mxu1 %v6609_v44  ;;  %v6619_v50 = vld [vmem:[#allocation80_spill] sm:$0xff]  ;;  %v6620_v44 = vld [vmem:[#allocation81_spill] sm:$0xff] }
 0x139   :  { %732 = vmatprep.subr.mxu0 %v6610_v41  ;;  %803 = vmatprep.subr.mxu1 %v6611_v38  ;;  %v6621_v41 = vld [vmem:[#allocation82_spill] sm:$0xff]  ;;  %v6622_v38 = vld [vmem:[#allocation83_spill] sm:$0xff] }
 0x13a   :  { %733 = vmatpush1.msra.mxu0 %v6612_v48  ;;  %804 = vmatpush1.msra.mxu1 %v6613_v43  ;;  %v6623_v48 = vld [vmem:[#allocation84_spill] sm:$0xff]  ;;  %v6624_v43 = vld [vmem:[#allocation85_spill] sm:$0xff] }
 0x13b   :  { %734 = vmatprep.subr.mxu0 %v6614_v55  ;;  %805 = vmatprep.subr.mxu1 %v6615_v46  ;;  %v6625_v55 = vld [vmem:[#allocation86_spill] sm:$0xff]  ;;  %v3048_v46 = vpop.eup %3047 }
 0x13c   :  { %735 = vmatpush1.msra.mxu0 %v6616_v37  ;;  %806 = vmatpush1.msra.mxu1 %v6617_v53 }
 0x13d   :  { %736 = vmatprep.subr.mxu0 %v6618_v54  ;;  %807 = vmatprep.subr.mxu1 %v6619_v50 }
 0x13e   :  { %737 = vmatpush1.msra.mxu0 %v6620_v44  ;;  %808 = vmatpush1.msra.mxu1 %v6621_v41 }
 0x13f   :  { %738 = vmatprep.subr.mxu0 %v6622_v38  ;;  %809 = vmatprep.subr.mxu1 %v6623_v48 }
 0x140   :  { %739 = vmatpush1.msra.mxu0 %v6624_v43  ;;  %810 = vmatpush1.msra.mxu1 %v6625_v55 }
 0x141   :  { %740 = vmatprep.subr.mxu0 %v4254_v58  ;;  %811 = vmatprep.subr.mxu1 %v4259_v57 }
 0x142   :  { %v3050_v54 = vpop.eup %3049  ;;  %741 = vmatpush1.msra.mxu0 %v4266_v61  ;;  %812 = vmatpush1.msra.mxu1 %v4271_v62 }
 0x143   :  { %742 = vmatprep.subr.mxu0 %v4278_v63  ;;  %813 = vmatprep.subr.mxu1 %v4283_v3  ;;  %v540_v38 = vmul.f32 %v3050_v54, %v3048_v46 }
 0x144   :  { %743 = vmatpush1.msra.mxu0 %v4290_v59  ;;  %776 = vmatprep.mubr.f32.mxu0 %v6507_v60 }
 0x145   :  { %814 = vmatpush1.msra.mxu1 %v4297_v56  ;;  %847 = vmatprep.mubr.f32.mxu1 %v6507_v60  ;;  %542 = vst [vmem:[%s6162_s5] sm:$0x3] %v540_v38 }
 0x146   :  { %777 = vmatmul.mubr.f32.vlgmr.msra.gmra.mxu0 %v540_v38  ;;  %848 = vmatmul.mubr.f32.vlgmr.msra.gmra.mxu1 %v540_v38 }
 0x147   :  { %945 = vmatprep.subr.mxu0 %v3534_v0  ;;  %1016 = vmatprep.subr.mxu1 %v3539_v1  ;;  %v6626_v0 = vld [vmem:[#allocation2_spill] sm:$0xff]  ;;  %v6627_v1 = vld [vmem:[#allocation3_spill] sm:$0xff] }
 0x148   :  { %946 = vmatpush1.msra.mxu0 %v3544_v2  ;;  %1017 = vmatpush1.msra.mxu1 %v3553_v4  ;;  %v6628_v2 = vld [vmem:[#allocation4_spill] sm:$0xff]  ;;  %v6629_v4 = vld [vmem:[#allocation5_spill] sm:$0xff] }
 0x149   :  { %947 = vmatprep.subr.mxu0 %v3558_v5  ;;  %1018 = vmatprep.subr.mxu1 %v3563_v6  ;;  %v6630_v5 = vld [vmem:[#allocation6_spill] sm:$0xff]  ;;  %v6631_v6 = vld [vmem:[#allocation7_spill] sm:$0xff] }
 0x14a   :  { %948 = vmatpush1.msra.mxu0 %v3570_v7  ;;  %1019 = vmatpush1.msra.mxu1 %v3575_v8  ;;  %v6632_v7 = vld [vmem:[#allocation8_spill] sm:$0xff]  ;;  %v6633_v8 = vld [vmem:[#allocation9_spill] sm:$0xff] }
 0x14b   :  { %949 = vmatprep.subr.mxu0 %v3580_v9  ;;  %1020 = vmatprep.subr.mxu1 %v3587_v10  ;;  %v6634_v9 = vld [vmem:[#allocation10_spill] sm:$0xff]  ;;  %v6635_v10 = vld [vmem:[#allocation11_spill] sm:$0xff] }
 0x14c   :  { %950 = vmatpush1.msra.mxu0 %v3592_v11  ;;  %1021 = vmatpush1.msra.mxu1 %v3597_v12  ;;  %v6636_v11 = vld [vmem:[#allocation12_spill] sm:$0xff]  ;;  %v6637_v12 = vld [vmem:[#allocation13_spill] sm:$0xff] }
 0x14d   :  { %951 = vmatprep.subr.mxu0 %v3604_v13  ;;  %1022 = vmatprep.subr.mxu1 %v3609_v14  ;;  %v6638_v13 = vld [vmem:[#allocation14_spill] sm:$0xff]  ;;  %v6639_v14 = vld [vmem:[#allocation15_spill] sm:$0xff] }
 0x14e   :  { %952 = vmatpush1.msra.mxu0 %v3616_v15  ;;  %1023 = vmatpush1.msra.mxu1 %v3621_v16  ;;  %v6640_v15 = vld [vmem:[#allocation16_spill] sm:$0xff]  ;;  %v6641_v16 = vld [vmem:[#allocation17_spill] sm:$0xff] }
 0x14f   :  { %953 = vmatprep.subr.mxu0 %v3628_v17  ;;  %1024 = vmatprep.subr.mxu1 %v3633_v18  ;;  %v6642_v17 = vld [vmem:[#allocation18_spill] sm:$0xff]  ;;  %v6643_v18 = vld [vmem:[#allocation19_spill] sm:$0xff] }
 0x150   :  { %954 = vmatpush1.msra.mxu0 %v3640_v19  ;;  %1025 = vmatpush1.msra.mxu1 %v3645_v20  ;;  %v6644_v19 = vld [vmem:[#allocation20_spill] sm:$0xff]  ;;  %v6645_v20 = vld [vmem:[#allocation21_spill] sm:$0xff] }
 0x151   :  { %955 = vmatprep.subr.mxu0 %v3652_v21  ;;  %1026 = vmatprep.subr.mxu1 %v3657_v22  ;;  %v6646_v21 = vld [vmem:[#allocation22_spill] sm:$0xff]  ;;  %v6647_v22 = vld [vmem:[#allocation23_spill] sm:$0xff] }
 0x152   :  { %956 = vmatpush1.msra.mxu0 %v3664_v23  ;;  %1027 = vmatpush1.msra.mxu1 %v3669_v24  ;;  %v6648_v23 = vld [vmem:[#allocation24_spill] sm:$0xff]  ;;  %v6649_v24 = vld [vmem:[#allocation25_spill] sm:$0xff] }
 0x153   :  { %957 = vmatprep.subr.mxu0 %v3676_v25  ;;  %1028 = vmatprep.subr.mxu1 %v3681_v26  ;;  %v6650_v25 = vld [vmem:[#allocation26_spill] sm:$0xff]  ;;  %v6651_v26 = vld [vmem:[#allocation27_spill] sm:$0xff] }
 0x154   :  { %958 = vmatpush1.msra.mxu0 %v3688_v27  ;;  %1029 = vmatpush1.msra.mxu1 %v3693_v28  ;;  %v6652_v27 = vld [vmem:[#allocation28_spill] sm:$0xff]  ;;  %v6653_v28 = vld [vmem:[#allocation29_spill] sm:$0xff] }
 0x155   :  { %959 = vmatprep.subr.mxu0 %v3700_v29  ;;  %1030 = vmatprep.subr.mxu1 %v3705_v30  ;;  %v6654_v29 = vld [vmem:[#allocation30_spill] sm:$0xff]  ;;  %v6655_v30 = vld [vmem:[#allocation31_spill] sm:$0xff] }
 0x156   :  { %960 = vmatpush1.msra.mxu0 %v3712_v31  ;;  %1031 = vmatpush1.msra.mxu1 %v3717_v32  ;;  %v6656_v31 = vld [vmem:[#allocation32_spill] sm:$0xff] }
 0x157   :  { %961 = vmatprep.subr.mxu0 %v3724_v33  ;;  %1032 = vmatprep.subr.mxu1 %v3729_v34 }
 0x158   :  { %962 = vmatpush1.msra.mxu0 %v3736_v35  ;;  %1033 = vmatpush1.msra.mxu1 %v6626_v0 }
 0x159   :  { %963 = vmatprep.subr.mxu0 %v6627_v1  ;;  %1034 = vmatprep.subr.mxu1 %v6628_v2  ;;  %v2957_v1 = vld [vmem:[%s6159_s0 + $0x8] sm:$0xff] }
 0x15a   :  { %964 = vmatpush1.msra.mxu0 %v6629_v4  ;;  %1035 = vmatpush1.msra.mxu1 %v6630_v5 }
 0x15b   :  { %965 = vmatprep.subr.mxu0 %v6631_v6  ;;  %1036 = vmatprep.subr.mxu1 %v6632_v7 }
 0x15c   :  { %966 = vmatpush1.msra.mxu0 %v6633_v8  ;;  %1037 = vmatpush1.msra.mxu1 %v6634_v9 }
 0x15d   :  { %967 = vmatprep.subr.mxu0 %v6635_v10  ;;  %1038 = vmatprep.subr.mxu1 %v6636_v11 }
 0x15e   :  { %968 = vmatpush1.msra.mxu0 %v6637_v12  ;;  %1039 = vmatpush1.msra.mxu1 %v6638_v13 }
 0x15f   :  { %969 = vmatprep.subr.mxu0 %v6639_v14  ;;  %1040 = vmatprep.subr.mxu1 %v6640_v15 }
 0x160   :  { %970 = vmatpush1.msra.mxu0 %v6641_v16  ;;  %1041 = vmatpush1.msra.mxu1 %v6642_v17 }
 0x161   :  { %971 = vmatprep.subr.mxu0 %v6643_v18  ;;  %1042 = vmatprep.subr.mxu1 %v6644_v19 }
 0x162   :  { %972 = vmatpush1.msra.mxu0 %v6645_v20  ;;  %1043 = vmatpush1.msra.mxu1 %v6646_v21 }
 0x163   :  { %973 = vmatprep.subr.mxu0 %v6647_v22  ;;  %1044 = vmatprep.subr.mxu1 %v6648_v23  ;;  %v2958_v23 = vld [vmem:[%s6160_s1 + $0x8] sm:$0xff] }
 0x164   :  { %974 = vmatpush1.msra.mxu0 %v6649_v24  ;;  %1045 = vmatpush1.msra.mxu1 %v6650_v25 }
 0x165   :  { %975 = vmatprep.subr.mxu0 %v6651_v26  ;;  %1046 = vmatprep.subr.mxu1 %v6652_v27 }
 0x166   :  { %976 = vmatpush1.msra.mxu0 %v6653_v28  ;;  %1009 = vmatprep.mubr.f32.mxu0 %v6507_v60 }
 0x167   :  { %1047 = vmatpush1.msra.mxu1 %v6654_v29  ;;  %1080 = vmatprep.mubr.f32.mxu1 %v6507_v60 }
 0x168   :  { %1112 = vmatprep.subr.mxu0 %v6655_v30  ;;  %1183 = vmatprep.subr.mxu1 %v6656_v31 }
 0x1e5   :  { %v611_v32 = vpop.f32.mrf.mxu0  ;;  %v682_v33 = vpop.f32.mrf.mxu1 }
 0x1e7   :  { %v613_v34 = vpop.f32.mrf.mxu0  ;;  %v684_v35 = vpop.f32.mrf.mxu1 }
 0x1e8   :  { %v691_v54 = vcombine.low %v611_v32, %v613_v34  ;;  %v692_v38 = vcombine.low %v682_v33, %v684_v35 }
 0x1ea   :  { %v699_v46 = vrot.slane %v691_v54, %v4375_v51  ;;  %v706_v0 = vrot.slane %v692_v38, %v4375_v51 }
 0x1ec   :  { %v707_v2 = vcombine.low %v699_v46, %v706_v0 }
 0x1ee   :  { %v709_v4 = vadd.f32 %v2957_v1, %v707_v2 }
 0x1f0   :  { %v2959_v5 = vmul.f32 -1.442695, %v709_v4  ;;  %v884_v6 = vrot.slane %v709_v4, 2  ;;  %v895_v8 = vrot.slane %v709_v4, 6  ;;  %v892_v11 = vrot.slane %v709_v4, 4 }
 0x1f2   :  { %3051 = vpow2.f32 %v2959_v5  ;;  %v2960_v7 = vmul.f32 -1.442695, %v884_v6  ;;  %v2961_v9 = vmul.f32 -1.442695, %v895_v8  ;;  %v6657_v8 = vld [vmem:[#allocation35_spill] sm:$0xff] }
 0x1f4   :  { %3053 = vpow2.f32 %v2960_v7 }
 0x1f5   :  { %3055 = vpow2.f32 %v2961_v9  ;;  %v6658_v9 = vld [vmem:[#allocation36_spill] sm:$0xff] }
 0x1ff   :  { %v3052_v10 = vpop.eup %3051 }
 0x200   :  { %v880_v12 = vadd.f32 1.0, %v3052_v10  ;;  %v6659_v10 = vld [vmem:[#allocation37_spill] sm:$0xff] }
 0x201   :  { %v3054_v13 = vpop.eup %3053 }
 0x202   :  { %3057 = vrcp.f32 %v880_v12  ;;  %v889_v14 = vadd.f32 1.0, %v3054_v13  ;;  %v3056_v25 = vpop.eup %3055  ;;  %v6661_v12 = vld [vmem:[#allocation39_spill] sm:$0xff]  ;;  %v6662_v13 = vld [vmem:[#allocation40_spill] sm:$0xff] }
 0x203   :  { %3059 = vtanh.f32 %v892_v11  ;;  %v900_v32 = vadd.f32 1.0, %v3056_v25  ;;  %v6660_v11 = vld [vmem:[#allocation38_spill] sm:$0xff]  ;;  %v6673_v25 = vld [vmem:[#allocation51_spill] sm:$0xff] }
 0x204   :  { %3061 = vrcp.f32 %v889_v14  ;;  %v6663_v14 = vld [vmem:[#allocation41_spill] sm:$0xff] }
 0x206   :  { %v778_v15 = vpop.f32.mrf.mxu0  ;;  %v849_v16 = vpop.f32.mrf.mxu1 }
 0x208   :  { %v780_v17 = vpop.f32.mrf.mxu0  ;;  %v851_v18 = vpop.f32.mrf.mxu1 }
 0x209   :  { %v858_v19 = vcombine.low %v778_v15, %v780_v17  ;;  %v859_v20 = vcombine.low %v849_v16, %v851_v18  ;;  %v6664_v15 = vld [vmem:[#allocation42_spill] sm:$0xff]  ;;  %v6665_v16 = vld [vmem:[#allocation43_spill] sm:$0xff] }
 0x20a   :  { %v6668_v17 = vld [vmem:[#allocation46_spill] sm:$0xff] }
 0x20b   :  { %v866_v21 = vrot.slane %v858_v19, %v4375_v51  ;;  %v873_v22 = vrot.slane %v859_v20, %v4375_v51  ;;  %v6669_v19 = vld [vmem:[#allocation47_spill] sm:$0xff]  ;;  %v6670_v20 = vld [vmem:[#allocation48_spill] sm:$0xff] }
 0x20d   :  { %v874_v24 = vcombine.low %v866_v21, %v873_v22  ;;  %v6671_v22 = vld [vmem:[#allocation49_spill] sm:$0xff] }
 0x20f   :  { %v3058_v26 = vpop.eup %3057  ;;  %v876_v27 = vadd.f32 %v2958_v23, %v874_v24  ;;  %v6672_v23 = vld [vmem:[#allocation50_spill] sm:$0xff] }
 0x210   :  { %v3060_v28 = vpop.eup %3059 }
 0x211   :  { %v3062_v29 = vpop.eup %3061  ;;  %v2962_v30 = vmul.f32 -1.442695, %v876_v27  ;;  %v915_v31 = vrot.slane %v876_v27, 2  ;;  %v904_v34 = vmul.f32 %v3060_v28, %v3058_v26  ;;  %v926_v38 = vrot.slane %v876_v27, 6  ;;  %v6674_v26 = vld [vmem:[#allocation52_spill] sm:$0xff] }
 0x212   :  { %v903_v33 = vmul.f32 %v3062_v29, %v4387_v40  ;;  %v923_v1 = vrot.slane %v876_v27, 4  ;;  %v6675_v29 = vld [vmem:[#allocation54_spill] sm:$0xff] }
 0x213   :  { %3063 = vpow2.f32 %v2962_v30  ;;  %v2963_v35 = vmul.f32 -1.442695, %v915_v31  ;;  %v2964_v46 = vmul.f32 -1.442695, %v926_v38  ;;  %v6676_v30 = vld [vmem:[#allocation55_spill] sm:$0xff]  ;;  %v6680_v38 = vld [vmem:[#allocation62_spill] sm:$0xff] }
 0x214   :  { %v4542_v54 = vadd.f32 %v904_v34, %v903_v33  ;;  %v6677_v33 = vld [vmem:[#allocation59_spill] sm:$0xff]  ;;  %v6678_v34 = vld [vmem:[#allocation60_spill] sm:$0xff] }
 0x215   :  { %3065 = vpow2.f32 %v2963_v35 }
 0x216   :  { %3067 = vrcp.f32 %v900_v32 }
 0x217   :  { %3069 = vtanh.f32 %v4542_v54 }
 0x218   :  { %3071 = vpow2.f32 %v2964_v46  ;;  %v6681_v46 = vld [vmem:[#allocation63_spill] sm:$0xff] }
 0x220   :  { %v3064_v0 = vpop.eup %3063 }
 0x221   :  { %v911_v2 = vadd.f32 1.0, %v3064_v0  ;;  %v6686_v0 = vld [vmem:[#allocation68_spill] sm:$0xff] }
 0x222   :  { %v3066_v4 = vpop.eup %3065 }
 0x223   :  { %v3068_v5 = vpop.eup %3067  ;;  %3073 = vrcp.f32 %v911_v2  ;;  %v920_v6 = vadd.f32 1.0, %v3066_v4  ;;  %v6688_v2 = vld [vmem:[#allocation70_spill] sm:$0xff]  ;;  %v6689_v4 = vld [vmem:[#allocation71_spill] sm:$0xff] }
 0x224   :  { %v3070_v40 = vpop.eup %3069  ;;  %3075 = vtanh.f32 %v923_v1  ;;  %v6687_v1 = vld [vmem:[#allocation69_spill] sm:$0xff] }
 0x225   :  { %3077 = vrcp.f32 %v920_v6  ;;  %v907_v7 = vmul.f32 %v3070_v40, %v3068_v5  ;;  %v3072_v18 = vpop.eup %3071  ;;  %v6690_v5 = vld [vmem:[#allocation72_spill] sm:$0xff]  ;;  %v6691_v6 = vld [vmem:[#allocation73_spill] sm:$0xff]  ;;  %v6692_v40 = vld [vmem:[#allocation74_spill] sm:$0xff] }
 0x226   :  { %v931_v28 = vadd.f32 1.0, %v3072_v18  ;;  %v4754_v18 = vld [vmem:[%s6157_s2 + $0x140] sm:$0xff] }
 0x227   :  { %2965 = vst [vmem:[%s6161_s4 + $0x2] sm:$0x3] %v907_v7  ;;  %1010 = vmatmul.mubr.f32.vlgmr.msra.gmra.mxu0 %v907_v7  ;;  %1081 = vmatmul.mubr.f32.vlgmr.msra.gmra.mxu1 %v907_v7  ;;  %v6693_v7 = vld [vmem:[#allocation75_spill] sm:$0xff] }
 0x228   :  { %1113 = vmatpush1.msra.mxu0 %v6572_v36  ;;  %1184 = vmatpush1.msra.mxu1 %v6573_v49  ;;  %v6666_v36 = vld [vmem:[#allocation44_spill] sm:$0xff]  ;;  %v6667_v49 = vld [vmem:[#allocation45_spill] sm:$0xff]  ;;  %3079 = vrcp.f32 %v931_v28  ;;  %v4814_v28 = vld [vmem:[%s6157_s2 + $0xe8] sm:$0xff] }
 0x229   :  { %1114 = vmatprep.subr.mxu0 %v6657_v8  ;;  %1185 = vmatprep.subr.mxu1 %v6658_v9  ;;  %v6694_v8 = vld [vmem:[#allocation76_spill] sm:$0xff]  ;;  %v6695_v9 = vld [vmem:[#allocation79_spill] sm:$0xff]  ;;  %6703 = vst [vmem:[#allocation77_spill] sm:$0xff] %v4814_v28 }
 0x22a   :  { %1115 = vmatpush1.msra.mxu0 %v6659_v10  ;;  %1186 = vmatpush1.msra.mxu1 %v6660_v11  ;;  %v6696_v10 = vld [vmem:[#allocation83_spill] sm:$0xff] }
 0x22b   :  { %1116 = vmatprep.subr.mxu0 %v6661_v12  ;;  %1187 = vmatprep.subr.mxu1 %v6662_v13  ;;  %v4706_v12 = vld [vmem:[%s6157_s2 + $0x180] sm:$0xff]  ;;  %v4712_v13 = vld [vmem:[%s6157_s2 + $0x190] sm:$0xff] }
 0x22c   :  { %1117 = vmatpush1.msra.mxu0 %v6663_v14  ;;  %1188 = vmatpush1.msra.mxu1 %v6664_v15  ;;  %v4718_v14 = vld [vmem:[%s6157_s2 + $0x168] sm:$0xff]  ;;  %v4724_v15 = vld [vmem:[%s6157_s2 + $0x178] sm:$0xff] }
 0x22d   :  { %1118 = vmatprep.subr.mxu0 %v6665_v16  ;;  %1189 = vmatprep.subr.mxu1 %v6666_v36  ;;  %v4730_v16 = vld [vmem:[%s6157_s2 + $0x160] sm:$0xff]  ;;  %v4736_v36 = vld [vmem:[%s6157_s2 + $0x170] sm:$0xff] }
 0x22e   :  { %1119 = vmatpush1.msra.mxu0 %v6667_v49  ;;  %1190 = vmatpush1.msra.mxu1 %v6668_v17  ;;  %v4742_v49 = vld [vmem:[%s6157_s2 + $0x148] sm:$0xff]  ;;  %v4748_v17 = vld [vmem:[%s6157_s2 + $0x158] sm:$0xff] }
 0x22f   :  { %1120 = vmatprep.subr.mxu0 %v6669_v19  ;;  %1191 = vmatprep.subr.mxu1 %v6670_v20  ;;  %v4760_v19 = vld [vmem:[%s6157_s2 + $0x150] sm:$0xff]  ;;  %v4766_v20 = vld [vmem:[%s6157_s2 + $0x128] sm:$0xff] }
 0x230   :  { %v3074_v21 = vpop.eup %3073  ;;  %1121 = vmatpush1.msra.mxu0 %v6671_v22  ;;  %1192 = vmatpush1.msra.mxu1 %v6672_v23  ;;  %v4778_v22 = vld [vmem:[%s6157_s2 + $0x120] sm:$0xff]  ;;  %v4784_v23 = vld [vmem:[%s6157_s2 + $0x130] sm:$0xff] }
 0x231   :  { %v3076_v24 = vpop.eup %3075  ;;  %1122 = vmatprep.subr.mxu0 %v6673_v25  ;;  %1193 = vmatprep.subr.mxu1 %v6674_v26  ;;  %6697 = vst [vmem:[#allocation33_spill] sm:$0xff] %v4778_v22  ;;  %6698 = vst [vmem:[#allocation34_spill] sm:$0xff] %v4784_v23  ;;  %v4796_v25 = vld [vmem:[%s6157_s2 + $0x118] sm:$0xff]  ;;  %v4802_v26 = vld [vmem:[%s6157_s2 + $0x100] sm:$0xff] }
 0x232   :  { %v3078_v27 = vpop.eup %3077  ;;  %1123 = vmatpush1.msra.mxu0 %v6592_v39  ;;  %1194 = vmatpush1.msra.mxu1 %v6675_v29  ;;  %v935_v32 = vmul.f32 %v3076_v24, %v3074_v21  ;;  %v6679_v39 = vld [vmem:[#allocation61_spill] sm:$0xff]  ;;  %v4790_v24 = vld [vmem:[%s6157_s2 + $0x108] sm:$0xff]  ;;  %6700 = vst [vmem:[#allocation56_spill] sm:$0xff] %v4796_v25  ;;  %6701 = vst [vmem:[#allocation57_spill] sm:$0xff] %v4802_v26 }
 0x233   :  { %1124 = vmatprep.subr.mxu0 %v6676_v30  ;;  %1195 = vmatprep.subr.mxu1 %v6595_v45  ;;  %v934_v31 = vmul.f32 %v3078_v27, %v4421_v47  ;;  %v6682_v45 = vld [vmem:[#allocation64_spill] sm:$0xff]  ;;  %v6685_v47 = vld [vmem:[#allocation67_spill] sm:$0xff]  ;;  %v4772_v21 = vld [vmem:[%s6157_s2 + $0x138] sm:$0xff]  ;;  %6699 = vst [vmem:[#allocation53_spill] sm:$0xff] %v4790_v24 }
 0x234   :  { %1125 = vmatpush1.msra.mxu0 %v6596_v42  ;;  %1196 = vmatpush1.msra.mxu1 %v6597_v52  ;;  %v6683_v42 = vld [vmem:[#allocation65_spill] sm:$0xff]  ;;  %v6684_v52 = vld [vmem:[#allocation66_spill] sm:$0xff]  ;;  %v4808_v27 = vld [vmem:[%s6157_s2 + $0x110] sm:$0xff] }
 0x235   :  { %1126 = vmatprep.subr.mxu0 %v6677_v33  ;;  %1197 = vmatprep.subr.mxu1 %v6678_v34  ;;  %v4577_v35 = vadd.f32 %v935_v32, %v934_v31  ;;  %v3080_v11 = vpop.eup %3079  ;;  %6702 = vst [vmem:[#allocation58_spill] sm:$0xff] %v4808_v27  ;;  %v4820_v29 = vld [vmem:[%s6157_s2 + $0xf8] sm:$0xff]  ;;  %v4826_v30 = vld [vmem:[%s6157_s2 + $0xe0] sm:$0xff]  ;;  %v4832_v31 = vld [vmem:[%s6157_s2 + $0xf0] sm:$0xff] }
 0x236   :  { %1127 = vmatpush1.msra.mxu0 %v6679_v39  ;;  %1198 = vmatpush1.msra.mxu1 %v6680_v38  ;;  %6704 = vst [vmem:[#allocation78_spill] sm:$0xff] %v4820_v29  ;;  %6705 = vst [vmem:[#allocation80_spill] sm:$0xff] %v4826_v30  ;;  %v4838_v32 = vld [vmem:[%s6157_s2 + $0xc8] sm:$0xff]  ;;  %v4844_v33 = vld [vmem:[%s6157_s2 + $0xd8] sm:$0xff] }
 0x237   :  { %1128 = vmatprep.subr.mxu0 %v6681_v46  ;;  %1199 = vmatprep.subr.mxu1 %v6682_v45  ;;  %3081 = vtanh.f32 %v4577_v35  ;;  %6706 = vst [vmem:[#allocation81_spill] sm:$0xff] %v4832_v31  ;;  %6707 = vst [vmem:[#allocation82_spill] sm:$0xff] %v4838_v32  ;;  %v4850_v34 = vld [vmem:[%s6157_s2 + $0xc0] sm:$0xff]  ;;  %v4856_v39 = vld [vmem:[%s6157_s2 + $0xd0] sm:$0xff] }
 0x238   :  { %1129 = vmatpush1.msra.mxu0 %v6683_v42  ;;  %1200 = vmatpush1.msra.mxu1 %v6684_v52  ;;  %6708 = vst [vmem:[#allocation84_spill] sm:$0xff] %v4844_v33  ;;  %6709 = vst [vmem:[#allocation85_spill] sm:$0xff] %v4850_v34  ;;  %v4862_v38 = vld [vmem:[%s6157_s2 + $0xa8] sm:$0xff]  ;;  %v4868_v46 = vld [vmem:[%s6157_s2 + $0xb8] sm:$0xff] }
 0x239   :  { %1130 = vmatprep.subr.mxu0 %v6685_v47  ;;  %1201 = vmatprep.subr.mxu1 %v6686_v0  ;;  %6710 = vst [vmem:[#allocation86_spill] sm:$0xff] %v4856_v39  ;;  %6711 = vst [vmem:[#allocation2_spill] sm:$0xff] %v4862_v38  ;;  %v4874_v45 = vld [vmem:[%s6157_s2 + $0xa0] sm:$0xff]  ;;  %v4880_v42 = vld [vmem:[%s6157_s2 + $0xb0] sm:$0xff] }
 0x23a   :  { %1131 = vmatpush1.msra.mxu0 %v6687_v1  ;;  %1202 = vmatpush1.msra.mxu1 %v6688_v2  ;;  %6712 = vst [vmem:[#allocation3_spill] sm:$0xff] %v4868_v46  ;;  %6713 = vst [vmem:[#allocation4_spill] sm:$0xff] %v4874_v45  ;;  %v4886_v52 = vld [vmem:[%s6157_s2 + $0x88] sm:$0xff]  ;;  %v4892_v47 = vld [vmem:[%s6157_s2 + $0x98] sm:$0xff] }
 0x23b   :  { %1132 = vmatprep.subr.mxu0 %v6689_v4  ;;  %1203 = vmatprep.subr.mxu1 %v6690_v5  ;;  %6714 = vst [vmem:[#allocation5_spill] sm:$0xff] %v4880_v42  ;;  %6715 = vst [vmem:[#allocation6_spill] sm:$0xff] %v4886_v52  ;;  %v4898_v0 = vld [vmem:[%s6157_s2 + $0x80] sm:$0xff]  ;;  %v4904_v1 = vld [vmem:[%s6157_s2 + $0x90] sm:$0xff] }
 0x23c   :  { %1133 = vmatpush1.msra.mxu0 %v6691_v6  ;;  %1204 = vmatpush1.msra.mxu1 %v6692_v40  ;;  %6716 = vst [vmem:[#allocation7_spill] sm:$0xff] %v4892_v47  ;;  %6717 = vst [vmem:[#allocation8_spill] sm:$0xff] %v4898_v0  ;;  %v4910_v2 = vld [vmem:[%s6157_s2 + $0x68] sm:$0xff]  ;;  %v4916_v4 = vld [vmem:[%s6157_s2 + $0x78] sm:$0xff] }
 0x23d   :  { %1134 = vmatprep.subr.mxu0 %v6693_v7  ;;  %1205 = vmatprep.subr.mxu1 %v6694_v8  ;;  %6718 = vst [vmem:[#allocation9_spill] sm:$0xff] %v4904_v1  ;;  %6719 = vst [vmem:[#allocation10_spill] sm:$0xff] %v4910_v2  ;;  %v4922_v5 = vld [vmem:[%s6157_s2 + $0x60] sm:$0xff]  ;;  %v4928_v6 = vld [vmem:[%s6157_s2 + $0x70] sm:$0xff] }
 0x23e   :  { %1135 = vmatpush1.msra.mxu0 %v6616_v37  ;;  %1206 = vmatpush1.msra.mxu1 %v6617_v53  ;;  %6720 = vst [vmem:[#allocation11_spill] sm:$0xff] %v4916_v4  ;;  %6721 = vst [vmem:[#allocation12_spill] sm:$0xff] %v4922_v5  ;;  %v4934_v40 = vld [vmem:[%s6157_s2 + $0x48] sm:$0xff]  ;;  %v4940_v7 = vld [vmem:[%s6157_s2 + $0x58] sm:$0xff] }
 0x23f   :  { %1136 = vmatprep.subr.mxu0 %v6695_v9  ;;  %1207 = vmatprep.subr.mxu1 %v6619_v50  ;;  %v4688_v50 = vld [vmem:[%s6157_s2 + $0x1b0] sm:$0xff]  ;;  %6722 = vst [vmem:[#allocation13_spill] sm:$0xff] %v4928_v6  ;;  %6723 = vst [vmem:[#allocation14_spill] sm:$0xff] %v4934_v40  ;;  %v4946_v8 = vld [vmem:[%s6157_s2 + $0x40] sm:$0xff] }
 0x240   :  { %1137 = vmatpush1.msra.mxu0 %v6620_v44  ;;  %1208 = vmatpush1.msra.mxu1 %v6621_v41  ;;  %v4694_v44 = vld [vmem:[%s6157_s2 + $0x188] sm:$0xff]  ;;  %v4700_v41 = vld [vmem:[%s6157_s2 + $0x198] sm:$0xff]  ;;  %6724 = vst [vmem:[#allocation15_spill] sm:$0xff] %v4940_v7  ;;  %6725 = vst [vmem:[#allocation16_spill] sm:$0xff] %v4946_v8 }
 0x241   :  { %1138 = vmatprep.subr.mxu0 %v6696_v10  ;;  %1209 = vmatprep.subr.mxu1 %v6623_v48  ;;  %v4682_v48 = vld [vmem:[%s6157_s2 + $0x1a0] sm:$0xff]  ;;  %v4952_v9 = vld [vmem:[%s6157_s2 + $0x50] sm:$0xff]  ;;  %v4958_v10 = vld [vmem:[%s6157_s2 + $0x28] sm:$0xff] }
 0x242   :  { %1139 = vmatpush1.msra.mxu0 %v6624_v43  ;;  %1210 = vmatpush1.msra.mxu1 %v6625_v55  ;;  %v4670_v43 = vld [vmem:[%s6157_s2 + $0x1a8] sm:$0xff]  ;;  %v4676_v55 = vld [vmem:[%s6157_s2 + $0x1b8] sm:$0xff]  ;;  %6726 = vst [vmem:[#allocation17_spill] sm:$0xff] %v4952_v9  ;;  %6727 = vst [vmem:[#allocation18_spill] sm:$0xff] %v4958_v10 }
 0x243   :  { %1140 = vmatprep.subr.mxu0 %v4254_v58  ;;  %1211 = vmatprep.subr.mxu1 %v4259_v57  ;;  %v4622_v57 = vld [vmem:[%s6157_s2 + $0x1e8] sm:$0xff]  ;;  %v4640_v58 = vld [vmem:[%s6157_s2 + $0x1f0] sm:$0xff] }
 0x244   :  { %v3082_v53 = vpop.eup %3081  ;;  %1141 = vmatpush1.msra.mxu0 %v4266_v61  ;;  %1212 = vmatpush1.msra.mxu1 %v4271_v62  ;;  %v4652_v61 = vld [vmem:[%s6157_s2 + $0x1d8] sm:$0xff]  ;;  %v4658_v62 = vld [vmem:[%s6157_s2 + $0x1c0] sm:$0xff] }
 0x245   :  { %1142 = vmatprep.subr.mxu0 %v4278_v63  ;;  %1213 = vmatprep.subr.mxu1 %v4283_v3  ;;  %v938_v37 = vmul.f32 %v3082_v53, %v3080_v11  ;;  %v4628_v3 = vld [vmem:[%s6157_s2 + $0x1f8] sm:$0xff]  ;;  %v4664_v63 = vld [vmem:[%s6157_s2 + $0x1d0] sm:$0xff]  ;;  %v4970_v53 = vld [vmem:[%s6157_s2 + $0x20] sm:$0xff] }
 0x246   :  { %1143 = vmatpush1.msra.mxu0 %v4290_v59  ;;  %1176 = vmatprep.mubr.f32.mxu0 %v6507_v60  ;;  %v4646_v59 = vld [vmem:[%s6157_s2 + $0x1c8] sm:$0xff]  ;;  %v4964_v11 = vld [vmem:[%s6157_s2 + $0x38] sm:$0xff]  ;;  %6729 = vst [vmem:[#allocation20_spill] sm:$0xff] %v4970_v53 }
 0x247   :  { %1214 = vmatpush1.msra.mxu1 %v4297_v56  ;;  %1247 = vmatprep.mubr.f32.mxu1 %v6507_v60  ;;  %2966 = vst [vmem:[%s6162_s5 + $0x2] sm:$0x3] %v938_v37  ;;  %v4634_v56 = vld [vmem:[%s6157_s2 + $0x1e0] sm:$0xff]  ;;  %6728 = vst [vmem:[#allocation19_spill] sm:$0xff] %v4964_v11 }
 0x248   :  { %1177 = vmatmul.mubr.f32.vlgmr.msra.gmra.mxu0 %v938_v37  ;;  %1248 = vmatmul.mubr.f32.vlgmr.msra.gmra.mxu1 %v938_v37  ;;  %v4976_v37 = vld [vmem:[%s6157_s2 + $0x30] sm:$0xff] }
 0x249   :  { %1345 = vmatprep.subr.mxu0 %v4622_v57  ;;  %1416 = vmatprep.subr.mxu1 %v4628_v3  ;;  %6730 = vst [vmem:[#allocation21_spill] sm:$0xff] %v4976_v37 }
 0x24a   :  { %1346 = vmatpush1.msra.mxu0 %v4634_v56  ;;  %1417 = vmatpush1.msra.mxu1 %v4640_v58 }
 0x24b   :  { %1347 = vmatprep.subr.mxu0 %v4646_v59  ;;  %1418 = vmatprep.subr.mxu1 %v4652_v61 }
 0x24c   :  { %1348 = vmatpush1.msra.mxu0 %v4658_v62  ;;  %1419 = vmatpush1.msra.mxu1 %v4664_v63 }
 0x24d   :  { %1349 = vmatprep.subr.mxu0 %v4670_v43  ;;  %1420 = vmatprep.subr.mxu1 %v4676_v55 }
 0x24e   :  { %1350 = vmatpush1.msra.mxu0 %v4682_v48  ;;  %1421 = vmatpush1.msra.mxu1 %v4688_v50 }
 0x24f   :  { %1351 = vmatprep.subr.mxu0 %v4694_v44  ;;  %1422 = vmatprep.subr.mxu1 %v4700_v41 }
 0x250   :  { %1352 = vmatpush1.msra.mxu0 %v4706_v12  ;;  %1423 = vmatpush1.msra.mxu1 %v4712_v13 }
 0x251   :  { %1353 = vmatprep.subr.mxu0 %v4718_v14  ;;  %1424 = vmatprep.subr.mxu1 %v4724_v15 }
 0x252   :  { %1354 = vmatpush1.msra.mxu0 %v4730_v16  ;;  %1425 = vmatpush1.msra.mxu1 %v4736_v36 }
 0x253   :  { %1355 = vmatprep.subr.mxu0 %v4742_v49  ;;  %1426 = vmatprep.subr.mxu1 %v4748_v17 }
 0x254   :  { %1356 = vmatpush1.msra.mxu0 %v4754_v18  ;;  %1427 = vmatpush1.msra.mxu1 %v4760_v19 }
 0x255   :  { %1357 = vmatprep.subr.mxu0 %v4766_v20  ;;  %1428 = vmatprep.subr.mxu1 %v4772_v21 }
 0x256   :  { %1358 = vmatpush1.msra.mxu0 %v4778_v22  ;;  %1429 = vmatpush1.msra.mxu1 %v4784_v23 }
 0x257   :  { %1359 = vmatprep.subr.mxu0 %v4790_v24  ;;  %1430 = vmatprep.subr.mxu1 %v4796_v25 }
 0x258   :  { %1360 = vmatpush1.msra.mxu0 %v4802_v26  ;;  %1431 = vmatpush1.msra.mxu1 %v4808_v27 }
 0x259   :  { %1361 = vmatprep.subr.mxu0 %v4814_v28  ;;  %1432 = vmatprep.subr.mxu1 %v4820_v29 }
 0x25a   :  { %1362 = vmatpush1.msra.mxu0 %v4826_v30  ;;  %1433 = vmatpush1.msra.mxu1 %v4832_v31 }
 0x25b   :  { %1363 = vmatprep.subr.mxu0 %v4838_v32  ;;  %1434 = vmatprep.subr.mxu1 %v4844_v33 }
 0x25c   :  { %1364 = vmatpush1.msra.mxu0 %v4850_v34  ;;  %1435 = vmatpush1.msra.mxu1 %v4856_v39 }
 0x25d   :  { %1365 = vmatprep.subr.mxu0 %v4862_v38  ;;  %1436 = vmatprep.subr.mxu1 %v4868_v46 }
 0x25e   :  { %1366 = vmatpush1.msra.mxu0 %v4874_v45  ;;  %1437 = vmatpush1.msra.mxu1 %v4880_v42 }
 0x25f   :  { %1367 = vmatprep.subr.mxu0 %v4886_v52  ;;  %1438 = vmatprep.subr.mxu1 %v4892_v47 }
 0x260   :  { %1368 = vmatpush1.msra.mxu0 %v4898_v0  ;;  %1439 = vmatpush1.msra.mxu1 %v4904_v1 }
 0x261   :  { %1369 = vmatprep.subr.mxu0 %v4910_v2  ;;  %1440 = vmatprep.subr.mxu1 %v4916_v4 }
 0x262   :  { %1370 = vmatpush1.msra.mxu0 %v4922_v5  ;;  %1441 = vmatpush1.msra.mxu1 %v4928_v6 }
 0x263   :  { %1371 = vmatprep.subr.mxu0 %v4934_v40  ;;  %1442 = vmatprep.subr.mxu1 %v4940_v7 }
 0x264   :  { %1372 = vmatpush1.msra.mxu0 %v4946_v8  ;;  %1443 = vmatpush1.msra.mxu1 %v4952_v9 }
 0x265   :  { %1373 = vmatprep.subr.mxu0 %v4958_v10  ;;  %1444 = vmatprep.subr.mxu1 %v4964_v11  ;;  %v4982_v10 = vld [vmem:[%s6157_s2 + $0x8] sm:$0xff]  ;;  %v4988_v11 = vld [vmem:[%s6157_s2 + $0x18] sm:$0xff] }
 0x266   :  { %1374 = vmatpush1.msra.mxu0 %v4970_v53  ;;  %1445 = vmatpush1.msra.mxu1 %v4976_v37  ;;  %6731 = vst [vmem:[#allocation22_spill] sm:$0xff] %v4982_v10  ;;  %6732 = vst [vmem:[#allocation23_spill] sm:$0xff] %v4988_v11  ;;  %v4994_v53 = vld [vmem:[%s6157_s2] sm:$0xff] }
 0x267   :  { %1375 = vmatprep.subr.mxu0 %v4982_v10  ;;  %1446 = vmatprep.subr.mxu1 %v4988_v11  ;;  %6733 = vst [vmem:[#allocation24_spill] sm:$0xff] %v4994_v53  ;;  %v5001_v10 = vld [vmem:[%s6157_s2 + $0x10] sm:$0xff]  ;;  %v5008_v11 = vld [vmem:[%s6158_s3 + $0x1e8] sm:$0xff] }
 0x268   :  { %1376 = vmatpush1.msra.mxu0 %v4994_v53  ;;  %1409 = vmatprep.mubr.f32.mxu0 %v6507_v60  ;;  %6734 = vst [vmem:[#allocation25_spill] sm:$0xff] %v5001_v10  ;;  %6735 = vst [vmem:[#allocation26_spill] sm:$0xff] %v5008_v11  ;;  %v5014_v53 = vld [vmem:[%s6158_s3 + $0x1f8] sm:$0xff] }
 0x269   :  { %1447 = vmatpush1.msra.mxu1 %v5001_v10  ;;  %1480 = vmatprep.mubr.f32.mxu1 %v6507_v60  ;;  %6736 = vst [vmem:[#allocation27_spill] sm:$0xff] %v5014_v53 }
 0x26a   :  { %1512 = vmatprep.subr.mxu0 %v5008_v11  ;;  %1583 = vmatprep.subr.mxu1 %v5014_v53  ;;  %v2967_v11 = vld [vmem:[%s6159_s0 + $0x10] sm:$0xff] }
 0x2e7   :  { %v1011_v37 = vpop.f32.mrf.mxu0  ;;  %v1082_v9 = vpop.f32.mrf.mxu1 }
 0x2e9   :  { %v1013_v8 = vpop.f32.mrf.mxu0  ;;  %v1084_v10 = vpop.f32.mrf.mxu1 }
 0x2ea   :  { %v1091_v7 = vcombine.low %v1011_v37, %v1013_v8  ;;  %v1092_v40 = vcombine.low %v1082_v9, %v1084_v10 }
 0x2ec   :  { %v1099_v6 = vrot.slane %v1091_v7, %v4375_v51  ;;  %v1106_v5 = vrot.slane %v1092_v40, %v4375_v51 }
 0x2ee   :  { %v1107_v4 = vcombine.low %v1099_v6, %v1106_v5 }
 0x2f0   :  { %v1109_v2 = vadd.f32 %v2967_v11, %v1107_v4 }
 0x2f2   :  { %v2969_v1 = vmul.f32 -1.442695, %v1109_v2  ;;  %v1284_v0 = vrot.slane %v1109_v2, 2  ;;  %v1295_v47 = vrot.slane %v1109_v2, 6  ;;  %v1292_v8 = vrot.slane %v1109_v2, 4 }
 0x2f4   :  { %3083 = vpow2.f32 %v2969_v1  ;;  %v2970_v53 = vmul.f32 -1.442695, %v1284_v0  ;;  %v2971_v52 = vmul.f32 -1.442695, %v1295_v47 }
 0x2f6   :  { %3085 = vpow2.f32 %v2970_v53 }
 0x2f7   :  { %3087 = vpow2.f32 %v2971_v52 }
 0x301   :  { %v3084_v42 = vpop.eup %3083 }
 0x302   :  { %v1280_v9 = vadd.f32 1.0, %v3084_v42  ;;  %v2968_v42 = vld [vmem:[%s6160_s1 + $0x10] sm:$0xff] }
 0x303   :  { %v3086_v10 = vpop.eup %3085 }
 0x304   :  { %3089 = vrcp.f32 %v1280_v9  ;;  %v1289_v40 = vadd.f32 1.0, %v3086_v10  ;;  %v3088_v52 = vpop.eup %3087 }
 0x305   :  { %3091 = vtanh.f32 %v1292_v8  ;;  %v1300_v45 = vadd.f32 1.0, %v3088_v52 }
 0x306   :  { %3093 = vrcp.f32 %v1289_v40 }
 0x308   :  { %v1178_v7 = vpop.f32.mrf.mxu0  ;;  %v1249_v37 = vpop.f32.mrf.mxu1 }
 0x30a   :  { %v1180_v5 = vpop.f32.mrf.mxu0  ;;  %v1251_v4 = vpop.f32.mrf.mxu1 }
 0x30b   :  { %v1258_v6 = vcombine.low %v1178_v7, %v1180_v5  ;;  %v1259_v11 = vcombine.low %v1249_v37, %v1251_v4 }
 0x30d   :  { %v1266_v0 = vrot.slane %v1258_v6, %v4375_v51  ;;  %v1273_v1 = vrot.slane %v1259_v11, %v4375_v51 }
 0x30f   :  { %v1274_v47 = vcombine.low %v1266_v0, %v1273_v1 }
 0x311   :  { %v3090_v2 = vpop.eup %3089  ;;  %v1276_v53 = vadd.f32 %v2968_v42, %v1274_v47 }
 0x312   :  { %v3092_v8 = vpop.eup %3091 }
 0x313   :  { %v3094_v9 = vpop.eup %3093  ;;  %v2972_v10 = vmul.f32 -1.442695, %v1276_v53  ;;  %v1315_v40 = vrot.slane %v1276_v53, 2  ;;  %v1304_v37 = vmul.f32 %v3092_v8, %v3090_v2  ;;  %v1326_v6 = vrot.slane %v1276_v53, 6  ;;  %v5055_v8 = vld [vmem:[%s6158_s3 + $0x1d8] sm:$0xff] }
 0x314   :  { %v1303_v7 = vmul.f32 %v3094_v9, %v4542_v54  ;;  %v1323_v1 = vrot.slane %v1276_v53, 4  ;;  %v5043_v53 = vld [vmem:[%s6158_s3 + $0x1f0] sm:$0xff]  ;;  %v5061_v9 = vld [vmem:[%s6158_s3 + $0x1c0] sm:$0xff] }
 0x315   :  { %3095 = vpow2.f32 %v2972_v10  ;;  %v2973_v5 = vmul.f32 -1.442695, %v1315_v40  ;;  %v2974_v11 = vmul.f32 -1.442695, %v1326_v6  ;;  %v5067_v10 = vld [vmem:[%s6158_s3 + $0x1d0] sm:$0xff]  ;;  %v5073_v40 = vld [vmem:[%s6158_s3 + $0x1a8] sm:$0xff] }
 0x316   :  { %v5028_v4 = vadd.f32 %v1304_v37, %v1303_v7  ;;  %v5079_v7 = vld [vmem:[%s6158_s3 + $0x1b8] sm:$0xff]  ;;  %v5085_v37 = vld [vmem:[%s6158_s3 + $0x1a0] sm:$0xff]  ;;  %v5097_v6 = vld [vmem:[%s6158_s3 + $0x188] sm:$0xff] }
 0x317   :  { %3097 = vpow2.f32 %v2973_v5  ;;  %v5091_v5 = vld [vmem:[%s6158_s3 + $0x1b0] sm:$0xff]  ;;  %6737 = vst [vmem:[#allocation28_spill] sm:$0xff] %v5097_v6 }
 0x318   :  { %3099 = vrcp.f32 %v1300_v45  ;;  %v5037_v45 = vld [vmem:[%s6158_s3 + $0x1e0] sm:$0xff] }
 0x319   :  { %3101 = vtanh.f32 %v5028_v4 }
 0x31a   :  { %3103 = vpow2.f32 %v2974_v11  ;;  %v5103_v11 = vld [vmem:[%s6158_s3 + $0x198] sm:$0xff] }
 0x31b   :  { %6738 = vst [vmem:[#allocation29_spill] sm:$0xff] %v5103_v11 }
 0x322   :  { %v3096_v0 = vpop.eup %3095 }
 0x323   :  { %v1311_v42 = vadd.f32 1.0, %v3096_v0  ;;  %v5109_v0 = vld [vmem:[%s6158_s3 + $0x180] sm:$0xff] }
 0x324   :  { %v3098_v47 = vpop.eup %3097  ;;  %6739 = vst [vmem:[#allocation30_spill] sm:$0xff] %v5109_v0 }
 0x325   :  { %v3100_v51 = vpop.eup %3099  ;;  %3105 = vrcp.f32 %v1311_v42  ;;  %v1320_v52 = vadd.f32 1.0, %v3098_v47  ;;  %v5121_v47 = vld [vmem:[%s6158_s3 + $0x168] sm:$0xff] }
 0x326   :  { %v3102_v54 = vpop.eup %3101  ;;  %3107 = vtanh.f32 %v1323_v1  ;;  %v5115_v1 = vld [vmem:[%s6158_s3 + $0x190] sm:$0xff]  ;;  %6741 = vst [vmem:[#allocation32_spill] sm:$0xff] %v5121_v47 }
 0x327   :  { %3109 = vrcp.f32 %v1320_v52  ;;  %v1307_v2 = vmul.f32 %v3102_v54, %v3100_v51  ;;  %v5049_v51 = vld [vmem:[%s6158_s3 + $0x1c8] sm:$0xff]  ;;  %6740 = vst [vmem:[#allocation31_spill] sm:$0xff] %v5115_v1  ;;  %v3104_v42 = vpop.eup %3103  ;;  %v5127_v52 = vld [vmem:[%s6158_s3 + $0x178] sm:$0xff] }
 0x328   :  { %6742 = vst [vmem:[#allocation35_spill] sm:$0xff] %v5127_v52 }
 0x329   :  { %2975 = vst [vmem:[%s6161_s4 + $0x4] sm:$0x3] %v1307_v2  ;;  %1410 = vmatmul.mubr.f32.vlgmr.msra.gmra.mxu0 %v1307_v2  ;;  %1481 = vmatmul.mubr.f32.vlgmr.msra.gmra.mxu1 %v1307_v2  ;;  %v5133_v2 = vld [vmem:[%s6158_s3 + $0x160] sm:$0xff] }
 0x32a   :  { %1513 = vmatpush1.msra.mxu0 %v5037_v45  ;;  %1584 = vmatpush1.msra.mxu1 %v5043_v53  ;;  %6743 = vst [vmem:[#allocation36_spill] sm:$0xff] %v5133_v2 }
 0x32b   :  { %1514 = vmatprep.subr.mxu0 %v5049_v51  ;;  %1585 = vmatprep.subr.mxu1 %v5055_v8 }
 0x32c   :  { %1515 = vmatpush1.msra.mxu0 %v5061_v9  ;;  %1586 = vmatpush1.msra.mxu1 %v5067_v10 }
 0x32d   :  { %1516 = vmatprep.subr.mxu0 %v5073_v40  ;;  %1587 = vmatprep.subr.mxu1 %v5079_v7 }
 0x32e   :  { %1517 = vmatpush1.msra.mxu0 %v5085_v37  ;;  %1588 = vmatpush1.msra.mxu1 %v5091_v5 }
 0x32f   :  { %1518 = vmatprep.subr.mxu0 %v5097_v6  ;;  %1589 = vmatprep.subr.mxu1 %v5103_v11  ;;  %v1331_v11 = vadd.f32 1.0, %v3104_v42  ;;  %v5175_v42 = vld [vmem:[%s6158_s3 + $0x138] sm:$0xff] }
 0x330   :  { %1519 = vmatpush1.msra.mxu0 %v5109_v0  ;;  %1590 = vmatpush1.msra.mxu1 %v5115_v1  ;;  %v5139_v1 = vld [vmem:[%s6158_s3 + $0x170] sm:$0xff]  ;;  %v5151_v0 = vld [vmem:[%s6158_s3 + $0x158] sm:$0xff]  ;;  %6750 = vst [vmem:[#allocation43_spill] sm:$0xff] %v5175_v42 }
 0x331   :  { %1520 = vmatprep.subr.mxu0 %v5121_v47  ;;  %1591 = vmatprep.subr.mxu1 %v5127_v52  ;;  %6744 = vst [vmem:[#allocation37_spill] sm:$0xff] %v5139_v1  ;;  %v5145_v52 = vld [vmem:[%s6158_s3 + $0x148] sm:$0xff]  ;;  %6746 = vst [vmem:[#allocation39_spill] sm:$0xff] %v5151_v0  ;;  %3111 = vrcp.f32 %v1331_v11  ;;  %v5226_v11 = vld [vmem:[%s6158_s3 + $0xf8] sm:$0xff] }
 0x332   :  { %v3106_v54 = vpop.eup %3105  ;;  %1521 = vmatpush1.msra.mxu0 %v5133_v2  ;;  %1592 = vmatpush1.msra.mxu1 %v5139_v1  ;;  %6745 = vst [vmem:[#allocation38_spill] sm:$0xff] %v5145_v52  ;;  %v5157_v1 = vld [vmem:[%s6158_s3 + $0x140] sm:$0xff]  ;;  %6756 = vst [vmem:[#allocation49_spill] sm:$0xff] %v5226_v11 }
 0x333   :  { %v3108_v47 = vpop.eup %3107  ;;  %1522 = vmatprep.subr.mxu0 %v5145_v52  ;;  %1593 = vmatprep.subr.mxu1 %v5151_v0  ;;  %6747 = vst [vmem:[#allocation40_spill] sm:$0xff] %v5157_v1  ;;  %v5163_v52 = vld [vmem:[%s6158_s3 + $0x150] sm:$0xff]  ;;  %v5169_v0 = vld [vmem:[%s6158_s3 + $0x128] sm:$0xff] }
 0x334   :  { %v3110_v2 = vpop.eup %3109  ;;  %1523 = vmatpush1.msra.mxu0 %v5157_v1  ;;  %6748 = vst [vmem:[#allocation41_spill] sm:$0xff] %v5163_v52  ;;  %1594 = vmatpush1.msra.mxu1 %v5163_v52  ;;  %6749 = vst [vmem:[#allocation42_spill] sm:$0xff] %v5169_v0  ;;  %v1335_v6 = vmul.f32 %v3108_v47, %v3106_v54  ;;  %v5182_v52 = vld [vmem:[%s6158_s3 + $0x120] sm:$0xff] }
 0x335   :  { %1524 = vmatprep.subr.mxu0 %v5169_v0  ;;  %1595 = vmatprep.subr.mxu1 %v5175_v42  ;;  %v1334_v1 = vmul.f32 %v3110_v2, %v4577_v35  ;;  %v5188_v0 = vld [vmem:[%s6158_s3 + $0x130] sm:$0xff]  ;;  %v5194_v42 = vld [vmem:[%s6158_s3 + $0x108] sm:$0xff]  ;;  %v5200_v35 = vld [vmem:[%s6158_s3 + $0x118] sm:$0xff] }
 0x336   :  { %1525 = vmatpush1.msra.mxu0 %v5182_v52  ;;  %1596 = vmatpush1.msra.mxu1 %v5188_v0  ;;  %6751 = vst [vmem:[#allocation44_spill] sm:$0xff] %v5194_v42  ;;  %6752 = vst [vmem:[#allocation45_spill] sm:$0xff] %v5200_v35  ;;  %v5208_v54 = vld [vmem:[%s6158_s3 + $0x100] sm:$0xff]  ;;  %v5214_v2 = vld [vmem:[%s6158_s3 + $0x110] sm:$0xff] }
 0x337   :  { %1526 = vmatprep.subr.mxu0 %v5194_v42  ;;  %1597 = vmatprep.subr.mxu1 %v5200_v35  ;;  %v5203_v47 = vadd.f32 %v1335_v6, %v1334_v1  ;;  %6753 = vst [vmem:[#allocation46_spill] sm:$0xff] %v5208_v54  ;;  %6754 = vst [vmem:[#allocation47_spill] sm:$0xff] %v5214_v2  ;;  %v5220_v6 = vld [vmem:[%s6158_s3 + $0xe8] sm:$0xff]  ;;  %v5233_v1 = vld [vmem:[%s6158_s3 + $0xe0] sm:$0xff] }
 0x338   :  { %1527 = vmatpush1.msra.mxu0 %v5208_v54  ;;  %1598 = vmatpush1.msra.mxu1 %v5214_v2  ;;  %6755 = vst [vmem:[#allocation48_spill] sm:$0xff] %v5220_v6  ;;  %6757 = vst [vmem:[#allocation50_spill] sm:$0xff] %v5233_v1  ;;  %v5251_v2 = vld [vmem:[%s6158_s3 + $0xd8] sm:$0xff]  ;;  %v5365_v54 = vld [vmem:[%s6158_s3 + $0x28] sm:$0xff] }
 0x339   :  { %1528 = vmatprep.subr.mxu0 %v5220_v6  ;;  %1599 = vmatprep.subr.mxu1 %v5226_v11  ;;  %3113 = vtanh.f32 %v5203_v47  ;;  %v5239_v6 = vld [vmem:[%s6158_s3 + $0xf0] sm:$0xff]  ;;  %v5245_v11 = vld [vmem:[%s6158_s3 + $0xc8] sm:$0xff]  ;;  %6760 = vst [vmem:[#allocation54_spill] sm:$0xff] %v5251_v2  ;;  %6779 = vst [vmem:[#allocation76_spill] sm:$0xff] %v5365_v54 }
 0x33a   :  { %1529 = vmatpush1.msra.mxu0 %v5233_v1  ;;  %6758 = vst [vmem:[#allocation51_spill] sm:$0xff] %v5239_v6  ;;  %1600 = vmatpush1.msra.mxu1 %v5239_v6  ;;  %6759 = vst [vmem:[#allocation52_spill] sm:$0xff] %v5245_v11  ;;  %v5257_v1 = vld [vmem:[%s6158_s3 + $0xc0] sm:$0xff]  ;;  %v5263_v6 = vld [vmem:[%s6158_s3 + $0xd0] sm:$0xff] }
 0x33b   :  { %1530 = vmatprep.subr.mxu0 %v5245_v11  ;;  %1601 = vmatprep.subr.mxu1 %v5251_v2  ;;  %6761 = vst [vmem:[#allocation55_spill] sm:$0xff] %v5257_v1  ;;  %6762 = vst [vmem:[#allocation59_spill] sm:$0xff] %v5263_v6  ;;  %v5269_v11 = vld [vmem:[%s6158_s3 + $0xa8] sm:$0xff]  ;;  %v5275_v2 = vld [vmem:[%s6158_s3 + $0xb8] sm:$0xff] }
 0x33c   :  { %1531 = vmatpush1.msra.mxu0 %v5257_v1  ;;  %1602 = vmatpush1.msra.mxu1 %v5263_v6  ;;  %6763 = vst [vmem:[#allocation60_spill] sm:$0xff] %v5269_v11  ;;  %6764 = vst [vmem:[#allocation61_spill] sm:$0xff] %v5275_v2  ;;  %v5281_v1 = vld [vmem:[%s6158_s3 + $0xa0] sm:$0xff]  ;;  %v5287_v6 = vld [vmem:[%s6158_s3 + $0xb0] sm:$0xff] }
 0x33d   :  { %1532 = vmatprep.subr.mxu0 %v5269_v11  ;;  %1603 = vmatprep.subr.mxu1 %v5275_v2  ;;  %6765 = vst [vmem:[#allocation62_spill] sm:$0xff] %v5281_v1  ;;  %6766 = vst [vmem:[#allocation63_spill] sm:$0xff] %v5287_v6  ;;  %v5293_v11 = vld [vmem:[%s6158_s3 + $0x88] sm:$0xff]  ;;  %v5299_v2 = vld [vmem:[%s6158_s3 + $0x98] sm:$0xff] }
 0x33e   :  { %1533 = vmatpush1.msra.mxu0 %v5281_v1  ;;  %1604 = vmatpush1.msra.mxu1 %v5287_v6  ;;  %6767 = vst [vmem:[#allocation64_spill] sm:$0xff] %v5293_v11  ;;  %6768 = vst [vmem:[#allocation65_spill] sm:$0xff] %v5299_v2  ;;  %v5305_v1 = vld [vmem:[%s6158_s3 + $0x80] sm:$0xff]  ;;  %v5311_v6 = vld [vmem:[%s6158_s3 + $0x90] sm:$0xff] }
 0x33f   :  { %1534 = vmatprep.subr.mxu0 %v5293_v11  ;;  %1605 = vmatprep.subr.mxu1 %v5299_v2  ;;  %6769 = vst [vmem:[#allocation66_spill] sm:$0xff] %v5305_v1  ;;  %6770 = vst [vmem:[#allocation67_spill] sm:$0xff] %v5311_v6  ;;  %v5317_v11 = vld [vmem:[%s6158_s3 + $0x68] sm:$0xff]  ;;  %v5323_v2 = vld [vmem:[%s6158_s3 + $0x78] sm:$0xff] }
 0x340   :  { %1535 = vmatpush1.msra.mxu0 %v5305_v1  ;;  %1606 = vmatpush1.msra.mxu1 %v5311_v6  ;;  %6771 = vst [vmem:[#allocation68_spill] sm:$0xff] %v5317_v11  ;;  %6772 = vst [vmem:[#allocation69_spill] sm:$0xff] %v5323_v2  ;;  %v5329_v1 = vld [vmem:[%s6158_s3 + $0x60] sm:$0xff]  ;;  %v5335_v6 = vld [vmem:[%s6158_s3 + $0x70] sm:$0xff] }
 0x341   :  { %1536 = vmatprep.subr.mxu0 %v5317_v11  ;;  %1607 = vmatprep.subr.mxu1 %v5323_v2  ;;  %6773 = vst [vmem:[#allocation70_spill] sm:$0xff] %v5329_v1  ;;  %6774 = vst [vmem:[#allocation71_spill] sm:$0xff] %v5335_v6  ;;  %v5341_v11 = vld [vmem:[%s6158_s3 + $0x48] sm:$0xff]  ;;  %v5347_v2 = vld [vmem:[%s6158_s3 + $0x58] sm:$0xff] }
 0x342   :  { %1537 = vmatpush1.msra.mxu0 %v5329_v1  ;;  %1608 = vmatpush1.msra.mxu1 %v5335_v6  ;;  %6775 = vst [vmem:[#allocation72_spill] sm:$0xff] %v5341_v11  ;;  %6776 = vst [vmem:[#allocation73_spill] sm:$0xff] %v5347_v2  ;;  %v5353_v1 = vld [vmem:[%s6158_s3 + $0x40] sm:$0xff]  ;;  %v5359_v6 = vld [vmem:[%s6158_s3 + $0x50] sm:$0xff] }
 0x343   :  { %1538 = vmatprep.subr.mxu0 %v5341_v11  ;;  %1609 = vmatprep.subr.mxu1 %v5347_v2  ;;  %6777 = vst [vmem:[#allocation74_spill] sm:$0xff] %v5353_v1  ;;  %6778 = vst [vmem:[#allocation75_spill] sm:$0xff] %v5359_v6  ;;  %v3112_v11 = vpop.eup %3111  ;;  %v5371_v2 = vld [vmem:[%s6158_s3 + $0x38] sm:$0xff]  ;;  %v5383_v35 = vld [vmem:[%s6158_s3 + $0x30] sm:$0xff] }
 0x344   :  { %1539 = vmatpush1.msra.mxu0 %v5353_v1  ;;  %1610 = vmatpush1.msra.mxu1 %v5359_v6  ;;  %6780 = vst [vmem:[#allocation79_spill] sm:$0xff] %v5371_v2  ;;  %v5377_v6 = vld [vmem:[%s6158_s3 + $0x20] sm:$0xff] }
 0x345   :  { %1540 = vmatprep.subr.mxu0 %v5365_v54  ;;  %1611 = vmatprep.subr.mxu1 %v5371_v2  ;;  %6781 = vst [vmem:[#allocation83_spill] sm:$0xff] %v5377_v6  ;;  %v5389_v54 = vld [vmem:[%s6158_s3 + $0x8] sm:$0xff]  ;;  %v5395_v2 = vld [vmem:[%s6158_s3 + $0x18] sm:$0xff]  ;;  %v5401_v42 = vld [vmem:[%s6158_s3] sm:$0xff] }
 0x346   :  { %v3114_v1 = vpop.eup %3113  ;;  %1541 = vmatpush1.msra.mxu0 %v5377_v6  ;;  %1612 = vmatpush1.msra.mxu1 %v5383_v35  ;;  %6782 = vst [vmem:[#allocation88_spill] sm:$0xff] %v5389_v54 }
 0x347   :  { %1542 = vmatprep.subr.mxu0 %v5389_v54  ;;  %1613 = vmatprep.subr.mxu1 %v5395_v2  ;;  %v1338_v6 = vmul.f32 %v3114_v1, %v3112_v11  ;;  %v5408_v54 = vld [vmem:[%s6158_s3 + $0x10] sm:$0xff]  ;;  %v6784_v11 = vld [vmem:[#allocation5_spill] sm:$0xff]  ;;  %v6785_v1 = vld [vmem:[#allocation6_spill] sm:$0xff] }
 0x348   :  { %1543 = vmatpush1.msra.mxu0 %v5401_v42  ;;  %1576 = vmatprep.mubr.f32.mxu0 %v6507_v60 }
 0x349   :  { %1614 = vmatpush1.msra.mxu1 %v5408_v54  ;;  %1647 = vmatprep.mubr.f32.mxu1 %v6507_v60  ;;  %2976 = vst [vmem:[%s6162_s5 + $0x4] sm:$0x3] %v1338_v6 }
 0x34a   :  { %1577 = vmatmul.mubr.f32.vlgmr.msra.gmra.mxu0 %v1338_v6  ;;  %1648 = vmatmul.mubr.f32.vlgmr.msra.gmra.mxu1 %v1338_v6  ;;  %v6783_v6 = vld [vmem:[#allocation4_spill] sm:$0xff] }
 0x34b   :  { %1745 = vmatprep.subr.mxu0 %v4622_v57  ;;  %1816 = vmatprep.subr.mxu1 %v4628_v3 }
 0x34c   :  { %1746 = vmatpush1.msra.mxu0 %v4634_v56  ;;  %1817 = vmatpush1.msra.mxu1 %v4640_v58 }
 0x34d   :  { %1747 = vmatprep.subr.mxu0 %v4646_v59  ;;  %1818 = vmatprep.subr.mxu1 %v4652_v61 }
 0x34e   :  { %1748 = vmatpush1.msra.mxu0 %v4658_v62  ;;  %1819 = vmatpush1.msra.mxu1 %v4664_v63 }
 0x34f   :  { %1749 = vmatprep.subr.mxu0 %v4670_v43  ;;  %1820 = vmatprep.subr.mxu1 %v4676_v55 }
 0x350   :  { %1750 = vmatpush1.msra.mxu0 %v4682_v48  ;;  %1821 = vmatpush1.msra.mxu1 %v4688_v50 }
 0x351   :  { %1751 = vmatprep.subr.mxu0 %v4694_v44  ;;  %1822 = vmatprep.subr.mxu1 %v4700_v41 }
 0x352   :  { %1752 = vmatpush1.msra.mxu0 %v4706_v12  ;;  %1823 = vmatpush1.msra.mxu1 %v4712_v13 }
 0x353   :  { %1753 = vmatprep.subr.mxu0 %v4718_v14  ;;  %1824 = vmatprep.subr.mxu1 %v4724_v15 }
 0x354   :  { %1754 = vmatpush1.msra.mxu0 %v4730_v16  ;;  %1825 = vmatpush1.msra.mxu1 %v4736_v36 }
 0x355   :  { %1755 = vmatprep.subr.mxu0 %v4742_v49  ;;  %1826 = vmatprep.subr.mxu1 %v4748_v17 }
 0x356   :  { %1756 = vmatpush1.msra.mxu0 %v4754_v18  ;;  %1827 = vmatpush1.msra.mxu1 %v4760_v19 }
 0x357   :  { %1757 = vmatprep.subr.mxu0 %v4766_v20  ;;  %1828 = vmatprep.subr.mxu1 %v4772_v21 }
 0x358   :  { %1758 = vmatpush1.msra.mxu0 %v4778_v22  ;;  %1829 = vmatpush1.msra.mxu1 %v4784_v23 }
 0x359   :  { %1759 = vmatprep.subr.mxu0 %v4790_v24  ;;  %1830 = vmatprep.subr.mxu1 %v4796_v25 }
 0x35a   :  { %1760 = vmatpush1.msra.mxu0 %v4802_v26  ;;  %1831 = vmatpush1.msra.mxu1 %v4808_v27 }
 0x35b   :  { %1761 = vmatprep.subr.mxu0 %v4814_v28  ;;  %1832 = vmatprep.subr.mxu1 %v4820_v29  ;;  %v6807_v29 = vld [vmem:[#allocation87_spill] sm:$0xff] }
 0x35c   :  { %1762 = vmatpush1.msra.mxu0 %v4826_v30  ;;  %1833 = vmatpush1.msra.mxu1 %v4832_v31  ;;  %v6786_v30 = vld [vmem:[#allocation7_spill] sm:$0xff]  ;;  %v6787_v31 = vld [vmem:[#allocation8_spill] sm:$0xff] }
 0x35d   :  { %1763 = vmatprep.subr.mxu0 %v4838_v32  ;;  %1834 = vmatprep.subr.mxu1 %v4844_v33  ;;  %v6788_v32 = vld [vmem:[#allocation9_spill] sm:$0xff]  ;;  %v6789_v33 = vld [vmem:[#allocation10_spill] sm:$0xff] }
 0x35e   :  { %1764 = vmatpush1.msra.mxu0 %v4850_v34  ;;  %1835 = vmatpush1.msra.mxu1 %v4856_v39  ;;  %v6790_v34 = vld [vmem:[#allocation11_spill] sm:$0xff]  ;;  %v6791_v39 = vld [vmem:[#allocation12_spill] sm:$0xff] }
 0x35f   :  { %1765 = vmatprep.subr.mxu0 %v4862_v38  ;;  %1836 = vmatprep.subr.mxu1 %v4868_v46  ;;  %v6792_v38 = vld [vmem:[#allocation13_spill] sm:$0xff]  ;;  %v6793_v46 = vld [vmem:[#allocation14_spill] sm:$0xff] }
 0x360   :  { %1766 = vmatpush1.msra.mxu0 %v6783_v6  ;;  %1837 = vmatpush1.msra.mxu1 %v6784_v11  ;;  %v6794_v6 = vld [vmem:[#allocation15_spill] sm:$0xff]  ;;  %v6795_v11 = vld [vmem:[#allocation16_spill] sm:$0xff] }
 0x361   :  { %1767 = vmatprep.subr.mxu0 %v6785_v1  ;;  %1838 = vmatprep.subr.mxu1 %v6786_v30  ;;  %v6796_v1 = vld [vmem:[#allocation17_spill] sm:$0xff]  ;;  %v6797_v30 = vld [vmem:[#allocation18_spill] sm:$0xff] }
 0x362   :  { %1768 = vmatpush1.msra.mxu0 %v6787_v31  ;;  %1839 = vmatpush1.msra.mxu1 %v6788_v32  ;;  %v6798_v31 = vld [vmem:[#allocation19_spill] sm:$0xff]  ;;  %v6799_v32 = vld [vmem:[#allocation20_spill] sm:$0xff] }
 0x363   :  { %1769 = vmatprep.subr.mxu0 %v6789_v33  ;;  %1840 = vmatprep.subr.mxu1 %v6790_v34  ;;  %v6800_v33 = vld [vmem:[#allocation21_spill] sm:$0xff]  ;;  %v6801_v34 = vld [vmem:[#allocation22_spill] sm:$0xff] }
 0x364   :  { %1770 = vmatpush1.msra.mxu0 %v6791_v39  ;;  %1841 = vmatpush1.msra.mxu1 %v6792_v38  ;;  %v6802_v39 = vld [vmem:[#allocation23_spill] sm:$0xff]  ;;  %v6803_v38 = vld [vmem:[#allocation24_spill] sm:$0xff] }
 0x365   :  { %1771 = vmatprep.subr.mxu0 %v6793_v46  ;;  %1842 = vmatprep.subr.mxu1 %v6794_v6  ;;  %v6804_v6 = vld [vmem:[#allocation25_spill] sm:$0xff] }
 0x366   :  { %1772 = vmatpush1.msra.mxu0 %v6795_v11  ;;  %1843 = vmatpush1.msra.mxu1 %v6796_v1  ;;  %v6805_v1 = vld [vmem:[#allocation26_spill] sm:$0xff] }
 0x367   :  { %1773 = vmatprep.subr.mxu0 %v6797_v30  ;;  %1844 = vmatprep.subr.mxu1 %v6798_v31  ;;  %v6806_v30 = vld [vmem:[#allocation27_spill] sm:$0xff] }
 0x368   :  { %1774 = vmatpush1.msra.mxu0 %v6799_v32  ;;  %1845 = vmatpush1.msra.mxu1 %v6800_v33 }
 0x369   :  { %1775 = vmatprep.subr.mxu0 %v6801_v34  ;;  %1846 = vmatprep.subr.mxu1 %v6802_v39 }
 0x36a   :  { %1776 = vmatpush1.msra.mxu0 %v6803_v38  ;;  %1809 = vmatprep.mubr.f32.mxu0 %v6507_v60 }
 0x36b   :  { %1847 = vmatpush1.msra.mxu1 %v6804_v6  ;;  %1880 = vmatprep.mubr.f32.mxu1 %v6507_v60  ;;  %v2977_v6 = vld [vmem:[%s6159_s0 + $0x18] sm:$0xff] }
 0x36c   :  { %1912 = vmatprep.subr.mxu0 %v6805_v1  ;;  %1983 = vmatprep.subr.mxu1 %v6806_v30 }
 0x3e9   :  { %v1411_v31 = vpop.f32.mrf.mxu0  ;;  %v1482_v32 = vpop.f32.mrf.mxu1 }
 0x3eb   :  { %v1413_v11 = vpop.f32.mrf.mxu0  ;;  %v1484_v33 = vpop.f32.mrf.mxu1 }
 0x3ec   :  { %v1491_v46 = vcombine.low %v1411_v31, %v1413_v11  ;;  %v1492_v34 = vcombine.low %v1482_v32, %v1484_v33 }
 0x3ee   :  { %v1499_v39 = vrot.slane %v1491_v46, %v6807_v29  ;;  %v1506_v38 = vrot.slane %v1492_v34, %v6807_v29 }
 0x3f0   :  { %v1507_v28 = vcombine.low %v1499_v39, %v1506_v38 }
 0x3f2   :  { %v1509_v27 = vadd.f32 %v2977_v6, %v1507_v28 }
 0x3f4   :  { %v2979_v26 = vmul.f32 -1.442695, %v1509_v27  ;;  %v1684_v1 = vrot.slane %v1509_v27, 2  ;;  %v1695_v25 = vrot.slane %v1509_v27, 6  ;;  %v1692_v31 = vrot.slane %v1509_v27, 4 }
 0x3f6   :  { %3115 = vpow2.f32 %v2979_v26  ;;  %v2980_v30 = vmul.f32 -1.442695, %v1684_v1  ;;  %v2981_v24 = vmul.f32 -1.442695, %v1695_v25 }
 0x3f8   :  { %3117 = vpow2.f32 %v2980_v30 }
 0x3f9   :  { %3119 = vpow2.f32 %v2981_v24 }
 0x403   :  { %v3116_v23 = vpop.eup %3115 }
 0x404   :  { %v1680_v32 = vadd.f32 1.0, %v3116_v23  ;;  %v2978_v23 = vld [vmem:[%s6160_s1 + $0x18] sm:$0xff] }
 0x405   :  { %v3118_v33 = vpop.eup %3117 }
 0x406   :  { %3121 = vrcp.f32 %v1680_v32  ;;  %v1689_v34 = vadd.f32 1.0, %v3118_v33  ;;  %v3120_v24 = vpop.eup %3119 }
 0x407   :  { %3123 = vtanh.f32 %v1692_v31  ;;  %v1700_v22 = vadd.f32 1.0, %v3120_v24 }
 0x408   :  { %3125 = vrcp.f32 %v1689_v34 }
 0x40a   :  { %v1578_v46 = vpop.f32.mrf.mxu0  ;;  %v1649_v11 = vpop.f32.mrf.mxu1 }
 0x40c   :  { %v1580_v39 = vpop.f32.mrf.mxu0  ;;  %v1651_v28 = vpop.f32.mrf.mxu1 }
 0x40d   :  { %v1658_v38 = vcombine.low %v1578_v46, %v1580_v39  ;;  %v1659_v6 = vcombine.low %v1649_v11, %v1651_v28 }
 0x40f   :  { %v1666_v26 = vrot.slane %v1658_v38, %v6807_v29  ;;  %v1673_v30 = vrot.slane %v1659_v6, %v6807_v29 }
 0x411   :  { %v1674_v25 = vcombine.low %v1666_v26, %v1673_v30 }
 0x413   :  { %v3122_v27 = vpop.eup %3121  ;;  %v1676_v1 = vadd.f32 %v2978_v23, %v1674_v25 }
 0x414   :  { %v3124_v31 = vpop.eup %3123 }
 0x415   :  { %v3126_v32 = vpop.eup %3125  ;;  %v2982_v33 = vmul.f32 -1.442695, %v1676_v1  ;;  %v1715_v34 = vrot.slane %v1676_v1, 2  ;;  %v1704_v11 = vmul.f32 %v3124_v31, %v3122_v27  ;;  %v1726_v38 = vrot.slane %v1676_v1, 6  ;;  %v6811_v31 = vld [vmem:[#allocation31_spill] sm:$0xff] }
 0x416   :  { %v1703_v46 = vmul.f32 %v3126_v32, %v5028_v4  ;;  %v1723_v30 = vrot.slane %v1676_v1, 4  ;;  %v6810_v1 = vld [vmem:[#allocation30_spill] sm:$0xff] }
 0x417   :  { %3127 = vpow2.f32 %v2982_v33  ;;  %v2983_v39 = vmul.f32 -1.442695, %v1715_v34  ;;  %v2984_v6 = vmul.f32 -1.442695, %v1726_v38  ;;  %v6812_v33 = vld [vmem:[#allocation32_spill] sm:$0xff]  ;;  %v6813_v34 = vld [vmem:[#allocation35_spill] sm:$0xff] }
 0x418   :  { %v5494_v28 = vadd.f32 %v1704_v11, %v1703_v46  ;;  %v6814_v11 = vld [vmem:[#allocation36_spill] sm:$0xff] }
 0x419   :  { %3129 = vpow2.f32 %v2983_v39  ;;  %v6815_v39 = vld [vmem:[#allocation37_spill] sm:$0xff] }
 0x41a   :  { %3131 = vrcp.f32 %v1700_v22  ;;  %v6808_v22 = vld [vmem:[#allocation28_spill] sm:$0xff] }
 0x41b   :  { %3133 = vtanh.f32 %v5494_v28 }
 0x41c   :  { %3135 = vpow2.f32 %v2984_v6  ;;  %v6816_v6 = vld [vmem:[#allocation38_spill] sm:$0xff] }
 0x424   :  { %v3128_v26 = vpop.eup %3127 }
 0x425   :  { %v1711_v23 = vadd.f32 1.0, %v3128_v26  ;;  %v6817_v26 = vld [vmem:[#allocation39_spill] sm:$0xff] }
 0x426   :  { %v3130_v25 = vpop.eup %3129 }
 0x427   :  { %v3132_v29 = vpop.eup %3131  ;;  %3137 = vrcp.f32 %v1711_v23  ;;  %v1720_v24 = vadd.f32 1.0, %v3130_v25  ;;  %v6818_v25 = vld [vmem:[#allocation40_spill] sm:$0xff] }
 0x428   :  { %v3134_v4 = vpop.eup %3133  ;;  %3139 = vtanh.f32 %v1723_v30 }
 0x429   :  { %3141 = vrcp.f32 %v1720_v24  ;;  %v1707_v27 = vmul.f32 %v3134_v4, %v3132_v29  ;;  %v6809_v29 = vld [vmem:[#allocation29_spill] sm:$0xff]  ;;  %v3136_v32 = vpop.eup %3135  ;;  %v6820_v4 = vld [vmem:[#allocation42_spill] sm:$0xff] }
 0x42a   :  { %v1731_v23 = vadd.f32 1.0, %v3136_v32  ;;  %v6819_v24 = vld [vmem:[#allocation41_spill] sm:$0xff] }
 0x42b   :  { %2985 = vst [vmem:[%s6161_s4 + $0x6] sm:$0x3] %v1707_v27  ;;  %1810 = vmatmul.mubr.f32.vlgmr.msra.gmra.mxu0 %v1707_v27  ;;  %1881 = vmatmul.mubr.f32.vlgmr.msra.gmra.mxu1 %v1707_v27  ;;  %v6821_v27 = vld [vmem:[#allocation43_spill] sm:$0xff] }
 0x42c   :  { %1913 = vmatpush1.msra.mxu0 %v5037_v45  ;;  %1984 = vmatpush1.msra.mxu1 %v5043_v53  ;;  %3143 = vrcp.f32 %v1731_v23  ;;  %v6834_v23 = vld [vmem:[#allocation60_spill] sm:$0xff] }
 0x42d   :  { %1914 = vmatprep.subr.mxu0 %v5049_v51  ;;  %1985 = vmatprep.subr.mxu1 %v5055_v8 }
 0x42e   :  { %1915 = vmatpush1.msra.mxu0 %v5061_v9  ;;  %1986 = vmatpush1.msra.mxu1 %v5067_v10 }
 0x42f   :  { %1916 = vmatprep.subr.mxu0 %v5073_v40  ;;  %1987 = vmatprep.subr.mxu1 %v5079_v7 }
 0x430   :  { %1917 = vmatpush1.msra.mxu0 %v5085_v37  ;;  %1988 = vmatpush1.msra.mxu1 %v5091_v5 }
 0x431   :  { %1918 = vmatprep.subr.mxu0 %v6808_v22  ;;  %1989 = vmatprep.subr.mxu1 %v6809_v29 }
 0x432   :  { %1919 = vmatpush1.msra.mxu0 %v6810_v1  ;;  %1990 = vmatpush1.msra.mxu1 %v6811_v31 }
 0x433   :  { %1920 = vmatprep.subr.mxu0 %v6812_v33  ;;  %1991 = vmatprep.subr.mxu1 %v6813_v34 }
 0x434   :  { %v3138_v46 = vpop.eup %3137  ;;  %1921 = vmatpush1.msra.mxu0 %v6814_v11  ;;  %1992 = vmatpush1.msra.mxu1 %v6815_v39 }
 0x435   :  { %v3140_v38 = vpop.eup %3139  ;;  %1922 = vmatprep.subr.mxu0 %v6816_v6  ;;  %1993 = vmatprep.subr.mxu1 %v6817_v26  ;;  %v6822_v6 = vld [vmem:[#allocation44_spill] sm:$0xff]  ;;  %v6823_v26 = vld [vmem:[#allocation45_spill] sm:$0xff] }
 0x436   :  { %v3142_v30 = vpop.eup %3141  ;;  %1923 = vmatpush1.msra.mxu0 %v6818_v25  ;;  %1994 = vmatpush1.msra.mxu1 %v6819_v24  ;;  %v1735_v11 = vmul.f32 %v3140_v38, %v3138_v46  ;;  %v6824_v25 = vld [vmem:[#allocation46_spill] sm:$0xff]  ;;  %v6825_v24 = vld [vmem:[#allocation47_spill] sm:$0xff]  ;;  %v6830_v38 = vld [vmem:[#allocation52_spill] sm:$0xff] }
 0x437   :  { %1924 = vmatprep.subr.mxu0 %v6820_v4  ;;  %1995 = vmatprep.subr.mxu1 %v6821_v27  ;;  %v1734_v34 = vmul.f32 %v3142_v30, %v5203_v47  ;;  %v6826_v4 = vld [vmem:[#allocation48_spill] sm:$0xff]  ;;  %v6827_v27 = vld [vmem:[#allocation49_spill] sm:$0xff]  ;;  %v6828_v47 = vld [vmem:[#allocation50_spill] sm:$0xff] }
 0x438   :  { %1925 = vmatpush1.msra.mxu0 %v5182_v52  ;;  %1996 = vmatpush1.msra.mxu1 %v5188_v0  ;;  %v6829_v46 = vld [vmem:[#allocation51_spill] sm:$0xff]  ;;  %v6831_v30 = vld [vmem:[#allocation54_spill] sm:$0xff] }
 0x439   :  { %1926 = vmatprep.subr.mxu0 %v6822_v6  ;;  %1997 = vmatprep.subr.mxu1 %v6823_v26  ;;  %v5529_v32 = vadd.f32 %v1735_v11, %v1734_v34  ;;  %v6832_v34 = vld [vmem:[#allocation55_spill] sm:$0xff] }
 0x43a   :  { %1927 = vmatpush1.msra.mxu0 %v6824_v25  ;;  %1998 = vmatpush1.msra.mxu1 %v6825_v24  ;;  %v6833_v11 = vld [vmem:[#allocation59_spill] sm:$0xff]  ;;  %v6835_v24 = vld [vmem:[#allocation61_spill] sm:$0xff]  ;;  %v6838_v25 = vld [vmem:[#allocation64_spill] sm:$0xff] }
 0x43b   :  { %1928 = vmatprep.subr.mxu0 %v6826_v4  ;;  %1999 = vmatprep.subr.mxu1 %v6827_v27  ;;  %3145 = vtanh.f32 %v5529_v32  ;;  %v6836_v4 = vld [vmem:[#allocation62_spill] sm:$0xff]  ;;  %v6837_v27 = vld [vmem:[#allocation63_spill] sm:$0xff] }
 0x43c   :  { %1929 = vmatpush1.msra.mxu0 %v6828_v47  ;;  %2000 = vmatpush1.msra.mxu1 %v6829_v46  ;;  %v6839_v47 = vld [vmem:[#allocation65_spill] sm:$0xff]  ;;  %v6840_v46 = vld [vmem:[#allocation66_spill] sm:$0xff]  ;;  %v6852_v26 = vld [vmem:[#allocation83_spill] sm:$0xff] }
 0x43d   :  { %1930 = vmatprep.subr.mxu0 %v6830_v38  ;;  %2001 = vmatprep.subr.mxu1 %v6831_v30  ;;  %v6841_v38 = vld [vmem:[#allocation67_spill] sm:$0xff]  ;;  %v6842_v30 = vld [vmem:[#allocation68_spill] sm:$0xff] }
 0x43e   :  { %1931 = vmatpush1.msra.mxu0 %v6832_v34  ;;  %2002 = vmatpush1.msra.mxu1 %v6833_v11  ;;  %v6843_v34 = vld [vmem:[#allocation69_spill] sm:$0xff]  ;;  %v6844_v11 = vld [vmem:[#allocation70_spill] sm:$0xff] }
 0x43f   :  { %1932 = vmatprep.subr.mxu0 %v6834_v23  ;;  %2003 = vmatprep.subr.mxu1 %v6835_v24  ;;  %v6845_v23 = vld [vmem:[#allocation71_spill] sm:$0xff]  ;;  %v6846_v24 = vld [vmem:[#allocation72_spill] sm:$0xff] }
 0x440   :  { %1933 = vmatpush1.msra.mxu0 %v6836_v4  ;;  %2004 = vmatpush1.msra.mxu1 %v6837_v27  ;;  %v6847_v4 = vld [vmem:[#allocation73_spill] sm:$0xff]  ;;  %v6848_v27 = vld [vmem:[#allocation74_spill] sm:$0xff] }
 0x441   :  { %1934 = vmatprep.subr.mxu0 %v6838_v25  ;;  %2005 = vmatprep.subr.mxu1 %v6839_v47  ;;  %v6849_v25 = vld [vmem:[#allocation75_spill] sm:$0xff]  ;;  %v3144_v47 = vpop.eup %3143 }
 0x442   :  { %1935 = vmatpush1.msra.mxu0 %v6840_v46  ;;  %2006 = vmatpush1.msra.mxu1 %v6841_v38  ;;  %v6850_v46 = vld [vmem:[#allocation76_spill] sm:$0xff]  ;;  %v6851_v38 = vld [vmem:[#allocation79_spill] sm:$0xff] }
 0x443   :  { %1936 = vmatprep.subr.mxu0 %v6842_v30  ;;  %2007 = vmatprep.subr.mxu1 %v6843_v34 }
 0x444   :  { %1937 = vmatpush1.msra.mxu0 %v6844_v11  ;;  %2008 = vmatpush1.msra.mxu1 %v6845_v23  ;;  %v6853_v11 = vld [vmem:[#allocation88_spill] sm:$0xff] }
 0x445   :  { %1938 = vmatprep.subr.mxu0 %v6846_v24  ;;  %2009 = vmatprep.subr.mxu1 %v6847_v4 }
 0x446   :  { %1939 = vmatpush1.msra.mxu0 %v6848_v27  ;;  %2010 = vmatpush1.msra.mxu1 %v6849_v25 }
 0x447   :  { %1940 = vmatprep.subr.mxu0 %v6850_v46  ;;  %2011 = vmatprep.subr.mxu1 %v6851_v38 }
 0x448   :  { %v3146_v30 = vpop.eup %3145  ;;  %1941 = vmatpush1.msra.mxu0 %v6852_v26  ;;  %2012 = vmatpush1.msra.mxu1 %v5383_v35 }
 0x449   :  { %1942 = vmatprep.subr.mxu0 %v6853_v11  ;;  %2013 = vmatprep.subr.mxu1 %v5395_v2  ;;  %v1738_v24 = vmul.f32 %v3146_v30, %v3144_v47  ;;  %v6881_v47 = vld [vmem:[#allocation15_spill] sm:$0xff]  ;;  %v6882_v30 = vld [vmem:[#allocation16_spill] sm:$0xff] }
 0x44a   :  { %1943 = vmatpush1.msra.mxu0 %v5401_v42  ;;  %1976 = vmatprep.mubr.f32.mxu0 %v6507_v60 }
 0x44b   :  { %2014 = vmatpush1.msra.mxu1 %v5408_v54  ;;  %2047 = vmatprep.mubr.f32.mxu1 %v6507_v60  ;;  %2986 = vst [vmem:[%s6162_s5 + $0x6] sm:$0x3] %v1738_v24 }
 0x44c   :  { %1977 = vmatmul.mubr.f32.vlgmr.msra.gmra.mxu0 %v1738_v24  ;;  %2048 = vmatmul.mubr.f32.vlgmr.msra.gmra.mxu1 %v1738_v24  ;;  %v6880_v24 = vld [vmem:[#allocation14_spill] sm:$0xff] }
 0x44d   :  { %2145 = vmatprep.subr.mxu0 %v4622_v57  ;;  %2216 = vmatprep.subr.mxu1 %v4628_v3  ;;  %v6854_v57 = vld [vmem:[#allocation33_spill] sm:$0xff]  ;;  %v6855_v3 = vld [vmem:[#allocation34_spill] sm:$0xff] }
 0x44e   :  { %2146 = vmatpush1.msra.mxu0 %v4634_v56  ;;  %2217 = vmatpush1.msra.mxu1 %v4640_v58  ;;  %v6856_v56 = vld [vmem:[#allocation53_spill] sm:$0xff]  ;;  %v6857_v58 = vld [vmem:[#allocation56_spill] sm:$0xff] }
 0x44f   :  { %2147 = vmatprep.subr.mxu0 %v4646_v59  ;;  %2218 = vmatprep.subr.mxu1 %v4652_v61  ;;  %v6858_v59 = vld [vmem:[#allocation57_spill] sm:$0xff]  ;;  %v6859_v61 = vld [vmem:[#allocation58_spill] sm:$0xff] }
 0x450   :  { %2148 = vmatpush1.msra.mxu0 %v4658_v62  ;;  %2219 = vmatpush1.msra.mxu1 %v4664_v63  ;;  %v6860_v62 = vld [vmem:[#allocation77_spill] sm:$0xff]  ;;  %v6861_v63 = vld [vmem:[#allocation78_spill] sm:$0xff] }
 0x451   :  { %2149 = vmatprep.subr.mxu0 %v4670_v43  ;;  %2220 = vmatprep.subr.mxu1 %v4676_v55  ;;  %v6862_v43 = vld [vmem:[#allocation80_spill] sm:$0xff]  ;;  %v6863_v55 = vld [vmem:[#allocation81_spill] sm:$0xff] }
 0x452   :  { %2150 = vmatpush1.msra.mxu0 %v4682_v48  ;;  %2221 = vmatpush1.msra.mxu1 %v4688_v50  ;;  %v6864_v48 = vld [vmem:[#allocation82_spill] sm:$0xff]  ;;  %v6865_v50 = vld [vmem:[#allocation84_spill] sm:$0xff] }
 0x453   :  { %2151 = vmatprep.subr.mxu0 %v4694_v44  ;;  %2222 = vmatprep.subr.mxu1 %v4700_v41  ;;  %v6866_v44 = vld [vmem:[#allocation85_spill] sm:$0xff]  ;;  %v6867_v41 = vld [vmem:[#allocation86_spill] sm:$0xff] }
 0x454   :  { %2152 = vmatpush1.msra.mxu0 %v4706_v12  ;;  %2223 = vmatpush1.msra.mxu1 %v4712_v13  ;;  %v6868_v12 = vld [vmem:[#allocation2_spill] sm:$0xff]  ;;  %v6869_v13 = vld [vmem:[#allocation3_spill] sm:$0xff] }
 0x455   :  { %2153 = vmatprep.subr.mxu0 %v4718_v14  ;;  %2224 = vmatprep.subr.mxu1 %v4724_v15  ;;  %v6870_v14 = vld [vmem:[#allocation4_spill] sm:$0xff]  ;;  %v6871_v15 = vld [vmem:[#allocation5_spill] sm:$0xff] }
 0x456   :  { %2154 = vmatpush1.msra.mxu0 %v4730_v16  ;;  %2225 = vmatpush1.msra.mxu1 %v4736_v36  ;;  %v6872_v16 = vld [vmem:[#allocation6_spill] sm:$0xff]  ;;  %v6873_v36 = vld [vmem:[#allocation7_spill] sm:$0xff] }
 0x457   :  { %2155 = vmatprep.subr.mxu0 %v4742_v49  ;;  %2226 = vmatprep.subr.mxu1 %v4748_v17  ;;  %v6874_v49 = vld [vmem:[#allocation8_spill] sm:$0xff]  ;;  %v6875_v17 = vld [vmem:[#allocation9_spill] sm:$0xff] }
 0x458   :  { %2156 = vmatpush1.msra.mxu0 %v4754_v18  ;;  %2227 = vmatpush1.msra.mxu1 %v4760_v19  ;;  %v6876_v18 = vld [vmem:[#allocation10_spill] sm:$0xff]  ;;  %v6877_v19 = vld [vmem:[#allocation11_spill] sm:$0xff] }
 0x459   :  { %2157 = vmatprep.subr.mxu0 %v4766_v20  ;;  %2228 = vmatprep.subr.mxu1 %v4772_v21  ;;  %v6878_v20 = vld [vmem:[#allocation12_spill] sm:$0xff]  ;;  %v6879_v21 = vld [vmem:[#allocation13_spill] sm:$0xff] }
 0x45a   :  { %2158 = vmatpush1.msra.mxu0 %v6854_v57  ;;  %2229 = vmatpush1.msra.mxu1 %v6855_v3  ;;  %v6883_v57 = vld [vmem:[#allocation17_spill] sm:$0xff]  ;;  %v6884_v3 = vld [vmem:[#allocation18_spill] sm:$0xff] }
 0x45b   :  { %2159 = vmatprep.subr.mxu0 %v6856_v56  ;;  %2230 = vmatprep.subr.mxu1 %v6857_v58  ;;  %v6885_v56 = vld [vmem:[#allocation19_spill] sm:$0xff]  ;;  %v6886_v58 = vld [vmem:[#allocation20_spill] sm:$0xff] }
 0x45c   :  { %2160 = vmatpush1.msra.mxu0 %v6858_v59  ;;  %2231 = vmatpush1.msra.mxu1 %v6859_v61  ;;  %v6887_v59 = vld [vmem:[#allocation21_spill] sm:$0xff]  ;;  %v6888_v61 = vld [vmem:[#allocation22_spill] sm:$0xff] }
 0x45d   :  { %2161 = vmatprep.subr.mxu0 %v6860_v62  ;;  %2232 = vmatprep.subr.mxu1 %v6861_v63  ;;  %v6889_v62 = vld [vmem:[#allocation23_spill] sm:$0xff]  ;;  %v6890_v63 = vld [vmem:[#allocation24_spill] sm:$0xff] }
 0x45e   :  { %2162 = vmatpush1.msra.mxu0 %v6862_v43  ;;  %2233 = vmatpush1.msra.mxu1 %v6863_v55  ;;  %v6891_v43 = vld [vmem:[#allocation25_spill] sm:$0xff]  ;;  %v6892_v55 = vld [vmem:[#allocation26_spill] sm:$0xff] }
 0x45f   :  { %2163 = vmatprep.subr.mxu0 %v6864_v48  ;;  %2234 = vmatprep.subr.mxu1 %v6865_v50  ;;  %v6893_v48 = vld [vmem:[#allocation27_spill] sm:$0xff] }
 0x460   :  { %2164 = vmatpush1.msra.mxu0 %v6866_v44  ;;  %2235 = vmatpush1.msra.mxu1 %v6867_v41 }
 0x461   :  { %2165 = vmatprep.subr.mxu0 %v6868_v12  ;;  %2236 = vmatprep.subr.mxu1 %v6869_v13 }
 0x462   :  { %2166 = vmatpush1.msra.mxu0 %v6870_v14  ;;  %2237 = vmatpush1.msra.mxu1 %v6871_v15  ;;  %v6894_v15 = vld [vmem:[#allocation87_spill] sm:$0xff] }
 0x463   :  { %2167 = vmatprep.subr.mxu0 %v6872_v16  ;;  %2238 = vmatprep.subr.mxu1 %v6873_v36 }
 0x464   :  { %2168 = vmatpush1.msra.mxu0 %v6874_v49  ;;  %2239 = vmatpush1.msra.mxu1 %v6875_v17  ;;  %v2987_v49 = vld [vmem:[%s6159_s0 + $0x20] sm:$0xff] }
 0x465   :  { %2169 = vmatprep.subr.mxu0 %v6876_v18  ;;  %2240 = vmatprep.subr.mxu1 %v6877_v19 }
 0x466   :  { %2170 = vmatpush1.msra.mxu0 %v6878_v20  ;;  %2241 = vmatpush1.msra.mxu1 %v6879_v21 }
 0x467   :  { %2171 = vmatprep.subr.mxu0 %v6880_v24  ;;  %2242 = vmatprep.subr.mxu1 %v6881_v47 }
 0x468   :  { %2172 = vmatpush1.msra.mxu0 %v6882_v30  ;;  %2243 = vmatpush1.msra.mxu1 %v6883_v57 }
 0x469   :  { %2173 = vmatprep.subr.mxu0 %v6884_v3  ;;  %2244 = vmatprep.subr.mxu1 %v6885_v56 }
 0x46a   :  { %2174 = vmatpush1.msra.mxu0 %v6886_v58  ;;  %2245 = vmatpush1.msra.mxu1 %v6887_v59 }
 0x46b   :  { %2175 = vmatprep.subr.mxu0 %v6888_v61  ;;  %2246 = vmatprep.subr.mxu1 %v6889_v62 }
 0x46c   :  { %2176 = vmatpush1.msra.mxu0 %v6890_v63  ;;  %2209 = vmatprep.mubr.f32.mxu0 %v6507_v60 }
 0x46d   :  { %2247 = vmatpush1.msra.mxu1 %v6891_v43  ;;  %2280 = vmatprep.mubr.f32.mxu1 %v6507_v60 }
 0x46e   :  { %2312 = vmatprep.subr.mxu0 %v6892_v55  ;;  %2383 = vmatprep.subr.mxu1 %v6893_v48 }
 0x4eb   :  { %v1811_v50 = vpop.f32.mrf.mxu0  ;;  %v1882_v44 = vpop.f32.mrf.mxu1 }
 0x4ed   :  { %v1813_v41 = vpop.f32.mrf.mxu0  ;;  %v1884_v12 = vpop.f32.mrf.mxu1 }
 0x4ee   :  { %v1891_v13 = vcombine.low %v1811_v50, %v1813_v41  ;;  %v1892_v14 = vcombine.low %v1882_v44, %v1884_v12  ;;  %v2988_v44 = vld [vmem:[%s6160_s1 + $0x20] sm:$0xff] }
 0x4f0   :  { %v1899_v16 = vrot.slane %v1891_v13, %v6894_v15  ;;  %v1906_v36 = vrot.slane %v1892_v14, %v6894_v15 }
 0x4f2   :  { %v1907_v17 = vcombine.low %v1899_v16, %v1906_v36 }
 0x4f4   :  { %v1909_v18 = vadd.f32 %v2987_v49, %v1907_v17 }
 0x4f6   :  { %v2989_v19 = vmul.f32 -1.442695, %v1909_v18  ;;  %v2084_v20 = vrot.slane %v1909_v18, 2  ;;  %v2095_v24 = vrot.slane %v1909_v18, 6  ;;  %v2092_v57 = vrot.slane %v1909_v18, 4 }
 0x4f8   :  { %3147 = vpow2.f32 %v2989_v19  ;;  %v2990_v21 = vmul.f32 -1.442695, %v2084_v20  ;;  %v2991_v47 = vmul.f32 -1.442695, %v2095_v24 }
 0x4fa   :  { %3149 = vpow2.f32 %v2990_v21 }
 0x4fb   :  { %3151 = vpow2.f32 %v2991_v47 }
 0x505   :  { %v3148_v30 = vpop.eup %3147 }
 0x506   :  { %v2080_v3 = vadd.f32 1.0, %v3148_v30 }
 0x507   :  { %v3150_v56 = vpop.eup %3149 }
 0x508   :  { %3153 = vrcp.f32 %v2080_v3  ;;  %v2089_v58 = vadd.f32 1.0, %v3150_v56  ;;  %v3152_v12 = vpop.eup %3151 }
 0x509   :  { %3155 = vtanh.f32 %v2092_v57  ;;  %v2100_v18 = vadd.f32 1.0, %v3152_v12  ;;  %v6914_v12 = vld [vmem:[#allocation60_spill] sm:$0xff] }
 0x50a   :  { %3157 = vrcp.f32 %v2089_v58 }
 0x50c   :  { %v1978_v59 = vpop.f32.mrf.mxu0  ;;  %v2049_v61 = vpop.f32.mrf.mxu1 }
 0x50e   :  { %v1980_v62 = vpop.f32.mrf.mxu0  ;;  %v2051_v63 = vpop.f32.mrf.mxu1 }
 0x50f   :  { %v2058_v43 = vcombine.low %v1978_v59, %v1980_v62  ;;  %v2059_v55 = vcombine.low %v2049_v61, %v2051_v63 }
 0x511   :  { %v2066_v48 = vrot.slane %v2058_v43, %v6894_v15  ;;  %v2073_v50 = vrot.slane %v2059_v55, %v6894_v15  ;;  %v6904_v43 = vld [vmem:[#allocation46_spill] sm:$0xff]  ;;  %v6905_v55 = vld [vmem:[#allocation47_spill] sm:$0xff] }
 0x513   :  { %v2074_v41 = vcombine.low %v2066_v48, %v2073_v50  ;;  %v6906_v48 = vld [vmem:[#allocation48_spill] sm:$0xff]  ;;  %v6907_v50 = vld [vmem:[#allocation49_spill] sm:$0xff] }
 0x515   :  { %v3154_v13 = vpop.eup %3153  ;;  %v2076_v14 = vadd.f32 %v2988_v44, %v2074_v41  ;;  %v6912_v44 = vld [vmem:[#allocation55_spill] sm:$0xff] }
 0x516   :  { %v3156_v16 = vpop.eup %3155  ;;  %v6913_v41 = vld [vmem:[#allocation59_spill] sm:$0xff] }
 0x517   :  { %v3158_v36 = vpop.eup %3157  ;;  %v2992_v49 = vmul.f32 -1.442695, %v2076_v14  ;;  %v2115_v17 = vrot.slane %v2076_v14, 2  ;;  %v2104_v20 = vmul.f32 %v3156_v16, %v3154_v13  ;;  %v2126_v47 = vrot.slane %v2076_v14, 6  ;;  %v6915_v13 = vld [vmem:[#allocation61_spill] sm:$0xff]  ;;  %v6917_v16 = vld [vmem:[#allocation63_spill] sm:$0xff] }
 0x518   :  { %v2103_v19 = vmul.f32 %v3158_v36, %v5494_v28  ;;  %v2123_v3 = vrot.slane %v2076_v14, 4  ;;  %v6916_v14 = vld [vmem:[#allocation62_spill] sm:$0xff]  ;;  %v6918_v36 = vld [vmem:[#allocation64_spill] sm:$0xff] }
 0x519   :  { %3159 = vpow2.f32 %v2992_v49  ;;  %v2993_v21 = vmul.f32 -1.442695, %v2115_v17  ;;  %v2994_v30 = vmul.f32 -1.442695, %v2126_v47  ;;  %v6919_v49 = vld [vmem:[#allocation65_spill] sm:$0xff]  ;;  %v6920_v17 = vld [vmem:[#allocation66_spill] sm:$0xff] }
 0x51a   :  { %v5650_v24 = vadd.f32 %v2104_v20, %v2103_v19  ;;  %v6922_v19 = vld [vmem:[#allocation68_spill] sm:$0xff]  ;;  %v6923_v20 = vld [vmem:[#allocation70_spill] sm:$0xff] }
 0x51b   :  { %3161 = vpow2.f32 %v2993_v21  ;;  %v6924_v21 = vld [vmem:[#allocation72_spill] sm:$0xff] }
 0x51c   :  { %3163 = vrcp.f32 %v2100_v18  ;;  %v6921_v18 = vld [vmem:[#allocation67_spill] sm:$0xff] }
 0x51d   :  { %3165 = vtanh.f32 %v5650_v24 }
 0x51e   :  { %3167 = vpow2.f32 %v2994_v30 }
 0x526   :  { %v3160_v57 = vpop.eup %3159 }
 0x527   :  { %v2111_v56 = vadd.f32 1.0, %v3160_v57  ;;  %v3383_v57 = vld [vmem:[%s6157_s2 + $0x188] sm:$0xff] }
 0x528   :  { %v3162_v58 = vpop.eup %3161 }
 0x529   :  { %v3164_v59 = vpop.eup %3163  ;;  %3169 = vrcp.f32 %v2111_v56  ;;  %v2120_v61 = vadd.f32 1.0, %v3162_v58  ;;  %v3385_v56 = vld [vmem:[%s6157_s2 + $0x180] sm:$0xff]  ;;  %v3386_v58 = vld [vmem:[%s6157_s2 + $0x190] sm:$0xff] }
 0x52a   :  { %v3166_v28 = vpop.eup %3165  ;;  %3171 = vtanh.f32 %v2123_v3  ;;  %v3384_v3 = vld [vmem:[%s6157_s2 + $0x198] sm:$0xff] }
 0x52b   :  { %3173 = vrcp.f32 %v2120_v61  ;;  %v2107_v62 = vmul.f32 %v3166_v28, %v3164_v59  ;;  %v3387_v59 = vld [vmem:[%s6157_s2 + $0x168] sm:$0xff]  ;;  %v3388_v61 = vld [vmem:[%s6157_s2 + $0x178] sm:$0xff]  ;;  %v3389_v28 = vld [vmem:[%s6157_s2 + $0x160] sm:$0xff] }
 0x52d   :  { %2995 = vst [vmem:[%s6161_s4 + $0x8] sm:$0x3] %v2107_v62  ;;  %2210 = vmatmul.mubr.f32.vlgmr.msra.gmra.mxu0 %v2107_v62  ;;  %2281 = vmatmul.mubr.f32.vlgmr.msra.gmra.mxu1 %v2107_v62  ;;  %v3390_v62 = vld [vmem:[%s6157_s2 + $0x170] sm:$0xff] }
 0x52e   :  { %2313 = vmatpush1.msra.mxu0 %v5037_v45  ;;  %2384 = vmatpush1.msra.mxu1 %v5043_v53  ;;  %v3168_v45 = vpop.eup %3167  ;;  %v6895_v53 = vld [vmem:[#allocation35_spill] sm:$0xff] }
 0x52f   :  { %2314 = vmatprep.subr.mxu0 %v5049_v51  ;;  %2385 = vmatprep.subr.mxu1 %v5055_v8  ;;  %v6896_v8 = vld [vmem:[#allocation36_spill] sm:$0xff] }
 0x530   :  { %2315 = vmatpush1.msra.mxu0 %v5061_v9  ;;  %2386 = vmatpush1.msra.mxu1 %v5067_v10  ;;  %v6897_v10 = vld [vmem:[#allocation38_spill] sm:$0xff] }
 0x531   :  { %2316 = vmatprep.subr.mxu0 %v5073_v40  ;;  %2387 = vmatprep.subr.mxu1 %v5079_v7  ;;  %v6898_v40 = vld [vmem:[#allocation39_spill] sm:$0xff] }
 0x532   :  { %2317 = vmatpush1.msra.mxu0 %v5085_v37  ;;  %2388 = vmatpush1.msra.mxu1 %v5091_v5  ;;  %v2131_v37 = vadd.f32 1.0, %v3168_v45  ;;  %v6899_v5 = vld [vmem:[#allocation40_spill] sm:$0xff]  ;;  %v3391_v45 = vld [vmem:[%s6157_s2 + $0x148] sm:$0xff] }
 0x533   :  { %2318 = vmatprep.subr.mxu0 %v6808_v22  ;;  %2389 = vmatprep.subr.mxu1 %v6809_v29  ;;  %v6900_v22 = vld [vmem:[#allocation41_spill] sm:$0xff]  ;;  %v6901_v29 = vld [vmem:[#allocation42_spill] sm:$0xff] }
 0x534   :  { %2319 = vmatpush1.msra.mxu0 %v6810_v1  ;;  %2390 = vmatpush1.msra.mxu1 %v6811_v31  ;;  %v6902_v1 = vld [vmem:[#allocation43_spill] sm:$0xff]  ;;  %3175 = vrcp.f32 %v2131_v37 }
 0x535   :  { %2320 = vmatprep.subr.mxu0 %v6812_v33  ;;  %2391 = vmatprep.subr.mxu1 %v6895_v53  ;;  %v3392_v53 = vld [vmem:[%s6157_s2 + $0x158] sm:$0xff]  ;;  %v3399_v37 = vld [vmem:[%s6157_s2 + $0x108] sm:$0xff] }
 0x536   :  { %v3170_v51 = vpop.eup %3169  ;;  %2321 = vmatpush1.msra.mxu0 %v6896_v8  ;;  %2392 = vmatpush1.msra.mxu1 %v6815_v39  ;;  %v6903_v39 = vld [vmem:[#allocation45_spill] sm:$0xff]  ;;  %v3394_v8 = vld [vmem:[%s6157_s2 + $0x150] sm:$0xff] }
 0x537   :  { %v3172_v9 = vpop.eup %3171  ;;  %2322 = vmatprep.subr.mxu0 %v6897_v10  ;;  %2393 = vmatprep.subr.mxu1 %v6898_v40  ;;  %v3396_v10 = vld [vmem:[%s6157_s2 + $0x138] sm:$0xff]  ;;  %v3397_v40 = vld [vmem:[%s6157_s2 + $0x120] sm:$0xff] }
 0x538   :  { %v3174_v7 = vpop.eup %3173  ;;  %2323 = vmatpush1.msra.mxu0 %v6899_v5  ;;  %2394 = vmatpush1.msra.mxu1 %v6900_v22  ;;  %v2135_v33 = vmul.f32 %v3172_v9, %v3170_v51  ;;  %v3393_v51 = vld [vmem:[%s6157_s2 + $0x140] sm:$0xff]  ;;  %v3395_v9 = vld [vmem:[%s6157_s2 + $0x128] sm:$0xff]  ;;  %v3400_v5 = vld [vmem:[%s6157_s2 + $0x118] sm:$0xff] }
 0x539   :  { %2324 = vmatprep.subr.mxu0 %v6901_v29  ;;  %2395 = vmatprep.subr.mxu1 %v6902_v1  ;;  %v2134_v31 = vmul.f32 %v3174_v7, %v5529_v32  ;;  %v6911_v32 = vld [vmem:[#allocation54_spill] sm:$0xff]  ;;  %v3398_v7 = vld [vmem:[%s6157_s2 + $0x130] sm:$0xff]  ;;  %v3403_v1 = vld [vmem:[%s6157_s2 + $0xe8] sm:$0xff] }
 0x53a   :  { %2325 = vmatpush1.msra.mxu0 %v5182_v52  ;;  %2396 = vmatpush1.msra.mxu1 %v5188_v0  ;;  %v6908_v52 = vld [vmem:[#allocation50_spill] sm:$0xff]  ;;  %v6909_v0 = vld [vmem:[#allocation51_spill] sm:$0xff]  ;;  %v3402_v29 = vld [vmem:[%s6157_s2 + $0x110] sm:$0xff] }
 0x53b   :  { %2326 = vmatprep.subr.mxu0 %v6822_v6  ;;  %2397 = vmatprep.subr.mxu1 %v6903_v39  ;;  %v5685_v63 = vadd.f32 %v2135_v33, %v2134_v31  ;;  %v6910_v6 = vld [vmem:[#allocation52_spill] sm:$0xff]  ;;  %v3401_v22 = vld [vmem:[%s6157_s2 + $0x100] sm:$0xff]  ;;  %v3404_v31 = vld [vmem:[%s6157_s2 + $0xf8] sm:$0xff] }
 0x53c   :  { %2327 = vmatpush1.msra.mxu0 %v6904_v43  ;;  %2398 = vmatpush1.msra.mxu1 %v6905_v55  ;;  %v3405_v33 = vld [vmem:[%s6157_s2 + $0xe0] sm:$0xff]  ;;  %v3406_v39 = vld [vmem:[%s6157_s2 + $0xf0] sm:$0xff]  ;;  %v3407_v43 = vld [vmem:[%s6157_s2 + $0xc8] sm:$0xff] }
 0x53d   :  { %2328 = vmatprep.subr.mxu0 %v6906_v48  ;;  %2399 = vmatprep.subr.mxu1 %v6907_v50  ;;  %3177 = vtanh.f32 %v5685_v63  ;;  %v3408_v55 = vld [vmem:[%s6157_s2 + $0xd8] sm:$0xff]  ;;  %v3409_v48 = vld [vmem:[%s6157_s2 + $0xc0] sm:$0xff]  ;;  %v3410_v50 = vld [vmem:[%s6157_s2 + $0xd0] sm:$0xff] }
 0x53e   :  { %2329 = vmatpush1.msra.mxu0 %v6908_v52  ;;  %2400 = vmatpush1.msra.mxu1 %v6909_v0  ;;  %v3411_v52 = vld [vmem:[%s6157_s2 + $0xa8] sm:$0xff]  ;;  %v3412_v0 = vld [vmem:[%s6157_s2 + $0xb8] sm:$0xff] }
 0x53f   :  { %2330 = vmatprep.subr.mxu0 %v6910_v6  ;;  %2401 = vmatprep.subr.mxu1 %v6911_v32  ;;  %v3413_v6 = vld [vmem:[%s6157_s2 + $0xa0] sm:$0xff]  ;;  %v3414_v32 = vld [vmem:[%s6157_s2 + $0xb0] sm:$0xff] }
 0x540   :  { %2331 = vmatpush1.msra.mxu0 %v6912_v44  ;;  %2402 = vmatpush1.msra.mxu1 %v6913_v41  ;;  %v3415_v44 = vld [vmem:[%s6157_s2 + $0x88] sm:$0xff]  ;;  %v3416_v41 = vld [vmem:[%s6157_s2 + $0x98] sm:$0xff] }
 0x541   :  { %2332 = vmatprep.subr.mxu0 %v6914_v12  ;;  %2403 = vmatprep.subr.mxu1 %v6915_v13  ;;  %v3176_v47 = vpop.eup %3175  ;;  %v3417_v12 = vld [vmem:[%s6157_s2 + $0x80] sm:$0xff]  ;;  %v3418_v13 = vld [vmem:[%s6157_s2 + $0x90] sm:$0xff] }
 0x542   :  { %2333 = vmatpush1.msra.mxu0 %v6916_v14  ;;  %2404 = vmatpush1.msra.mxu1 %v6917_v16  ;;  %v3419_v14 = vld [vmem:[%s6157_s2 + $0x68] sm:$0xff]  ;;  %v3420_v16 = vld [vmem:[%s6157_s2 + $0x78] sm:$0xff] }
 0x543   :  { %2334 = vmatprep.subr.mxu0 %v6918_v36  ;;  %2405 = vmatprep.subr.mxu1 %v6919_v49  ;;  %v3421_v36 = vld [vmem:[%s6157_s2 + $0x60] sm:$0xff]  ;;  %v3422_v49 = vld [vmem:[%s6157_s2 + $0x70] sm:$0xff] }
 0x544   :  { %2335 = vmatpush1.msra.mxu0 %v6920_v17  ;;  %2406 = vmatpush1.msra.mxu1 %v6921_v18  ;;  %v3423_v17 = vld [vmem:[%s6157_s2 + $0x48] sm:$0xff]  ;;  %v3424_v18 = vld [vmem:[%s6157_s2 + $0x58] sm:$0xff] }
 0x545   :  { %2336 = vmatprep.subr.mxu0 %v6922_v19  ;;  %2407 = vmatprep.subr.mxu1 %v6843_v34  ;;  %v3425_v19 = vld [vmem:[%s6157_s2 + $0x40] sm:$0xff] }
 0x546   :  { %2337 = vmatpush1.msra.mxu0 %v6923_v20  ;;  %2408 = vmatpush1.msra.mxu1 %v6845_v23  ;;  %v3382_v23 = vld [vmem:[%s6157_s2 + $0x1b0] sm:$0xff] }
 0x547   :  { %2338 = vmatprep.subr.mxu0 %v6924_v21  ;;  %2409 = vmatprep.subr.mxu1 %v6847_v4  ;;  %v3377_v4 = vld [vmem:[%s6157_s2 + $0x1c0] sm:$0xff]  ;;  %v3426_v20 = vld [vmem:[%s6157_s2 + $0x50] sm:$0xff]  ;;  %v3427_v21 = vld [vmem:[%s6157_s2 + $0x28] sm:$0xff] }
 0x548   :  { %2339 = vmatpush1.msra.mxu0 %v6848_v27  ;;  %2410 = vmatpush1.msra.mxu1 %v6849_v25  ;;  %v3376_v25 = vld [vmem:[%s6157_s2 + $0x1d8] sm:$0xff]  ;;  %v3378_v27 = vld [vmem:[%s6157_s2 + $0x1d0] sm:$0xff] }
 0x549   :  { %2340 = vmatprep.subr.mxu0 %v6850_v46  ;;  %2411 = vmatprep.subr.mxu1 %v6851_v38  ;;  %v3379_v46 = vld [vmem:[%s6157_s2 + $0x1a8] sm:$0xff]  ;;  %v3380_v38 = vld [vmem:[%s6157_s2 + $0x1b8] sm:$0xff] }
 0x54a   :  { %v3178_v30 = vpop.eup %3177  ;;  %2341 = vmatpush1.msra.mxu0 %v6852_v26  ;;  %2412 = vmatpush1.msra.mxu1 %v5383_v35  ;;  %v3371_v35 = vld [vmem:[%s6157_s2 + $0x1e8] sm:$0xff] }
 0x54b   :  { %2342 = vmatprep.subr.mxu0 %v6853_v11  ;;  %2413 = vmatprep.subr.mxu1 %v5395_v2  ;;  %v2138_v34 = vmul.f32 %v3178_v30, %v3176_v47  ;;  %v3374_v2 = vld [vmem:[%s6157_s2 + $0x1f0] sm:$0xff]  ;;  %v3375_v26 = vld [vmem:[%s6157_s2 + $0x1c8] sm:$0xff]  ;;  %v3381_v11 = vld [vmem:[%s6157_s2 + $0x1a0] sm:$0xff] }
 0x54c   :  { %2343 = vmatpush1.msra.mxu0 %v5401_v42  ;;  %2376 = vmatprep.mubr.f32.mxu0 %v6507_v60  ;;  %v3372_v42 = vld [vmem:[%s6157_s2 + $0x1f8] sm:$0xff]  ;;  %v3429_v30 = vld [vmem:[%s6157_s2 + $0x20] sm:$0xff] }
 0x54d   :  { %2414 = vmatpush1.msra.mxu1 %v5408_v54  ;;  %2447 = vmatprep.mubr.f32.mxu1 %v6507_v60  ;;  %2996 = vst [vmem:[%s6162_s5 + $0x8] sm:$0x3] %v2138_v34  ;;  %v3373_v54 = vld [vmem:[%s6157_s2 + $0x1e0] sm:$0xff]  ;;  %v3428_v47 = vld [vmem:[%s6157_s2 + $0x38] sm:$0xff] }
 0x54e   :  { %2377 = vmatmul.mubr.f32.vlgmr.msra.gmra.mxu0 %v2138_v34  ;;  %2448 = vmatmul.mubr.f32.vlgmr.msra.gmra.mxu1 %v2138_v34  ;;  %v3430_v34 = vld [vmem:[%s6157_s2 + $0x30] sm:$0xff] }
 0x54f   :  { %2545 = vmatprep.subr.mxu0 %v3371_v35  ;;  %2616 = vmatprep.subr.mxu1 %v3372_v42  ;;  %v3431_v35 = vld [vmem:[%s6157_s2 + $0x8] sm:$0xff]  ;;  %v3432_v42 = vld [vmem:[%s6157_s2 + $0x18] sm:$0xff] }
 0x550   :  { %2546 = vmatpush1.msra.mxu0 %v3373_v54  ;;  %2617 = vmatpush1.msra.mxu1 %v3374_v2  ;;  %v3433_v54 = vld [vmem:[%s6157_s2] sm:$0xff]  ;;  %v3434_v2 = vld [vmem:[%s6157_s2 + $0x10] sm:$0xff] }
 0x551   :  { %2547 = vmatprep.subr.mxu0 %v3375_v26  ;;  %2618 = vmatprep.subr.mxu1 %v3376_v25  ;;  %v3435_v26 = vld [vmem:[%s6158_s3 + $0x1e8] sm:$0xff]  ;;  %v3436_v25 = vld [vmem:[%s6158_s3 + $0x1f8] sm:$0xff] }
 0x552   :  { %2548 = vmatpush1.msra.mxu0 %v3377_v4  ;;  %2619 = vmatpush1.msra.mxu1 %v3378_v27 }
 0x553   :  { %2549 = vmatprep.subr.mxu0 %v3379_v46  ;;  %2620 = vmatprep.subr.mxu1 %v3380_v38 }
 0x554   :  { %2550 = vmatpush1.msra.mxu0 %v3381_v11  ;;  %2621 = vmatpush1.msra.mxu1 %v3382_v23 }
 0x555   :  { %2551 = vmatprep.subr.mxu0 %v3383_v57  ;;  %2622 = vmatprep.subr.mxu1 %v3384_v3 }
 0x556   :  { %2552 = vmatpush1.msra.mxu0 %v3385_v56  ;;  %2623 = vmatpush1.msra.mxu1 %v3386_v58  ;;  %v2997_v56 = vld [vmem:[%s6159_s0 + $0x28] sm:$0xff] }
 0x557   :  { %2553 = vmatprep.subr.mxu0 %v3387_v59  ;;  %2624 = vmatprep.subr.mxu1 %v3388_v61 }
 0x558   :  { %2554 = vmatpush1.msra.mxu0 %v3389_v28  ;;  %2625 = vmatpush1.msra.mxu1 %v3390_v62 }
 0x559   :  { %2555 = vmatprep.subr.mxu0 %v3391_v45  ;;  %2626 = vmatprep.subr.mxu1 %v3392_v53 }
 0x55a   :  { %2556 = vmatpush1.msra.mxu0 %v3393_v51  ;;  %2627 = vmatpush1.msra.mxu1 %v3394_v8 }
 0x55b   :  { %2557 = vmatprep.subr.mxu0 %v3395_v9  ;;  %2628 = vmatprep.subr.mxu1 %v3396_v10 }
 0x55c   :  { %2558 = vmatpush1.msra.mxu0 %v3397_v40  ;;  %2629 = vmatpush1.msra.mxu1 %v3398_v7 }
 0x55d   :  { %2559 = vmatprep.subr.mxu0 %v3399_v37  ;;  %2630 = vmatprep.subr.mxu1 %v3400_v5 }
 0x55e   :  { %2560 = vmatpush1.msra.mxu0 %v3401_v22  ;;  %2631 = vmatpush1.msra.mxu1 %v3402_v29 }
 0x55f   :  { %2561 = vmatprep.subr.mxu0 %v3403_v1  ;;  %2632 = vmatprep.subr.mxu1 %v3404_v31 }
 0x560   :  { %2562 = vmatpush1.msra.mxu0 %v3405_v33  ;;  %2633 = vmatpush1.msra.mxu1 %v3406_v39  ;;  %v2998_v39 = vld [vmem:[%s6160_s1 + $0x28] sm:$0xff] }
 0x561   :  { %2563 = vmatprep.subr.mxu0 %v3407_v43  ;;  %2634 = vmatprep.subr.mxu1 %v3408_v55 }
 0x562   :  { %2564 = vmatpush1.msra.mxu0 %v3409_v48  ;;  %2635 = vmatpush1.msra.mxu1 %v3410_v50 }
 0x563   :  { %2565 = vmatprep.subr.mxu0 %v3411_v52  ;;  %2636 = vmatprep.subr.mxu1 %v3412_v0 }
 0x564   :  { %2566 = vmatpush1.msra.mxu0 %v3413_v6  ;;  %2637 = vmatpush1.msra.mxu1 %v3414_v32 }
 0x565   :  { %2567 = vmatprep.subr.mxu0 %v3415_v44  ;;  %2638 = vmatprep.subr.mxu1 %v3416_v41 }
 0x566   :  { %2568 = vmatpush1.msra.mxu0 %v3417_v12  ;;  %2639 = vmatpush1.msra.mxu1 %v3418_v13 }
 0x567   :  { %2569 = vmatprep.subr.mxu0 %v3419_v14  ;;  %2640 = vmatprep.subr.mxu1 %v3420_v16 }
 0x568   :  { %2570 = vmatpush1.msra.mxu0 %v3421_v36  ;;  %2641 = vmatpush1.msra.mxu1 %v3422_v49 }
 0x569   :  { %2571 = vmatprep.subr.mxu0 %v3423_v17  ;;  %2642 = vmatprep.subr.mxu1 %v3424_v18 }
 0x56a   :  { %2572 = vmatpush1.msra.mxu0 %v3425_v19  ;;  %2643 = vmatpush1.msra.mxu1 %v3426_v20 }
 0x56b   :  { %2573 = vmatprep.subr.mxu0 %v3427_v21  ;;  %2644 = vmatprep.subr.mxu1 %v3428_v47 }
 0x56c   :  { %2574 = vmatpush1.msra.mxu0 %v3429_v30  ;;  %2645 = vmatpush1.msra.mxu1 %v3430_v34  ;;  %v3437_v30 = vld [vmem:[%s6158_s3 + $0x1e0] sm:$0xff]  ;;  %v3438_v34 = vld [vmem:[%s6158_s3 + $0x1f0] sm:$0xff] }
 0x56d   :  { %2575 = vmatprep.subr.mxu0 %v3431_v35  ;;  %2646 = vmatprep.subr.mxu1 %v3432_v42  ;;  %v3439_v35 = vld [vmem:[%s6158_s3 + $0x1c8] sm:$0xff]  ;;  %v3440_v42 = vld [vmem:[%s6158_s3 + $0x1d8] sm:$0xff] }
 0x56e   :  { %2576 = vmatpush1.msra.mxu0 %v3433_v54  ;;  %2609 = vmatprep.mubr.f32.mxu0 %v6507_v60  ;;  %v3441_v54 = vld [vmem:[%s6158_s3 + $0x1c0] sm:$0xff] }
 0x56f   :  { %2647 = vmatpush1.msra.mxu1 %v3434_v2  ;;  %2680 = vmatprep.mubr.f32.mxu1 %v6507_v60  ;;  %v3442_v2 = vld [vmem:[%s6158_s3 + $0x1d0] sm:$0xff] }
 0x570   :  { %2712 = vmatprep.subr.mxu0 %v3435_v26  ;;  %2783 = vmatprep.subr.mxu1 %v3436_v25  ;;  %v3443_v26 = vld [vmem:[%s6158_s3 + $0x1a8] sm:$0xff]  ;;  %v3444_v25 = vld [vmem:[%s6158_s3 + $0x1b8] sm:$0xff] }
 0x5ed   :  { %v2211_v4 = vpop.f32.mrf.mxu0  ;;  %v2282_v27 = vpop.f32.mrf.mxu1 }
 0x5ef   :  { %v2213_v46 = vpop.f32.mrf.mxu0  ;;  %v2284_v38 = vpop.f32.mrf.mxu1 }
 0x5f0   :  { %v2291_v11 = vcombine.low %v2211_v4, %v2213_v46  ;;  %v2292_v23 = vcombine.low %v2282_v27, %v2284_v38  ;;  %v3445_v4 = vld [vmem:[%s6158_s3 + $0x1a0] sm:$0xff]  ;;  %v3446_v27 = vld [vmem:[%s6158_s3 + $0x1b0] sm:$0xff]  ;;  %v3447_v46 = vld [vmem:[%s6158_s3 + $0x188] sm:$0xff] }
 0x5f1   :  { %v3448_v38 = vld [vmem:[%s6158_s3 + $0x198] sm:$0xff] }
 0x5f2   :  { %v2299_v57 = vrot.slane %v2291_v11, %v6894_v15  ;;  %v2306_v3 = vrot.slane %v2292_v23, %v6894_v15  ;;  %v3449_v11 = vld [vmem:[%s6158_s3 + $0x180] sm:$0xff]  ;;  %v3450_v23 = vld [vmem:[%s6158_s3 + $0x190] sm:$0xff] }
 0x5f4   :  { %v2307_v58 = vcombine.low %v2299_v57, %v2306_v3  ;;  %v3451_v3 = vld [vmem:[%s6158_s3 + $0x168] sm:$0xff] }
 0x5f6   :  { %v2309_v59 = vadd.f32 %v2997_v56, %v2307_v58  ;;  %v3452_v56 = vld [vmem:[%s6158_s3 + $0x178] sm:$0xff] }
 0x5f8   :  { %v2999_v61 = vmul.f32 -1.442695, %v2309_v59  ;;  %v2484_v28 = vrot.slane %v2309_v59, 2  ;;  %v2495_v45 = vrot.slane %v2309_v59, 6  ;;  %v2492_v8 = vrot.slane %v2309_v59, 4  ;;  %v3453_v59 = vld [vmem:[%s6158_s3 + $0x160] sm:$0xff] }
 0x5fa   :  { %3179 = vpow2.f32 %v2999_v61  ;;  %v3000_v62 = vmul.f32 -1.442695, %v2484_v28  ;;  %v3001_v53 = vmul.f32 -1.442695, %v2495_v45  ;;  %v3454_v61 = vld [vmem:[%s6158_s3 + $0x170] sm:$0xff]  ;;  %v3456_v45 = vld [vmem:[%s6158_s3 + $0x158] sm:$0xff] }
 0x5fc   :  { %3181 = vpow2.f32 %v3000_v62  ;;  %v3455_v62 = vld [vmem:[%s6158_s3 + $0x148] sm:$0xff] }
 0x5fd   :  { %3183 = vpow2.f32 %v3001_v53 }
 0x607   :  { %v3180_v51 = vpop.eup %3179 }
 0x608   :  { %v2480_v9 = vadd.f32 1.0, %v3180_v51 }
 0x609   :  { %v3182_v10 = vpop.eup %3181 }
 0x60a   :  { %3185 = vrcp.f32 %v2480_v9  ;;  %v2489_v40 = vadd.f32 1.0, %v3182_v10  ;;  %v3184_v55 = vpop.eup %3183  ;;  %v3458_v9 = vld [vmem:[%s6158_s3 + $0x150] sm:$0xff]  ;;  %v3459_v10 = vld [vmem:[%s6158_s3 + $0x128] sm:$0xff] }
 0x60b   :  { %3187 = vtanh.f32 %v2492_v8  ;;  %v2500_v44 = vadd.f32 1.0, %v3184_v55  ;;  %v3457_v8 = vld [vmem:[%s6158_s3 + $0x140] sm:$0xff] }
 0x60c   :  { %3189 = vrcp.f32 %v2489_v40  ;;  %v3460_v40 = vld [vmem:[%s6158_s3 + $0x138] sm:$0xff]  ;;  %v3469_v55 = vld [vmem:[%s6158_s3 + $0xe0] sm:$0xff] }
 0x60e   :  { %v2378_v7 = vpop.f32.mrf.mxu0  ;;  %v2449_v37 = vpop.f32.mrf.mxu1 }
 0x610   :  { %v2380_v5 = vpop.f32.mrf.mxu0  ;;  %v2451_v22 = vpop.f32.mrf.mxu1 }
 0x611   :  { %v2458_v29 = vcombine.low %v2378_v7, %v2380_v5  ;;  %v2459_v1 = vcombine.low %v2449_v37, %v2451_v22  ;;  %v3461_v5 = vld [vmem:[%s6158_s3 + $0x120] sm:$0xff]  ;;  %v3462_v22 = vld [vmem:[%s6158_s3 + $0x130] sm:$0xff] }
 0x613   :  { %v2466_v31 = vrot.slane %v2458_v29, %v6894_v15  ;;  %v2473_v33 = vrot.slane %v2459_v1, %v6894_v15  ;;  %v3463_v29 = vld [vmem:[%s6158_s3 + $0x108] sm:$0xff] }
 0x615   :  { %v2474_v43 = vcombine.low %v2466_v31, %v2473_v33  ;;  %v3465_v31 = vld [vmem:[%s6158_s3 + $0x100] sm:$0xff]  ;;  %v3466_v33 = vld [vmem:[%s6158_s3 + $0x110] sm:$0xff] }
 0x617   :  { %v3186_v48 = vpop.eup %3185  ;;  %v2476_v50 = vadd.f32 %v2998_v39, %v2474_v43  ;;  %v3467_v39 = vld [vmem:[%s6158_s3 + $0xe8] sm:$0xff]  ;;  %v3468_v43 = vld [vmem:[%s6158_s3 + $0xf8] sm:$0xff] }
 0x618   :  { %v3188_v52 = vpop.eup %3187 }
 0x619   :  { %v3190_v0 = vpop.eup %3189  ;;  %v3002_v6 = vmul.f32 -1.442695, %v2476_v50  ;;  %v2515_v32 = vrot.slane %v2476_v50, 2  ;;  %v2504_v12 = vmul.f32 %v3188_v52, %v3186_v48  ;;  %v2526_v16 = vrot.slane %v2476_v50, 6  ;;  %v3470_v48 = vld [vmem:[%s6158_s3 + $0xf0] sm:$0xff]  ;;  %v3472_v52 = vld [vmem:[%s6158_s3 + $0xd8] sm:$0xff] }
 0x61a   :  { %v2503_v41 = vmul.f32 %v3190_v0, %v5650_v24  ;;  %v2523_v17 = vrot.slane %v2476_v50, 4  ;;  %v3471_v50 = vld [vmem:[%s6158_s3 + $0xc8] sm:$0xff]  ;;  %v3473_v0 = vld [vmem:[%s6158_s3 + $0xc0] sm:$0xff] }
 0x61b   :  { %3191 = vpow2.f32 %v3002_v6  ;;  %v3003_v13 = vmul.f32 -1.442695, %v2515_v32  ;;  %v3004_v36 = vmul.f32 -1.442695, %v2526_v16  ;;  %v3474_v6 = vld [vmem:[%s6158_s3 + $0xd0] sm:$0xff]  ;;  %v3475_v32 = vld [vmem:[%s6158_s3 + $0xa8] sm:$0xff] }
 0x61c   :  { %v5938_v14 = vadd.f32 %v2504_v12, %v2503_v41  ;;  %v3477_v41 = vld [vmem:[%s6158_s3 + $0xa0] sm:$0xff]  ;;  %v3478_v12 = vld [vmem:[%s6158_s3 + $0xb0] sm:$0xff]  ;;  %v3480_v16 = vld [vmem:[%s6158_s3 + $0x98] sm:$0xff] }
 0x61d   :  { %3193 = vpow2.f32 %v3003_v13  ;;  %v3479_v13 = vld [vmem:[%s6158_s3 + $0x88] sm:$0xff] }
 0x61e   :  { %3195 = vrcp.f32 %v2500_v44  ;;  %v3476_v44 = vld [vmem:[%s6158_s3 + $0xb8] sm:$0xff] }
 0x61f   :  { %3197 = vtanh.f32 %v5938_v14 }
 0x620   :  { %3199 = vpow2.f32 %v3004_v36  ;;  %v3481_v36 = vld [vmem:[%s6158_s3 + $0x80] sm:$0xff] }
 0x628   :  { %v3192_v49 = vpop.eup %3191 }
 0x629   :  { %v2511_v18 = vadd.f32 1.0, %v3192_v49  ;;  %v3482_v49 = vld [vmem:[%s6158_s3 + $0x90] sm:$0xff] }
 0x62a   :  { %v3194_v19 = vpop.eup %3193 }
 0x62b   :  { %v3196_v20 = vpop.eup %3195  ;;  %3201 = vrcp.f32 %v2511_v18  ;;  %v2520_v21 = vadd.f32 1.0, %v3194_v19  ;;  %v3484_v18 = vld [vmem:[%s6158_s3 + $0x78] sm:$0xff]  ;;  %v3485_v19 = vld [vmem:[%s6158_s3 + $0x60] sm:$0xff] }
 0x62c   :  { %v3198_v24 = vpop.eup %3197  ;;  %3203 = vtanh.f32 %v2523_v17  ;;  %v3483_v17 = vld [vmem:[%s6158_s3 + $0x68] sm:$0xff] }
 0x62d   :  { %3205 = vrcp.f32 %v2520_v21  ;;  %v2507_v47 = vmul.f32 %v3198_v24, %v3196_v20  ;;  %v3200_v57 = vpop.eup %3199  ;;  %v3486_v20 = vld [vmem:[%s6158_s3 + $0x70] sm:$0xff]  ;;  %v3487_v21 = vld [vmem:[%s6158_s3 + $0x48] sm:$0xff]  ;;  %v3488_v24 = vld [vmem:[%s6158_s3 + $0x58] sm:$0xff] }
 0x62e   :  { %v2531_v51 = vadd.f32 1.0, %v3200_v57 }
 0x62f   :  { %3005 = vst [vmem:[%s6161_s4 + $0xa] sm:$0x3] %v2507_v47  ;;  %2610 = vmatmul.mubr.f32.vlgmr.msra.gmra.mxu0 %v2507_v47  ;;  %2681 = vmatmul.mubr.f32.vlgmr.msra.gmra.mxu1 %v2507_v47  ;;  %v3489_v47 = vld [vmem:[%s6158_s3 + $0x40] sm:$0xff] }
 0x630   :  { %2713 = vmatpush1.msra.mxu0 %v3437_v30  ;;  %2784 = vmatpush1.msra.mxu1 %v3438_v34  ;;  %3207 = vrcp.f32 %v2531_v51  ;;  %v3490_v30 = vld [vmem:[%s6158_s3 + $0x50] sm:$0xff] }
 0x631   :  { %2714 = vmatprep.subr.mxu0 %v3439_v35  ;;  %2785 = vmatprep.subr.mxu1 %v3440_v42  ;;  %v3491_v35 = vld [vmem:[%s6158_s3 + $0x28] sm:$0xff]  ;;  %v3492_v42 = vld [vmem:[%s6158_s3 + $0x38] sm:$0xff] }
 0x632   :  { %2715 = vmatpush1.msra.mxu0 %v3441_v54  ;;  %2786 = vmatpush1.msra.mxu1 %v3442_v2  ;;  %v3493_v2 = vld [vmem:[%s6158_s3 + $0x20] sm:$0xff] }
 0x633   :  { %2716 = vmatprep.subr.mxu0 %v3443_v26  ;;  %2787 = vmatprep.subr.mxu1 %v3444_v25  ;;  %v3494_v26 = vld [vmem:[%s6158_s3 + $0x30] sm:$0xff]  ;;  %v3495_v25 = vld [vmem:[%s6158_s3 + $0x8] sm:$0xff] }
 0x634   :  { %2717 = vmatpush1.msra.mxu0 %v3445_v4  ;;  %2788 = vmatpush1.msra.mxu1 %v3446_v27  ;;  %v3496_v4 = vld [vmem:[%s6158_s3 + $0x18] sm:$0xff] }
 0x635   :  { %2718 = vmatprep.subr.mxu0 %v3447_v46  ;;  %2789 = vmatprep.subr.mxu1 %v3448_v38  ;;  %v3497_v46 = vld [vmem:[%s6158_s3] sm:$0xff]  ;;  %v3498_v38 = vld [vmem:[%s6158_s3 + $0x10] sm:$0xff] }
 0x636   :  { %2719 = vmatpush1.msra.mxu0 %v3449_v11  ;;  %2790 = vmatpush1.msra.mxu1 %v3450_v23 }
 0x637   :  { %2720 = vmatprep.subr.mxu0 %v3451_v3  ;;  %2791 = vmatprep.subr.mxu1 %v3452_v56 }
 0x638   :  { %v3202_v58 = vpop.eup %3201  ;;  %2721 = vmatpush1.msra.mxu0 %v3453_v59  ;;  %2792 = vmatpush1.msra.mxu1 %v3454_v61 }
 0x639   :  { %v3204_v28 = vpop.eup %3203  ;;  %2722 = vmatprep.subr.mxu0 %v3455_v62  ;;  %2793 = vmatprep.subr.mxu1 %v3456_v45 }
 0x63a   :  { %v3206_v53 = vpop.eup %3205  ;;  %2723 = vmatpush1.msra.mxu0 %v3457_v8  ;;  %2794 = vmatpush1.msra.mxu1 %v3458_v9  ;;  %v2535_v37 = vmul.f32 %v3204_v28, %v3202_v58 }
 0x63b   :  { %2724 = vmatprep.subr.mxu0 %v3459_v10  ;;  %2795 = vmatprep.subr.mxu1 %v3460_v40  ;;  %v2534_v7 = vmul.f32 %v3206_v53, %v5685_v63  ;;  %v3464_v63 = vld [vmem:[%s6158_s3 + $0x118] sm:$0xff] }
 0x63c   :  { %2725 = vmatpush1.msra.mxu0 %v3461_v5  ;;  %2796 = vmatpush1.msra.mxu1 %v3462_v22 }
 0x63d   :  { %2726 = vmatprep.subr.mxu0 %v3463_v29  ;;  %2797 = vmatprep.subr.mxu1 %v3464_v63  ;;  %v6029_v1 = vadd.f32 %v2535_v37, %v2534_v7  ;;  %v3208_v34 = vpop.eup %3207 }
 0x63e   :  { %2727 = vmatpush1.msra.mxu0 %v3465_v31  ;;  %2798 = vmatpush1.msra.mxu1 %v3466_v33 }
 0x63f   :  { %2728 = vmatprep.subr.mxu0 %v3467_v39  ;;  %2799 = vmatprep.subr.mxu1 %v3468_v43  ;;  %3209 = vtanh.f32 %v6029_v1 }
 0x640   :  { %2729 = vmatpush1.msra.mxu0 %v3469_v55  ;;  %2800 = vmatpush1.msra.mxu1 %v3470_v48  ;;  %v3008_v48 = vld [vmem:[%s6160_s1 + $0x30] sm:$0xff] }
 0x641   :  { %2730 = vmatprep.subr.mxu0 %v3471_v50  ;;  %2801 = vmatprep.subr.mxu1 %v3472_v52 }
 0x642   :  { %2731 = vmatpush1.msra.mxu0 %v3473_v0  ;;  %2802 = vmatpush1.msra.mxu1 %v3474_v6 }
 0x643   :  { %2732 = vmatprep.subr.mxu0 %v3475_v32  ;;  %2803 = vmatprep.subr.mxu1 %v3476_v44 }
 0x644   :  { %2733 = vmatpush1.msra.mxu0 %v3477_v41  ;;  %2804 = vmatpush1.msra.mxu1 %v3478_v12 }
 0x645   :  { %2734 = vmatprep.subr.mxu0 %v3479_v13  ;;  %2805 = vmatprep.subr.mxu1 %v3480_v16 }
 0x646   :  { %2735 = vmatpush1.msra.mxu0 %v3481_v36  ;;  %2806 = vmatpush1.msra.mxu1 %v3482_v49 }
 0x647   :  { %2736 = vmatprep.subr.mxu0 %v3483_v17  ;;  %2807 = vmatprep.subr.mxu1 %v3484_v18 }
 0x648   :  { %2737 = vmatpush1.msra.mxu0 %v3485_v19  ;;  %2808 = vmatpush1.msra.mxu1 %v3486_v20 }
 0x649   :  { %2738 = vmatprep.subr.mxu0 %v3487_v21  ;;  %2809 = vmatprep.subr.mxu1 %v3488_v24 }
 0x64a   :  { %2739 = vmatpush1.msra.mxu0 %v3489_v47  ;;  %2810 = vmatpush1.msra.mxu1 %v3490_v30 }
 0x64b   :  { %2740 = vmatprep.subr.mxu0 %v3491_v35  ;;  %2811 = vmatprep.subr.mxu1 %v3492_v42 }
 0x64c   :  { %v3210_v54 = vpop.eup %3209  ;;  %2741 = vmatpush1.msra.mxu0 %v3493_v2  ;;  %2812 = vmatpush1.msra.mxu1 %v3494_v26 }
 0x64d   :  { %2742 = vmatprep.subr.mxu0 %v3495_v25  ;;  %2813 = vmatprep.subr.mxu1 %v3496_v4  ;;  %v2538_v27 = vmul.f32 %v3210_v54, %v3208_v34 }
 0x64e   :  { %2743 = vmatpush1.msra.mxu0 %v3497_v46  ;;  %2776 = vmatprep.mubr.f32.mxu0 %v6507_v60 }
 0x64f   :  { %2814 = vmatpush1.msra.mxu1 %v3498_v38  ;;  %2847 = vmatprep.mubr.f32.mxu1 %v6507_v60  ;;  %3006 = vst [vmem:[%s6162_s5 + $0xa] sm:$0x3] %v2538_v27  ;;  %v3007_v60 = vld [vmem:[%s6159_s0 + $0x30] sm:$0xff] }
 0x650   :  { %2777 = vmatmul.mubr.f32.vlgmr.msra.gmra.mxu0 %v2538_v27  ;;  %2848 = vmatmul.mubr.f32.vlgmr.msra.gmra.mxu1 %v2538_v27 }
 0x6ef   :  { %v2611_v11 = vpop.f32.mrf.mxu0  ;;  %v2682_v23 = vpop.f32.mrf.mxu1 }
 0x6f1   :  { %v2613_v57 = vpop.f32.mrf.mxu0  ;;  %v2684_v3 = vpop.f32.mrf.mxu1 }
 0x6f2   :  { %v2691_v56 = vcombine.low %v2611_v11, %v2613_v57  ;;  %v2692_v58 = vcombine.low %v2682_v23, %v2684_v3 }
 0x6f4   :  { %v2699_v59 = vrot.slane %v2691_v56, %v6894_v15  ;;  %v2706_v61 = vrot.slane %v2692_v58, %v6894_v15 }
 0x6f6   :  { %v2707_v28 = vcombine.low %v2699_v59, %v2706_v61 }
 0x6f8   :  { %v2709_v62 = vadd.f32 %v3007_v60, %v2707_v28 }
 0x6fa   :  { %v3009_v45 = vmul.f32 -1.442695, %v2709_v62  ;;  %v2884_v53 = vrot.slane %v2709_v62, 2  ;;  %v2895_v8 = vrot.slane %v2709_v62, 6  ;;  %v2892_v40 = vrot.slane %v2709_v62, 4 }
 0x6fc   :  { %3211 = vpow2.f32 %v3009_v45  ;;  %v3010_v51 = vmul.f32 -1.442695, %v2884_v53  ;;  %v3011_v9 = vmul.f32 -1.442695, %v2895_v8 }
 0x6fe   :  { %3213 = vpow2.f32 %v3010_v51 }
 0x6ff   :  { %3215 = vpow2.f32 %v3011_v9 }
 0x709   :  { %v3212_v10 = vpop.eup %3211 }
 0x70a   :  { %v2880_v7 = vadd.f32 1.0, %v3212_v10 }
 0x70b   :  { %v3214_v37 = vpop.eup %3213 }
 0x70c   :  { %3217 = vrcp.f32 %v2880_v7  ;;  %v2889_v5 = vadd.f32 1.0, %v3214_v37  ;;  %v3216_v50 = vpop.eup %3215 }
 0x70d   :  { %3219 = vtanh.f32 %v2892_v40  ;;  %v2900_v44 = vadd.f32 1.0, %v3216_v50 }
 0x70e   :  { %3221 = vrcp.f32 %v2889_v5 }
 0x710   :  { %v2778_v22 = vpop.f32.mrf.mxu0  ;;  %v2849_v29 = vpop.f32.mrf.mxu1 }
 0x712   :  { %v2780_v63 = vpop.f32.mrf.mxu0  ;;  %v2851_v31 = vpop.f32.mrf.mxu1 }
 0x713   :  { %v2858_v33 = vcombine.low %v2778_v22, %v2780_v63  ;;  %v2859_v39 = vcombine.low %v2849_v29, %v2851_v31 }
 0x715   :  { %v2866_v43 = vrot.slane %v2858_v33, %v6894_v15  ;;  %v2873_v55 = vrot.slane %v2859_v39, %v6894_v15 }
 0x717   :  { %v2874_v52 = vcombine.low %v2866_v43, %v2873_v55 }
 0x719   :  { %v3218_v0 = vpop.eup %3217  ;;  %v2876_v6 = vadd.f32 %v3008_v48, %v2874_v52 }
 0x71a   :  { %v3220_v32 = vpop.eup %3219 }
 0x71b   :  { %v3222_v41 = vpop.eup %3221  ;;  %v3012_v12 = vmul.f32 -1.442695, %v2876_v6  ;;  %v2915_v13 = vrot.slane %v2876_v6, 2  ;;  %v2904_v36 = vmul.f32 %v3220_v32, %v3218_v0  ;;  %v2926_v17 = vrot.slane %v2876_v6, 6 }
 0x71c   :  { %v2903_v16 = vmul.f32 %v3222_v41, %v5938_v14  ;;  %v2923_v20 = vrot.slane %v2876_v6, 4 }
 0x71d   :  { %3223 = vpow2.f32 %v3012_v12  ;;  %v3013_v49 = vmul.f32 -1.442695, %v2915_v13  ;;  %v3014_v18 = vmul.f32 -1.442695, %v2926_v17 }
 0x71e   :  { %3225 = vrcp.f32 %v2900_v44  ;;  %v2905_v15 = vadd.f32 %v2904_v36, %v2903_v16 }
 0x71f   :  { %3227 = vpow2.f32 %v3013_v49 }
 0x720   :  { %3229 = vtanh.f32 %v2905_v15 }
 0x721   :  { %3231 = vpow2.f32 %v3014_v18 }
 0x72a   :  { %v3224_v19 = vpop.eup %3223 }
 0x72b   :  { %v3226_v21 = vpop.eup %3225  ;;  %v2911_v24 = vadd.f32 1.0, %v3224_v19 }
 0x72c   :  { %v3228_v47 = vpop.eup %3227 }
 0x72d   :  { %v3230_v30 = vpop.eup %3229  ;;  %3233 = vrcp.f32 %v2911_v24  ;;  %v2920_v34 = vadd.f32 1.0, %v3228_v47 }
 0x72e   :  { %v2907_v35 = vmul.f32 %v3230_v30, %v3226_v21  ;;  %3235 = vtanh.f32 %v2923_v20  ;;  %v3232_v14 = vpop.eup %3231 }
 0x72f   :  { %3237 = vrcp.f32 %v2920_v34  ;;  %v2931_v26 = vadd.f32 1.0, %v3232_v14 }
 0x730   :  { %3015 = vst [vmem:[%s6161_s4 + $0xc] sm:$0x3] %v2907_v35 }
 0x731   :  { %3239 = vrcp.f32 %v2931_v26 }
 0x73a   :  { %v3234_v42 = vpop.eup %3233 }
 0x73b   :  { %v3236_v54 = vpop.eup %3235 }
 0x73c   :  { %v3238_v2 = vpop.eup %3237  ;;  %v2935_v4 = vmul.f32 %v3236_v54, %v3234_v42 }
 0x73d   :  { %v2934_v25 = vmul.f32 %v3238_v2, %v6029_v1 }
 0x73e   :  { %v3240_v46 = vpop.eup %3239 }
 0x73f   :  { %v2936_v27 = vadd.f32 %v2935_v4, %v2934_v25 }
 0x741   :  { %3241 = vtanh.f32 %v2936_v27 }
 0x74e   :  { %v3242_v38 = vpop.eup %3241 }
 0x74f   :  { %v2938_v11 = vmul.f32 %v3242_v38, %v3240_v46 }
 0x751   :  { %3016 = vst [vmem:[%s6162_s5 + $0xc] sm:$0x3] %v2938_v11 }

</bundles_post_ra>
